<compile_context>
chip_gen: v5e
topology: v5e:2x2
jax: 0.10.0
libtpu: 0.0.40
codegen_flags: <defaults>
</compile_context>

<pallas_src>
import numpy as np
import jax
import jax.numpy as jnp
from jax.experimental import pallas as pl
from jax.experimental.pallas import tpu as pltpu

HPARAMS = dict(hidden=32, res_blocks=2, pol_feats=32, pol_dropout=0.3,
               val_feats=8, val_dropout=0.3)
EPS = 1e-5
LANE = 128
VALUE_LANE = 16      # lane of the fused output slab that carries the value scalar


def _round_up(n, m):
    return ((n + m - 1) // m) * m


def _pad2(a, rows, cols, col_off=0):
    out = np.zeros((rows, cols), dtype=np.float32)
    out[:a.shape[0], col_off:col_off + a.shape[1]] = a
    return out


# ----------------------------- parameter construction (glue) -----------------------------

def expand_conv_weight(w):
    """(Cout, Cin, 3, 3) conv weight -> (Cin*9, Cout*9) dense matrix implementing a
    3x3, padding=1 convolution on a 3x3 spatial grid in the flattened layout."""
    w = np.asarray(w, dtype=np.float32)
    cout, cin = w.shape[:2]
    wb = np.zeros((cin * 9, cout * 9), dtype=np.float32)
    for ci in range(cin):
        for co in range(cout):
            for py in range(3):
                for px in range(3):
                    for qy in range(3):
                        for qx in range(3):
                            dy, dx = qy - py + 1, qx - px + 1
                            if 0 <= dy < 3 and 0 <= dx < 3:
                                wb[ci * 9 + qy * 3 + qx, co * 9 + py * 3 + px] = w[co, ci, dy, dx]
    return wb


def init_params(hp):
    rng = np.random.default_rng(0)

    def conv_bn(cin, cout):
        return dict(
            w=rng.normal(0, 0.1, (cout, cin, 3, 3)).astype(np.float32),
            b=rng.normal(0, 0.1, (cout,)).astype(np.float32),
            gamma=rng.uniform(0.5, 1.5, (cout,)).astype(np.float32),
            beta=rng.normal(0, 0.1, (cout,)).astype(np.float32),
            mean=rng.normal(0, 0.1, (cout,)).astype(np.float32),
            var=rng.uniform(0.5, 1.5, (cout,)).astype(np.float32),
        )

    def linear(cin, cout):
        return dict(w=rng.normal(0, 0.1, (cout, cin)).astype(np.float32),
                    b=rng.normal(0, 0.1, (cout,)).astype(np.float32))

    def bn1d(c):
        return dict(gamma=rng.uniform(0.5, 1.5, (c,)).astype(np.float32),
                    beta=rng.normal(0, 0.1, (c,)).astype(np.float32),
                    mean=rng.normal(0, 0.1, (c,)).astype(np.float32),
                    var=rng.uniform(0.5, 1.5, (c,)).astype(np.float32))

    H, P, V = hp['hidden'], hp['pol_feats'], hp['val_feats']
    return dict(
        conv=conv_bn(3, H),
        res=[(conv_bn(H, H), conv_bn(H, H)) for _ in range(hp['res_blocks'])],
        pol_conv=conv_bn(H, P),
        pol_lin=linear(P * 9, 9),
        val_conv=conv_bn(H, V),
        val_lin2=linear(V * 9, 2 * V),
        val_bn2=bn1d(2 * V),
        val_lin3=linear(2 * V, 1),
    )


def _conv_bn_mats(p):
    """Expanded conv weight with eval-mode BN scale folded in, plus the per-column shift."""
    wexp = expand_conv_weight(p['w'])                               # (Cin*9, Cout*9)
    scale_c = p['gamma'] / np.sqrt(p['var'] + EPS)
    shift_c = (p['b'] - p['mean']) * scale_c + p['beta']
    w_scaled = wexp * np.repeat(scale_c, 9)[None, :]                # fold BN scale
    shift = np.repeat(shift_c, 9)[None, :]
    return w_scaled, shift


def flatten_for_kernel(P):
    """Flat tuple of kernel weight operands.

    Every tower conv-BN layer becomes (w_bf16, shift_f32) with the BN scale folded into the
    lane-padded expanded weight.  The two head convs are concatenated along N into one fused
    (384, 512) weight.  All widths are padded to multiples of 128 so every matmul operand and
    every activation is lane-dense."""
    flat = []

    def add_conv_bn(p):
        w, s = _conv_bn_mats(p)
        rows, cols = _round_up(w.shape[0], LANE), _round_up(w.shape[1], LANE)
        flat.append(jnp.asarray(_pad2(w, rows, cols), dtype=jnp.bfloat16))
        flat.append(jnp.asarray(_pad2(s, 1, cols), dtype=jnp.float32))

    # ---- residual tower ----
    add_conv_bn(P['conv'])
    for (p1, p2) in P['res']:
        add_conv_bn(p1)
        add_conv_bn(p2)

    # ---- fused policy-conv + value-conv: one (384, 384+128=512) matmul ----
    wp, sp = _conv_bn_mats(P['pol_conv'])     # (288, 288), (1, 288)
    wv, sv = _conv_bn_mats(P['val_conv'])     # (288, 72),  (1, 72)
    rows = _round_up(wp.shape[0], LANE)       # 384
    pcols = _round_up(wp.shape[1], LANE)      # 384
    vcols = _round_up(wv.shape[1], LANE)      # 128
    w_heads = np.concatenate([_pad2(wp, rows, pcols), _pad2(wv, rows, vcols)], axis=1)
    s_heads = np.concatenate([_pad2(sp, 1, pcols), _pad2(sv, 1, vcols)], axis=1)
    flat.append(jnp.asarray(w_heads, dtype=jnp.bfloat16))
    flat.append(jnp.asarray(s_heads, dtype=jnp.float32))

    # ---- policy linear ----
    wpl = P['pol_lin']['w'].T                 # (288, 9)
    bpl = P['pol_lin']['b'][None, :]
    flat.append(jnp.asarray(_pad2(wpl, pcols, LANE), dtype=jnp.bfloat16))
    flat.append(jnp.asarray(_pad2(bpl, 1, LANE), dtype=jnp.float32))

    # ---- value linear-2 with BN1d scale folded into the weight ----
    lin, bn = P['val_lin2'], P['val_bn2']
    scale = bn['gamma'] / np.sqrt(bn['var'] + EPS)
    shift = (lin['b'] - bn['mean']) * scale + bn['beta']
    w2 = lin['w'].T * scale[None, :]          # (72, 16)
    flat.append(jnp.asarray(_pad2(w2, vcols, LANE), dtype=jnp.bfloat16))
    flat.append(jnp.asarray(_pad2(shift[None, :], 1, LANE), dtype=jnp.float32))

    # ---- value linear-3: real column placed at VALUE_LANE so policy and value results can
    #      be summed exactly into one lane-dense output slab (all other lanes are 0). ----
    w3 = P['val_lin3']['w'].T                 # (16, 1)
    b3 = P['val_lin3']['b'][None, :]
    flat.append(jnp.asarray(_pad2(w3, LANE, LANE, col_off=VALUE_LANE), dtype=jnp.bfloat16))
    flat.append(jnp.asarray(_pad2(b3, 1, LANE, col_off=VALUE_LANE), dtype=jnp.float32))
    return tuple(flat)


# ----------------------------------- Pallas kernel -----------------------------------

def make_kernel(n_res, pol_w):
    # x + (1 + 2*n_res) tower layers * 2 + fused head conv * 2 + 3 linears * 2
    n_in = 11 + 4 * n_res

    def kernel(*refs):
        out_ref = refs[n_in]
        it = iter(refs[:n_in])
        nxt = lambda: next(it)

        def mm(a, w_ref):
            # bf16 x bf16 -> f32 accumulation on the MXU; weight read at point of use.
            return jnp.dot(a, w_ref[...], preferred_element_type=jnp.float32)

        def relu_bf16(acc, b_ref):
            # Fused bias + ReLU + downcast: activations carried as bf16 between matmuls.
            return jnp.maximum(acc + b_ref[...], 0.0).astype(jnp.bfloat16)

        x_ref = nxt()
        w0, b0 = nxt(), nxt()
        # ConvBlock: conv (+ folded BN scale) -> shift -> relu      (TB, 384) bf16
        h = relu_bf16(mm(x_ref[...], w0), b0)

        # ResBlocks (residual carried in bf16; the add happens in the f32 accumulator).
        for _ in range(n_res):
            w1, b1, w2, b2 = nxt(), nxt(), nxt(), nxt()
            h1 = relu_bf16(mm(h, w1), b1)
            acc2 = mm(h1, w2) + b2[...] + h.astype(jnp.float32)
            h = jnp.maximum(acc2, 0.0).astype(jnp.bfloat16)

        # Fused policy/value head convs: one (384, 512) matmul, split at a 128-aligned lane.
        wh, bh = nxt(), nxt()
        y = relu_bf16(mm(h, wh), bh)              # (TB, 512) bf16
        ph = y[:, :pol_w]                         # (TB, 384) policy conv features
        vh = y[:, pol_w:pol_w + LANE]             # (TB, 128) value conv features

        # Policy tail: dropout(identity) -> flatten(already flat) -> linear
        wpl, bpl = nxt(), nxt()
        pol = mm(ph, wpl) + bpl[...]              # (TB, 128) f32; lanes 9..127 are exactly 0

        # Value tail: linear + bn1d(folded) -> relu -> dropout(identity) -> linear -> tanh
        wv2, bv2 = nxt(), nxt()
        wv3, bv3 = nxt(), nxt()
        v2 = relu_bf16(mm(vh, wv2), bv2)
        val = jnp.tanh(mm(v2, wv3) + bv3[...])    # (TB, 128) f32; only lane VALUE_LANE nonzero

        # Single lane-dense output slab: policy in lanes 0..8, value in lane VALUE_LANE.
        # Both addends are exactly zero outside their own lanes, so the sum is exact.
        out_ref[...] = pol + val

    return kernel, n_in


def tictactoe_forward(x_nchw, flat_params, n_res, block_batch=2048):
    B = x_nchw.shape[0]
    x_flat = x_nchw.reshape(B, -1).astype(jnp.float32)      # (B, 27), PyTorch flatten order

    # Batch tile: multiple of 16 (bf16-native sublane tile), capped at block_batch; large
    # batches get >=4 grid steps so v7x megacore has >=2 steps per TensorCore.
    TB = min(block_batch, _round_up(B, 16))
    if B >= 64:
        TB = min(TB, _round_up(pl.cdiv(B, 4), 16))
    Bp = _round_up(B, TB)

    # Lane-pad the input to 128 and batch-pad to a multiple of TB (pad rows are ignored).
    # bf16 input is exact for real tic-tac-toe planes (0/±1); arbitrary float inputs see
    # bf16-grade rounding (the stated precision contract of this kernel).
    x_pad = jnp.zeros((Bp, LANE), dtype=jnp.bfloat16)
    x_pad = x_pad.at[:B, :x_flat.shape[1]].set(x_flat.astype(jnp.bfloat16))

    pol_w = int(flat_params[2 * (1 + 2 * n_res) + 2].shape[0])   # policy-conv feature width
    kernel, n_in = make_kernel(n_res, pol_w)
    inputs = (x_pad,) + tuple(flat_params)
    assert len(inputs) == n_in

    in_specs = [pl.BlockSpec((TB, LANE), lambda i: (i, 0))]
    # Constant index_map: weights stay resident in VMEM across batch-grid steps.
    in_specs += [pl.BlockSpec(w.shape, lambda i: (0, 0)) for w in flat_params]
    out_specs = pl.BlockSpec((TB, LANE), lambda i: (i, 0))

    macs = sum(int(w.shape[0]) * int(w.shape[1]) for w in flat_params if w.shape[0] > 1)
    weight_bytes = sum(int(np.prod(w.shape)) * w.dtype.itemsize for w in flat_params)
    cost = pl.CostEstimate(
        flops=2 * Bp * macs,
        transcendentals=Bp * LANE,
        bytes_accessed=weight_bytes + Bp * LANE * 2 + Bp * LANE * 4,
    )

    # Scoped-VMEM limit from actual buffer sizes (v5e's 16 MiB default is too small at big TB).
    vmem_limit = int(2 * weight_bytes                 # double-buffered resident weights
                     + 2 * TB * LANE * (2 + 4)        # double-buffered input (bf16) + output (f32)
                     + 10 * TB * 512 * 4              # headroom for live intermediates
                     + (4 << 20))
    vmem_limit = max(32 << 20, min(vmem_limit, 64 << 20))

    out_pad = pl.pallas_call(
        kernel,
        out_shape=jax.ShapeDtypeStruct((Bp, LANE), jnp.float32),
        grid=(Bp // TB,),
        in_specs=in_specs,
        out_specs=out_specs,
        compiler_params=pltpu.CompilerParams(
            dimension_semantics=("parallel",),
            vmem_limit_bytes=vmem_limit),
        cost_estimate=cost,
    )(*inputs)
    return out_pad[:B, :9], out_pad[:B, VALUE_LANE:VALUE_LANE + 1]


# ---------------------------------- pure-JAX reference ----------------------------------

def _conv3x3(x, w, b):
    y = jax.lax.conv_general_dilated(
        x, jnp.asarray(w), window_strides=(1, 1), padding=((1, 1), (1, 1)),
        dimension_numbers=('NCHW', 'OIHW', 'NCHW'))
    return y + jnp.asarray(b)[None, :, None, None]


def _bn2d(x, p):
    g, be, m, v = (jnp.asarray(p[k])[None, :, None, None] for k in ('gamma', 'beta', 'mean', 'var'))
    return g * (x - m) / jnp.sqrt(v + EPS) + be


def ref_forward(x, P):
    def cbr(x, p):
        return jax.nn.relu(_bn2d(_conv3x3(x, p['w'], p['b']), p))

    h = cbr(x, P['conv'])
    for (p1, p2) in P['res']:
        r = h
        h1 = cbr(h, p1)
        h2 = _bn2d(_conv3x3(h1, p2['w'], p2['b']), p2)
        h = jax.nn.relu(h2 + r)
    ph = cbr(h, P['pol_conv']).reshape(x.shape[0], -1)
    policy = ph @ jnp.asarray(P['pol_lin']['w']).T + jnp.asarray(P['pol_lin']['b'])
    vh = cbr(h, P['val_conv']).reshape(x.shape[0], -1)
    v2 = vh @ jnp.asarray(P['val_lin2']['w']).T + jnp.asarray(P['val_lin2']['b'])
    bn = P['val_bn2']
    v2 = jnp.asarray(bn['gamma']) * (v2 - jnp.asarray(bn['mean'])) / jnp.sqrt(jnp.asarray(bn['var']) + EPS) + jnp.asarray(bn['beta'])
    v2 = jax.nn.relu(v2)
    value = jnp.tanh(v2 @ jnp.asarray(P['val_lin3']['w']).T + jnp.asarray(P['val_lin3']['b']))
    return policy, value


# --------------------------------------- main ---------------------------------------

if __name__ == "__main__":
    B = 2
    key = jax.random.PRNGKey(0)
    x = jax.random.normal(key, (B, 3, 3, 3), dtype=jnp.float32)   # NCHW: (batch, 3 planes, 3, 3)

    params = init_params(HPARAMS)
    flat_params = flatten_for_kernel(params)

    policy, value = tictactoe_forward(x, flat_params, HPARAMS['res_blocks'])
    policy, value = jax.block_until_ready((policy, value))

    ref_policy, ref_value = ref_forward(x, params)
    assert policy.shape == (B, 9) and value.shape == (B, 1)
    # bf16 weights/activations on the MXU -> looser tolerances than a pure-f32 kernel.
    assert np.allclose(np.asarray(policy), np.asarray(ref_policy), rtol=5e-2, atol=5e-2)
    assert np.allclose(np.asarray(value), np.asarray(ref_value), rtol=5e-2, atol=5e-2)

    print("KERNEL_OK")
</pallas_src>

<mosaic_0001>
module attributes {stable_mosaic.version = 11 : i64} {
  func.func @kernel(%arg0: i32, %arg1: memref<16x128xbf16, #tpu.memory_space<vmem>>, %arg2: memref<128x384xbf16, #tpu.memory_space<vmem>>, %arg3: memref<1x384xf32, #tpu.memory_space<vmem>>, %arg4: memref<384x384xbf16, #tpu.memory_space<vmem>>, %arg5: memref<1x384xf32, #tpu.memory_space<vmem>>, %arg6: memref<384x384xbf16, #tpu.memory_space<vmem>>, %arg7: memref<1x384xf32, #tpu.memory_space<vmem>>, %arg8: memref<384x384xbf16, #tpu.memory_space<vmem>>, %arg9: memref<1x384xf32, #tpu.memory_space<vmem>>, %arg10: memref<384x384xbf16, #tpu.memory_space<vmem>>, %arg11: memref<1x384xf32, #tpu.memory_space<vmem>>, %arg12: memref<384x512xbf16, #tpu.memory_space<vmem>>, %arg13: memref<1x512xf32, #tpu.memory_space<vmem>>, %arg14: memref<384x128xbf16, #tpu.memory_space<vmem>>, %arg15: memref<1x128xf32, #tpu.memory_space<vmem>>, %arg16: memref<128x128xbf16, #tpu.memory_space<vmem>>, %arg17: memref<1x128xf32, #tpu.memory_space<vmem>>, %arg18: memref<128x128xbf16, #tpu.memory_space<vmem>>, %arg19: memref<1x128xf32, #tpu.memory_space<vmem>>, %arg20: memref<16x128xf32, #tpu.memory_space<vmem>>) attributes {dimension_semantics = [#tpu.dimension_semantics<parallel>], iteration_bounds = array<i64: 1>, scalar_prefetch = 0 : i64, scratch_operands = 0 : i64, tpu.core_type = #tpu.core_type<tc>, window_params = [{transform_indices = @transform_0, window_bounds = array<i64: 16, 128>}, {pipeline_mode = #tpu.pipeline_mode<synchronous>, transform_indices = @transform_1, window_bounds = array<i64: 128, 384>}, {pipeline_mode = #tpu.pipeline_mode<synchronous>, transform_indices = @transform_2, window_bounds = array<i64: 1, 384>}, {pipeline_mode = #tpu.pipeline_mode<synchronous>, transform_indices = @transform_3, window_bounds = array<i64: 384, 384>}, {pipeline_mode = #tpu.pipeline_mode<synchronous>, transform_indices = @transform_4, window_bounds = array<i64: 1, 384>}, {pipeline_mode = #tpu.pipeline_mode<synchronous>, transform_indices = @transform_5, window_bounds = array<i64: 384, 384>}, {pipeline_mode = #tpu.pipeline_mode<synchronous>, transform_indices = @transform_6, window_bounds = array<i64: 1, 384>}, {pipeline_mode = #tpu.pipeline_mode<synchronous>, transform_indices = @transform_7, window_bounds = array<i64: 384, 384>}, {pipeline_mode = #tpu.pipeline_mode<synchronous>, transform_indices = @transform_8, window_bounds = array<i64: 1, 384>}, {pipeline_mode = #tpu.pipeline_mode<synchronous>, transform_indices = @transform_9, window_bounds = array<i64: 384, 384>}, {pipeline_mode = #tpu.pipeline_mode<synchronous>, transform_indices = @transform_10, window_bounds = array<i64: 1, 384>}, {pipeline_mode = #tpu.pipeline_mode<synchronous>, transform_indices = @transform_11, window_bounds = array<i64: 384, 512>}, {pipeline_mode = #tpu.pipeline_mode<synchronous>, transform_indices = @transform_12, window_bounds = array<i64: 1, 512>}, {pipeline_mode = #tpu.pipeline_mode<synchronous>, transform_indices = @transform_13, window_bounds = array<i64: 384, 128>}, {pipeline_mode = #tpu.pipeline_mode<synchronous>, transform_indices = @transform_14, window_bounds = array<i64: 1, 128>}, {pipeline_mode = #tpu.pipeline_mode<synchronous>, transform_indices = @transform_15, window_bounds = array<i64: 128, 128>}, {pipeline_mode = #tpu.pipeline_mode<synchronous>, transform_indices = @transform_16, window_bounds = array<i64: 1, 128>}, {pipeline_mode = #tpu.pipeline_mode<synchronous>, transform_indices = @transform_17, window_bounds = array<i64: 128, 128>}, {pipeline_mode = #tpu.pipeline_mode<synchronous>, transform_indices = @transform_18, window_bounds = array<i64: 1, 128>}, {transform_indices = @transform_19, window_bounds = array<i64: 16, 128>}]} {
    %c0 = arith.constant 0 : index
    %c0_0 = arith.constant 0 : index
    %0 = vector.load %arg1[%c0, %c0_0] : memref<16x128xbf16, #tpu.memory_space<vmem>>, vector<16x128xbf16>
    %c0_1 = arith.constant 0 : index
    %c0_2 = arith.constant 0 : index
    %1 = vector.load %arg2[%c0_1, %c0_2] : memref<128x384xbf16, #tpu.memory_space<vmem>>, vector<128x384xbf16>
    %cst = arith.constant dense<0.000000e+00> : vector<16x384xf32>
    %2 = tpu.matmul %0, %1, %cst {dimension_numbers = #tpu.dot_dimension_numbers<[1], [0], [0], [1], [0, 0, 1, 1], [], []>} : vector<16x128xbf16>, vector<128x384xbf16>, vector<16x384xf32> -> vector<16x384xf32>
    %c0_3 = arith.constant 0 : index
    %c0_4 = arith.constant 0 : index
    %3 = vector.load %arg3[%c0_3, %c0_4] : memref<1x384xf32, #tpu.memory_space<vmem>>, vector<1x384xf32>
    %4 = vector.broadcast %3 : vector<1x384xf32> to vector<16x384xf32>
    %5 = arith.addf %2, %4 : vector<16x384xf32>
    %cst_5 = arith.constant 0.000000e+00 : f32
    %6 = vector.broadcast %cst_5 : f32 to vector<16x384xf32>
    %7 = arith.maximumf %5, %6 : vector<16x384xf32>
    %8 = arith.truncf %7 : vector<16x384xf32> to vector<16x384xbf16>
    %c0_6 = arith.constant 0 : index
    %c0_7 = arith.constant 0 : index
    %9 = vector.load %arg4[%c0_6, %c0_7] : memref<384x384xbf16, #tpu.memory_space<vmem>>, vector<384x384xbf16>
    %cst_8 = arith.constant dense<0.000000e+00> : vector<16x384xf32>
    %10 = tpu.matmul %8, %9, %cst_8 {dimension_numbers = #tpu.dot_dimension_numbers<[1], [0], [0], [1], [0, 0, 1, 1], [], []>} : vector<16x384xbf16>, vector<384x384xbf16>, vector<16x384xf32> -> vector<16x384xf32>
    %c0_9 = arith.constant 0 : index
    %c0_10 = arith.constant 0 : index
    %11 = vector.load %arg5[%c0_9, %c0_10] : memref<1x384xf32, #tpu.memory_space<vmem>>, vector<1x384xf32>
    %12 = vector.broadcast %11 : vector<1x384xf32> to vector<16x384xf32>
    %13 = arith.addf %10, %12 : vector<16x384xf32>
    %cst_11 = arith.constant 0.000000e+00 : f32
    %14 = vector.broadcast %cst_11 : f32 to vector<16x384xf32>
    %15 = arith.maximumf %13, %14 : vector<16x384xf32>
    %16 = arith.truncf %15 : vector<16x384xf32> to vector<16x384xbf16>
    %c0_12 = arith.constant 0 : index
    %c0_13 = arith.constant 0 : index
    %17 = vector.load %arg6[%c0_12, %c0_13] : memref<384x384xbf16, #tpu.memory_space<vmem>>, vector<384x384xbf16>
    %cst_14 = arith.constant dense<0.000000e+00> : vector<16x384xf32>
    %18 = tpu.matmul %16, %17, %cst_14 {dimension_numbers = #tpu.dot_dimension_numbers<[1], [0], [0], [1], [0, 0, 1, 1], [], []>} : vector<16x384xbf16>, vector<384x384xbf16>, vector<16x384xf32> -> vector<16x384xf32>
    %c0_15 = arith.constant 0 : index
    %c0_16 = arith.constant 0 : index
    %19 = vector.load %arg7[%c0_15, %c0_16] : memref<1x384xf32, #tpu.memory_space<vmem>>, vector<1x384xf32>
    %20 = vector.broadcast %19 : vector<1x384xf32> to vector<16x384xf32>
    %21 = arith.addf %18, %20 : vector<16x384xf32>
    %22 = arith.extf %8 : vector<16x384xbf16> to vector<16x384xf32>
    %23 = arith.addf %21, %22 : vector<16x384xf32>
    %cst_17 = arith.constant 0.000000e+00 : f32
    %24 = vector.broadcast %cst_17 : f32 to vector<16x384xf32>
    %25 = arith.maximumf %23, %24 : vector<16x384xf32>
    %26 = arith.truncf %25 : vector<16x384xf32> to vector<16x384xbf16>
    %c0_18 = arith.constant 0 : index
    %c0_19 = arith.constant 0 : index
    %27 = vector.load %arg8[%c0_18, %c0_19] : memref<384x384xbf16, #tpu.memory_space<vmem>>, vector<384x384xbf16>
    %cst_20 = arith.constant dense<0.000000e+00> : vector<16x384xf32>
    %28 = tpu.matmul %26, %27, %cst_20 {dimension_numbers = #tpu.dot_dimension_numbers<[1], [0], [0], [1], [0, 0, 1, 1], [], []>} : vector<16x384xbf16>, vector<384x384xbf16>, vector<16x384xf32> -> vector<16x384xf32>
    %c0_21 = arith.constant 0 : index
    %c0_22 = arith.constant 0 : index
    %29 = vector.load %arg9[%c0_21, %c0_22] : memref<1x384xf32, #tpu.memory_space<vmem>>, vector<1x384xf32>
    %30 = vector.broadcast %29 : vector<1x384xf32> to vector<16x384xf32>
    %31 = arith.addf %28, %30 : vector<16x384xf32>
    %cst_23 = arith.constant 0.000000e+00 : f32
    %32 = vector.broadcast %cst_23 : f32 to vector<16x384xf32>
    %33 = arith.maximumf %31, %32 : vector<16x384xf32>
    %34 = arith.truncf %33 : vector<16x384xf32> to vector<16x384xbf16>
    %c0_24 = arith.constant 0 : index
    %c0_25 = arith.constant 0 : index
    %35 = vector.load %arg10[%c0_24, %c0_25] : memref<384x384xbf16, #tpu.memory_space<vmem>>, vector<384x384xbf16>
    %cst_26 = arith.constant dense<0.000000e+00> : vector<16x384xf32>
    %36 = tpu.matmul %34, %35, %cst_26 {dimension_numbers = #tpu.dot_dimension_numbers<[1], [0], [0], [1], [0, 0, 1, 1], [], []>} : vector<16x384xbf16>, vector<384x384xbf16>, vector<16x384xf32> -> vector<16x384xf32>
    %c0_27 = arith.constant 0 : index
    %c0_28 = arith.constant 0 : index
    %37 = vector.load %arg11[%c0_27, %c0_28] : memref<1x384xf32, #tpu.memory_space<vmem>>, vector<1x384xf32>
    %38 = vector.broadcast %37 : vector<1x384xf32> to vector<16x384xf32>
    %39 = arith.addf %36, %38 : vector<16x384xf32>
    %40 = arith.extf %26 : vector<16x384xbf16> to vector<16x384xf32>
    %41 = arith.addf %39, %40 : vector<16x384xf32>
    %cst_29 = arith.constant 0.000000e+00 : f32
    %42 = vector.broadcast %cst_29 : f32 to vector<16x384xf32>
    %43 = arith.maximumf %41, %42 : vector<16x384xf32>
    %44 = arith.truncf %43 : vector<16x384xf32> to vector<16x384xbf16>
    %c0_30 = arith.constant 0 : index
    %c0_31 = arith.constant 0 : index
    %45 = vector.load %arg12[%c0_30, %c0_31] : memref<384x512xbf16, #tpu.memory_space<vmem>>, vector<384x512xbf16>
    %cst_32 = arith.constant dense<0.000000e+00> : vector<16x512xf32>
    %46 = tpu.matmul %44, %45, %cst_32 {dimension_numbers = #tpu.dot_dimension_numbers<[1], [0], [0], [1], [0, 0, 1, 1], [], []>} : vector<16x384xbf16>, vector<384x512xbf16>, vector<16x512xf32> -> vector<16x512xf32>
    %c0_33 = arith.constant 0 : index
    %c0_34 = arith.constant 0 : index
    %47 = vector.load %arg13[%c0_33, %c0_34] : memref<1x512xf32, #tpu.memory_space<vmem>>, vector<1x512xf32>
    %48 = vector.broadcast %47 : vector<1x512xf32> to vector<16x512xf32>
    %49 = arith.addf %46, %48 : vector<16x512xf32>
    %cst_35 = arith.constant 0.000000e+00 : f32
    %50 = vector.broadcast %cst_35 : f32 to vector<16x512xf32>
    %51 = arith.maximumf %49, %50 : vector<16x512xf32>
    %52 = arith.truncf %51 : vector<16x512xf32> to vector<16x512xbf16>
    %53 = vector.extract_strided_slice %52 {offsets = [0, 0], sizes = [16, 384], strides = [1, 1]} : vector<16x512xbf16> to vector<16x384xbf16>
    %54 = vector.extract_strided_slice %52 {offsets = [0, 384], sizes = [16, 128], strides = [1, 1]} : vector<16x512xbf16> to vector<16x128xbf16>
    %c0_36 = arith.constant 0 : index
    %c0_37 = arith.constant 0 : index
    %55 = vector.load %arg14[%c0_36, %c0_37] : memref<384x128xbf16, #tpu.memory_space<vmem>>, vector<384x128xbf16>
    %cst_38 = arith.constant dense<0.000000e+00> : vector<16x128xf32>
    %56 = tpu.matmul %53, %55, %cst_38 {dimension_numbers = #tpu.dot_dimension_numbers<[1], [0], [0], [1], [0, 0, 1, 1], [], []>} : vector<16x384xbf16>, vector<384x128xbf16>, vector<16x128xf32> -> vector<16x128xf32>
    %c0_39 = arith.constant 0 : index
    %c0_40 = arith.constant 0 : index
    %57 = vector.load %arg15[%c0_39, %c0_40] : memref<1x128xf32, #tpu.memory_space<vmem>>, vector<1x128xf32>
    %58 = vector.broadcast %57 : vector<1x128xf32> to vector<16x128xf32>
    %59 = arith.addf %56, %58 : vector<16x128xf32>
    %c0_41 = arith.constant 0 : index
    %c0_42 = arith.constant 0 : index
    %60 = vector.load %arg16[%c0_41, %c0_42] : memref<128x128xbf16, #tpu.memory_space<vmem>>, vector<128x128xbf16>
    %cst_43 = arith.constant dense<0.000000e+00> : vector<16x128xf32>
    %61 = tpu.matmul %54, %60, %cst_43 {dimension_numbers = #tpu.dot_dimension_numbers<[1], [0], [0], [1], [0, 0, 1, 1], [], []>} : vector<16x128xbf16>, vector<128x128xbf16>, vector<16x128xf32> -> vector<16x128xf32>
    %c0_44 = arith.constant 0 : index
    %c0_45 = arith.constant 0 : index
    %62 = vector.load %arg17[%c0_44, %c0_45] : memref<1x128xf32, #tpu.memory_space<vmem>>, vector<1x128xf32>
    %63 = vector.broadcast %62 : vector<1x128xf32> to vector<16x128xf32>
    %64 = arith.addf %61, %63 : vector<16x128xf32>
    %cst_46 = arith.constant 0.000000e+00 : f32
    %65 = vector.broadcast %cst_46 : f32 to vector<16x128xf32>
    %66 = arith.maximumf %64, %65 : vector<16x128xf32>
    %67 = arith.truncf %66 : vector<16x128xf32> to vector<16x128xbf16>
    %c0_47 = arith.constant 0 : index
    %c0_48 = arith.constant 0 : index
    %68 = vector.load %arg18[%c0_47, %c0_48] : memref<128x128xbf16, #tpu.memory_space<vmem>>, vector<128x128xbf16>
    %cst_49 = arith.constant dense<0.000000e+00> : vector<16x128xf32>
    %69 = tpu.matmul %67, %68, %cst_49 {dimension_numbers = #tpu.dot_dimension_numbers<[1], [0], [0], [1], [0, 0, 1, 1], [], []>} : vector<16x128xbf16>, vector<128x128xbf16>, vector<16x128xf32> -> vector<16x128xf32>
    %c0_50 = arith.constant 0 : index
    %c0_51 = arith.constant 0 : index
    %70 = vector.load %arg19[%c0_50, %c0_51] : memref<1x128xf32, #tpu.memory_space<vmem>>, vector<1x128xf32>
    %71 = vector.broadcast %70 : vector<1x128xf32> to vector<16x128xf32>
    %72 = arith.addf %69, %71 : vector<16x128xf32>
    %73 = math.tanh %72 : vector<16x128xf32>
    %74 = arith.addf %59, %73 : vector<16x128xf32>
    %c0_52 = arith.constant 0 : index
    %c0_53 = arith.constant 0 : index
    %75 = vector.load %arg20[%c0_52, %c0_53] : memref<16x128xf32, #tpu.memory_space<vmem>>, vector<16x128xf32>
    tpu.vector_store %arg20[%c0_52, %c0_53], %74 {strides = array<i32>} : memref<16x128xf32, #tpu.memory_space<vmem>>, vector<16x128xf32>,
    return
  }
  func.func @transform_0(%arg0: i32) -> (i32, i32) {
    %c0_i32 = arith.constant 0 : i32
    %c0_i32_0 = arith.constant 0 : i32
    return %arg0, %c0_i32 : i32, i32
  }
  func.func @transform_1(%arg0: i32) -> (i32, i32) {
    %c0_i32 = arith.constant 0 : i32
    %c0_i32_0 = arith.constant 0 : i32
    %c0_i32_1 = arith.constant 0 : i32
    return %c0_i32, %c0_i32_0 : i32, i32
  }
  func.func @transform_2(%arg0: i32) -> (i32, i32) {
    %c0_i32 = arith.constant 0 : i32
    %c0_i32_0 = arith.constant 0 : i32
    %c0_i32_1 = arith.constant 0 : i32
    return %c0_i32, %c0_i32_0 : i32, i32
  }
  func.func @transform_3(%arg0: i32) -> (i32, i32) {
    %c0_i32 = arith.constant 0 : i32
    %c0_i32_0 = arith.constant 0 : i32
    %c0_i32_1 = arith.constant 0 : i32
    return %c0_i32, %c0_i32_0 : i32, i32
  }
  func.func @transform_4(%arg0: i32) -> (i32, i32) {
    %c0_i32 = arith.constant 0 : i32
    %c0_i32_0 = arith.constant 0 : i32
    %c0_i32_1 = arith.constant 0 : i32
    return %c0_i32, %c0_i32_0 : i32, i32
  }
  func.func @transform_5(%arg0: i32) -> (i32, i32) {
    %c0_i32 = arith.constant 0 : i32
    %c0_i32_0 = arith.constant 0 : i32
    %c0_i32_1 = arith.constant 0 : i32
    return %c0_i32, %c0_i32_0 : i32, i32
  }
  func.func @transform_6(%arg0: i32) -> (i32, i32) {
    %c0_i32 = arith.constant 0 : i32
    %c0_i32_0 = arith.constant 0 : i32
    %c0_i32_1 = arith.constant 0 : i32
    return %c0_i32, %c0_i32_0 : i32, i32
  }
  func.func @transform_7(%arg0: i32) -> (i32, i32) {
    %c0_i32 = arith.constant 0 : i32
    %c0_i32_0 = arith.constant 0 : i32
    %c0_i32_1 = arith.constant 0 : i32
    return %c0_i32, %c0_i32_0 : i32, i32
  }
  func.func @transform_8(%arg0: i32) -> (i32, i32) {
    %c0_i32 = arith.constant 0 : i32
    %c0_i32_0 = arith.constant 0 : i32
    %c0_i32_1 = arith.constant 0 : i32
    return %c0_i32, %c0_i32_0 : i32, i32
  }
  func.func @transform_9(%arg0: i32) -> (i32, i32) {
    %c0_i32 = arith.constant 0 : i32
    %c0_i32_0 = arith.constant 0 : i32
    %c0_i32_1 = arith.constant 0 : i32
    return %c0_i32, %c0_i32_0 : i32, i32
  }
  func.func @transform_10(%arg0: i32) -> (i32, i32) {
    %c0_i32 = arith.constant 0 : i32
    %c0_i32_0 = arith.constant 0 : i32
    %c0_i32_1 = arith.constant 0 : i32
    return %c0_i32, %c0_i32_0 : i32, i32
  }
  func.func @transform_11(%arg0: i32) -> (i32, i32) {
    %c0_i32 = arith.constant 0 : i32
    %c0_i32_0 = arith.constant 0 : i32
    %c0_i32_1 = arith.constant 0 : i32
    return %c0_i32, %c0_i32_0 : i32, i32
  }
  func.func @transform_12(%arg0: i32) -> (i32, i32) {
    %c0_i32 = arith.constant 0 : i32
    %c0_i32_0 = arith.constant 0 : i32
    %c0_i32_1 = arith.constant 0 : i32
    return %c0_i32, %c0_i32_0 : i32, i32
  }
  func.func @transform_13(%arg0: i32) -> (i32, i32) {
    %c0_i32 = arith.constant 0 : i32
    %c0_i32_0 = arith.constant 0 : i32
    %c0_i32_1 = arith.constant 0 : i32
    return %c0_i32, %c0_i32_0 : i32, i32
  }
  func.func @transform_14(%arg0: i32) -> (i32, i32) {
    %c0_i32 = arith.constant 0 : i32
    %c0_i32_0 = arith.constant 0 : i32
    %c0_i32_1 = arith.constant 0 : i32
    return %c0_i32, %c0_i32_0 : i32, i32
  }
  func.func @transform_15(%arg0: i32) -> (i32, i32) {
    %c0_i32 = arith.constant 0 : i32
    %c0_i32_0 = arith.constant 0 : i32
    %c0_i32_1 = arith.constant 0 : i32
    return %c0_i32, %c0_i32_0 : i32, i32
  }
  func.func @transform_16(%arg0: i32) -> (i32, i32) {
    %c0_i32 = arith.constant 0 : i32
    %c0_i32_0 = arith.constant 0 : i32
    %c0_i32_1 = arith.constant 0 : i32
    return %c0_i32, %c0_i32_0 : i32, i32
  }
  func.func @transform_17(%arg0: i32) -> (i32, i32) {
    %c0_i32 = arith.constant 0 : i32
    %c0_i32_0 = arith.constant 0 : i32
    %c0_i32_1 = arith.constant 0 : i32
    return %c0_i32, %c0_i32_0 : i32, i32
  }
  func.func @transform_18(%arg0: i32) -> (i32, i32) {
    %c0_i32 = arith.constant 0 : i32
    %c0_i32_0 = arith.constant 0 : i32
    %c0_i32_1 = arith.constant 0 : i32
    return %c0_i32, %c0_i32_0 : i32, i32
  }
  func.func @transform_19(%arg0: i32) -> (i32, i32) {
    %c0_i32 = arith.constant 0 : i32
    %c0_i32_0 = arith.constant 0 : i32
    return %arg0, %c0_i32 : i32, i32
  }
}

</mosaic_0001>

<bundles_post_ra>
// kernel: tpu_custom_call.1
= control target key start
LH: loop header
LB: loop body
LE: loop exit
PB: predicated region body
PF: predicated region fallthrough
CT: control target
= control target key end

     0   :  { %s7264_s0 = inlined_call_operand.hbm [shape: bf16[16,128], index: 0, kind: input, shape index: {}]   ;;  %s7265_s1 = inlined_call_operand.hbm [shape: bf16[128,384], index: 1, kind: input, shape index: {}]   ;;  %s7266_s2 = inlined_call_operand.hbm [shape: f32[1,384], index: 2, kind: input, shape index: {}]   ;;  %s7267_s3 = inlined_call_operand.hbm [shape: bf16[384,384], index: 3, kind: input, shape index: {}]   ;;  %s7268_s4 = inlined_call_operand.vmem [shape: f32[1,384], index: 4, kind: input, shape index: {}]   ;;  %s7269_s5 = inlined_call_operand.hbm [shape: bf16[384,384], index: 5, kind: input, shape index: {}]   ;;  %s7270_s6 = inlined_call_operand.hbm [shape: f32[1,384], index: 6, kind: input, shape index: {}]   ;;  %s7271_s7 = inlined_call_operand.hbm [shape: bf16[384,384], index: 7, kind: input, shape index: {}]   ;;  %s7272_s8 = inlined_call_operand.hbm [shape: f32[1,384], index: 8, kind: input, shape index: {}]   ;;  %s7273_s9 = inlined_call_operand.hbm [shape: bf16[384,384], index: 9, kind: input, shape index: {}]   ;;  %s7274_s10 = inlined_call_operand.hbm [shape: f32[1,384], index: 10, kind: input, shape index: {}]   ;;  %s7275_s11 = inlined_call_operand.hbm [shape: bf16[384,512], index: 11, kind: input, shape index: {}]   ;;  %s7276_s12 = inlined_call_operand.vmem [shape: f32[1,512], index: 12, kind: input, shape index: {}]   ;;  %s7277_s13 = inlined_call_operand.hbm [shape: bf16[384,128], index: 13, kind: input, shape index: {}]   ;;  %s7278_s14 = inlined_call_operand.vmem [shape: f32[1,128], index: 14, kind: input, shape index: {}]   ;;  %s7279_s15 = inlined_call_operand.hbm [shape: bf16[128,128], index: 15, kind: input, shape index: {}]   ;;  %s7280_s16 = inlined_call_operand.vmem [shape: f32[1,128], index: 16, kind: input, shape index: {}]   ;;  %s7281_s17 = inlined_call_operand.hbm [shape: bf16[128,128], index: 17, kind: input, shape index: {}]   ;;  %s7282_s18 = inlined_call_operand.vmem [shape: f32[1,128], index: 18, kind: input, shape index: {}]   ;;  %s7283_s19 = inlined_call_operand.hbm [shape: f32[16,128], index: 19, kind: output, shape index: {}]  }
   0x1   :  { %7286 = sst [smem:[#allocation35_spill]] %s7264_s0 }
   0x2   :  { %7287 = sst [smem:[#allocation36_spill]] %s7265_s1 }
   0x3   :  { %7288 = sst [smem:[#allocation37_spill]] %s7266_s2 }
   0x4   :  { %7289 = sst [smem:[#allocation38_spill]] %s7267_s3 }
   0x5   :  { %24 = vsyncpa [#allocation3], 0 }
   0x6   :  { %25 = vsyncpa [#allocation6], 0 }
   0x7   :  { %26 = vsyncpa [#allocation9], 0 }
   0x8   :  { %27 = vsyncpa [#allocation12], 0 }
   0x9   :  { %28 = vsyncpa [#allocation15], 0 }
   0xa   :  { %29 = vsyncpa [#allocation18], 0 }
   0xb   :  { %30 = vsyncpa [#allocation21], 0 }
   0xc   :  { %31 = vsyncpa [#allocation24], 0  ;;  %s7290_s20 = sld [smem:[#allocation36_spill]] }
  0x12   :  { %s50_s21 = sshll.u32 %s7290_s20, 4  ;;  %s51_s21 = int_to_ptr.hbm [resolvable:$true] %s50_s21 }
  0x13   :  { %32 = vsyncpa [#allocation4], 0  ;;  %s6926_s1 = smov [#allocation5]   ;;  %s7291_s24 = sld [smem:[#allocation38_spill]] }
  0x14   :  { %s52_s22 = sshll.u32 %s6926_s1, 4  ;;  %s7284_s3 = smov 192   ;;  %s53_s22 = int_to_ptr.vmem [resolvable:$true] %s52_s22 }
  0x15   :  { %s6928_s26 = smov 12   ;;  %s6929_s27 = smov [#allocation8]  }
  0x16   :  { %58 = dma.hbm_to_vmem [thread:$0]  %s51_s21, 3072, %s53_s22, [#allocation6], %s7284_s3, %s7284_s3, %s6928_s26  }
  0x17   :  { %s76_s28 = sshll.u32 %s6929_s27, 4  ;;  %s103_s30 = sshll.u32 %s7270_s6, 4  ;;  %s77_s28 = int_to_ptr.vmem [resolvable:$true] %s76_s28  ;;  %s104_s30 = int_to_ptr.hbm [resolvable:$true] %s103_s30 }
  0x18   :  { %s127_s2 = sshll.u32 %s7272_s8, 4  ;;  %s6930_s23 = smov [#allocation11]   ;;  %s128_s2 = int_to_ptr.hbm [resolvable:$true] %s127_s2 }
  0x19   :  { %s74_s25 = sshll.u32 %s7291_s24, 4  ;;  %s105_s24 = sshll.u32 %s6930_s23, 4  ;;  %s75_s25 = int_to_ptr.hbm [resolvable:$true] %s74_s25  ;;  %s106_s24 = int_to_ptr.vmem [resolvable:$true] %s105_s24 }
  0x1a   :  { %82 = dma.hbm_to_vmem [thread:$0]  %s75_s25, 9216, %s77_s28, [#allocation9], %s7284_s3, %s7284_s3, %s6928_s26  }
  0x1b   :  { %108 = dma.hbm_to_vmem [thread:$0]  %s104_s30, 48, %s106_s24, [#allocation12]  }
  0x1c   :  { %s6931_s21 = smov [#allocation14]   ;;  %s151_s6 = sshll.u32 %s7274_s10, 4  ;;  %s152_s6 = int_to_ptr.hbm [resolvable:$true] %s151_s6 }
  0x1d   :  { %s129_s22 = sshll.u32 %s6931_s21, 4  ;;  %s6932_s0 = smov [#allocation17]   ;;  %s130_s22 = int_to_ptr.vmem [resolvable:$true] %s129_s22 }
  0x1e   :  { %132 = dma.hbm_to_vmem [thread:$0]  %s128_s2, 48, %s130_s22, [#allocation15]  }
  0x1f   :  { %s153_s25 = sshll.u32 %s6932_s0, 4  ;;  %s176_s8 = sshll.u32 %s7277_s13, 4  ;;  %s154_s25 = int_to_ptr.vmem [resolvable:$true] %s153_s25  ;;  %s177_s8 = int_to_ptr.hbm [resolvable:$true] %s176_s8 }
  0x20   :  { %156 = dma.hbm_to_vmem [thread:$0]  %s152_s6, 48, %s154_s25, [#allocation18]  }
  0x21   :  { %s6933_s1 = smov [#allocation20]   ;;  %s7292_s21 = sld [smem:[#allocation35_spill]] }
  0x22   :  { %s178_s30 = sshll.u32 %s6933_s1, 4  ;;  %s6934_s10 = smov 64   ;;  %s179_s30 = int_to_ptr.vmem [resolvable:$true] %s178_s30 }
  0x23   :  { %s6935_s27 = smov 4   ;;  %s7293_s29 = sld [smem:[#allocation37_spill]] }
  0x24   :  { %184 = dma.hbm_to_vmem [thread:$0]  %s177_s8, 3072, %s179_s30, [#allocation21], %s6934_s10, %s6934_s10, %s6935_s27  }
  0x25   :  { %s6936_s6 = smov [#allocation2]   ;;  %s6937_s25 = smov [#allocation7]  }
  0x26   :  { %s39_s0 = sshll.u32 %s6936_s6, 4  ;;  %s66_s28 = sshll.u32 %s6937_s25, 4  ;;  %s40_s0 = int_to_ptr.vmem [resolvable:$true] %s39_s0  ;;  %s67_s28 = int_to_ptr.vmem [resolvable:$true] %s66_s28 }
  0x27   :  { %s37_s3 = sshll.u32 %s7292_s21, 4  ;;  %s89_s23 = sshll.u32 %s7269_s5, 4  ;;  %s38_s3 = int_to_ptr.hbm [resolvable:$true] %s37_s3  ;;  %s90_s23 = int_to_ptr.hbm [resolvable:$true] %s89_s23 }
  0x28   :  { %45 = dma.hbm_to_vmem [thread:$0]  %s38_s3, 128, %s40_s0, [#allocation3], %s6934_s10, %s6934_s10, %s6935_s27  }
  0x29   :  { %s64_s13 = sshll.u32 %s7293_s29, 4  ;;  %s113_s24 = sshll.u32 %s7271_s7, 4  ;;  %s65_s13 = int_to_ptr.hbm [resolvable:$true] %s64_s13  ;;  %s114_s24 = int_to_ptr.hbm [resolvable:$true] %s113_s24 }
  0x2a   :  { %69 = dma.hbm_to_vmem [thread:$0]  %s65_s13, 48, %s67_s28, [#allocation6]  }
  0x2b   :  { %s6938_s21 = smov [#allocation10]   ;;  %s7294_s22 = smov 192  }
  0x2c   :  { %s91_s2 = sshll.u32 %s6938_s21, 4  ;;  %s6939_s3 = smov [#allocation13]   ;;  %s92_s2 = int_to_ptr.vmem [resolvable:$true] %s91_s2 }
  0x2d   :  { %97 = dma.hbm_to_vmem [thread:$0]  %s90_s23, 9216, %s92_s2, [#allocation9], %s7294_s22, %s7294_s22, %s6928_s26  }
  0x2e   :  { %s115_s29 = sshll.u32 %s6939_s3, 4  ;;  %s137_s5 = sshll.u32 %s7273_s9, 4  ;;  %s116_s29 = int_to_ptr.vmem [resolvable:$true] %s115_s29  ;;  %s138_s5 = int_to_ptr.hbm [resolvable:$true] %s137_s5 }
  0x2f   :  { %121 = dma.hbm_to_vmem [thread:$0]  %s114_s24, 9216, %s116_s29, [#allocation12], %s7294_s22, %s7294_s22, %s6928_s26  }
  0x30   :  { %s161_s25 = sshll.u32 %s7275_s11, 4  ;;  %s6940_s28 = smov [#allocation16]   ;;  %s162_s25 = int_to_ptr.hbm [resolvable:$true] %s161_s25 }
  0x31   :  { %s139_s20 = sshll.u32 %s6940_s28, 4  ;;  %s6941_s1 = smov [#allocation19]   ;;  %s140_s20 = int_to_ptr.vmem [resolvable:$true] %s139_s20 }
  0x32   :  { %145 = dma.hbm_to_vmem [thread:$0]  %s138_s5, 9216, %s140_s20, [#allocation15], %s7294_s22, %s7294_s22, %s6928_s26  }
  0x33   :  { %s163_s9 = sshll.u32 %s6941_s1, 4  ;;  %s6942_s23 = smov 256   ;;  %s164_s9 = int_to_ptr.vmem [resolvable:$true] %s163_s9 }
  0x34   :  { %s6943_s8 = smov 16   ;;  %s191_s21 = sshll.u32 %s7279_s15, 4  ;;  %s192_s21 = int_to_ptr.hbm [resolvable:$true] %s191_s21 }
  0x35   :  { %169 = dma.hbm_to_vmem [thread:$0]  %s162_s25, 12288, %s164_s9, [#allocation18], %s6942_s23, %s6942_s23, %s6943_s8  }
  0x36   :  { %s6944_s11 = smov [#allocation22]   ;;  %s206_s6 = sshll.u32 %s7281_s17, 4  ;;  %s207_s6 = int_to_ptr.hbm [resolvable:$true] %s206_s6 }
  0x37   :  { %s193_s2 = sshll.u32 %s6944_s11, 4  ;;  %s6945_s26 = smov [#allocation23]   ;;  %s194_s2 = int_to_ptr.vmem [resolvable:$true] %s193_s2 }
  0x38   :  { %199 = dma.hbm_to_vmem [thread:$0]  %s192_s21, 1024, %s194_s2, [#allocation21], %s6934_s10, %s6934_s10, %s6935_s27  }
  0x39   :  { %s208_s22 = sshll.u32 %s6945_s26, 4  ;;  %s209_s22 = int_to_ptr.vmem [resolvable:$true] %s208_s22 }
  0x3a   :  { %214 = dma.hbm_to_vmem [thread:$0]  %s207_s6, 1024, %s209_s22, [#allocation24], %s6934_s10, %s6934_s10, %s6935_s27  }
  0x3b   :  { %6908 = dma.done.wait [#allocation3], 128  }
  0x3c   :  { %6909 = vsyncadd [#allocation3], 4294967168 }
  0x3d   :  { %6910 = dma.done.wait [#allocation6], 3120  }
  0x3e   :  { %6911 = vsyncadd [#allocation6], 4294964176 }
  0x3f   :  { %6912 = dma.done.wait [#allocation9], 18432  }
  0x40   :  { %6913 = vsyncadd [#allocation9], 4294948864 }
  0x41   :  { %6914 = dma.done.wait [#allocation12], 9264  }
  0x42   :  { %6915 = vsyncadd [#allocation12], 4294958032 }
  0x43   :  { %6916 = dma.done.wait [#allocation15], 9264  }
  0x44   :  { %6917 = vsyncadd [#allocation15], 4294958032 }
  0x45   :  { %6918 = dma.done.wait [#allocation18], 12336  }
  0x46   :  { %6919 = vsyncadd [#allocation18], 4294954960 }
  0x47   :  { %6920 = dma.done.wait [#allocation21], 4096  }
  0x48   :  { %6921 = vsyncadd [#allocation21], 4294963200 }
  0x49   :  { %6922 = dma.done.wait [#allocation24], 1024  }
  0x4a   :  { %6923 = vsyncadd [#allocation24], 4294966272  ;;  %v4363_v0 = vld [vmem:[#allocation5 + $0xa8] sm:$0xf]  ;;  %v6092_v1 = vld [vmem:[#allocation5 + $0xb0] sm:$0xf0] }
  0x4b   :  { %v6091_v2 = vld [vmem:[#allocation5 + $0xac] sm:$0xf]  ;;  %v4364_v3 = vor.u32 %v6092_v1, %v4363_v0  ;;  %v4365_v4 = vld [vmem:[#allocation5 + $0xb4] sm:$0xf0]  ;;  %v4371_v5 = vld [vmem:[#allocation5 + $0xb0] sm:$0xf] }
  0x4c   :  { %v6093_v6 = vld [vmem:[#allocation5 + $0xb8] sm:$0xf0]  ;;  %v4368_v7 = vor.u32 %v6091_v2, %v4365_v4  ;;  %v4351_v9 = vld [vmem:[#allocation5 + $0x90] sm:$0xf]  ;;  %v6088_v11 = vld [vmem:[#allocation5 + $0x94] sm:$0xf] }
  0x4d   :  { %v4372_v8 = vor.u32 %v6093_v6, %v4371_v5  ;;  %v6089_v10 = vld [vmem:[#allocation5 + $0x98] sm:$0xf0]  ;;  %449 = vmatpush.bf16.msra.mxu0 %v4364_v3  ;;  %v4353_v13 = vld [vmem:[#allocation5 + $0x9c] sm:$0xf0]  ;;  %v4359_v14 = vld [vmem:[#allocation5 + $0x98] sm:$0xf] }
  0x4e   :  { %v4352_v12 = vor.u32 %v6089_v10, %v4351_v9  ;;  %v6090_v15 = vld [vmem:[#allocation5 + $0xa0] sm:$0xf0]  ;;  %463 = vmatpush.bf16.msra.mxu1 %v4368_v7  ;;  %v4356_v16 = vor.u32 %v6088_v11, %v4353_v13  ;;  %v4339_v18 = vld [vmem:[#allocation5 + $0x78] sm:$0xf]  ;;  %v6085_v20 = vld [vmem:[#allocation5 + $0x7c] sm:$0xf] }
  0x4f   :  { %477 = vmatpush.bf16.msra.mxu2 %v4372_v8  ;;  %v4360_v17 = vor.u32 %v6090_v15, %v4359_v14  ;;  %v6086_v19 = vld [vmem:[#allocation5 + $0x80] sm:$0xf0]  ;;  %v4341_v21 = vld [vmem:[#allocation5 + $0x84] sm:$0xf0]  ;;  %v4347_v22 = vld [vmem:[#allocation5 + $0x80] sm:$0xf] }
  0x50   :  { %v6087_v23 = vld [vmem:[#allocation5 + $0x88] sm:$0xf0]  ;;  %v4340_v24 = vor.u32 %v6086_v19, %v4339_v18  ;;  %v4344_v25 = vor.u32 %v6085_v20, %v4341_v21  ;;  %v4327_v27 = vld [vmem:[#allocation5 + $0x60] sm:$0xf]  ;;  %v6082_v29 = vld [vmem:[#allocation5 + $0x64] sm:$0xf] }
  0x51   :  { %450 = vmatpush.bf16.msra.mxu0 %v4352_v12  ;;  %v4348_v26 = vor.u32 %v6087_v23, %v4347_v22  ;;  %v6083_v28 = vld [vmem:[#allocation5 + $0x68] sm:$0xf0]  ;;  %v4329_v30 = vld [vmem:[#allocation5 + $0x6c] sm:$0xf0]  ;;  %v4335_v31 = vld [vmem:[#allocation5 + $0x68] sm:$0xf] }
  0x52   :  { %464 = vmatpush.bf16.msra.mxu1 %v4356_v16  ;;  %v6084_v32 = vld [vmem:[#allocation5 + $0x70] sm:$0xf0]  ;;  %v4328_v33 = vor.u32 %v6083_v28, %v4327_v27  ;;  %v4332_v34 = vor.u32 %v6082_v29, %v4329_v30  ;;  %v4315_v36 = vld [vmem:[#allocation5 + $0x48] sm:$0xf]  ;;  %v6079_v38 = vld [vmem:[#allocation5 + $0x4c] sm:$0xf] }
  0x53   :  { %478 = vmatpush.bf16.msra.mxu2 %v4360_v17  ;;  %v4336_v35 = vor.u32 %v6084_v32, %v4335_v31  ;;  %v6080_v37 = vld [vmem:[#allocation5 + $0x50] sm:$0xf0]  ;;  %v4317_v39 = vld [vmem:[#allocation5 + $0x54] sm:$0xf0]  ;;  %v4323_v40 = vld [vmem:[#allocation5 + $0x50] sm:$0xf] }
  0x54   :  { %v6081_v41 = vld [vmem:[#allocation5 + $0x58] sm:$0xf0]  ;;  %v4303_v42 = vld [vmem:[#allocation5 + $0x30] sm:$0xf]  ;;  %v4316_v43 = vor.u32 %v6080_v37, %v4315_v36  ;;  %v6076_v45 = vld [vmem:[#allocation5 + $0x34] sm:$0xf]  ;;  %v4320_v47 = vor.u32 %v6079_v38, %v4317_v39 }
  0x55   :  { %451 = vmatpush.bf16.msra.mxu0 %v4340_v24  ;;  %v6077_v44 = vld [vmem:[#allocation5 + $0x38] sm:$0xf0]  ;;  %v4305_v46 = vld [vmem:[#allocation5 + $0x3c] sm:$0xf0]  ;;  %v4324_v48 = vor.u32 %v6081_v41, %v4323_v40  ;;  %v4311_v49 = vld [vmem:[#allocation5 + $0x38] sm:$0xf] }
  0x56   :  { %465 = vmatpush.bf16.msra.mxu1 %v4344_v25  ;;  %v4459_v50 = vld [vmem:[#allocation8 + $0xa8] sm:$0xf]  ;;  %v6116_v51 = vld [vmem:[#allocation8 + $0xb0] sm:$0xf0]  ;;  %v6078_v52 = vld [vmem:[#allocation5 + $0x40] sm:$0xf0]  ;;  %v4304_v56 = vor.u32 %v6077_v44, %v4303_v42  ;;  %v4308_v60 = vor.u32 %v6076_v45, %v4305_v46 }
  0x57   :  { %479 = vmatpush.bf16.msra.mxu2 %v4348_v26  ;;  %v4460_v53 = vor.u32 %v6116_v51, %v4459_v50  ;;  %v4447_v54 = vld [vmem:[#allocation8 + $0x90] sm:$0xf]  ;;  %v6113_v55 = vld [vmem:[#allocation8 + $0x98] sm:$0xf0]  ;;  %v4291_v57 = vld [vmem:[#allocation5 + $0x18] sm:$0xf]  ;;  %v4312_v61 = vor.u32 %v6078_v52, %v4311_v49 }
  0x58   :  { %v6074_v58 = vld [vmem:[#allocation5 + $0x20] sm:$0xf0]  ;;  %v4448_v59 = vor.u32 %v6113_v55, %v4447_v54  ;;  %v6073_v62 = vld [vmem:[#allocation5 + $0x1c] sm:$0xf]  ;;  %v6110_v0 = vld [vmem:[#allocation8 + $0x80] sm:$0xf0] }
  0x59   :  { %452 = vmatpush.bf16.msra.mxu0 %v4328_v33  ;;  %1005 = vmatpush.bf16.msra.mxu3 %v4460_v53  ;;  %v4435_v63 = vld [vmem:[#allocation8 + $0x78] sm:$0xf]  ;;  %v4293_v1 = vld [vmem:[#allocation5 + $0x24] sm:$0xf0]  ;;  %v4299_v2 = vld [vmem:[#allocation5 + $0x20] sm:$0xf]  ;;  %v4292_v4 = vor.u32 %v6074_v58, %v4291_v57 }
  0x5a   :  { %466 = vmatpush.bf16.msra.mxu1 %v4332_v34  ;;  %v6075_v3 = vld [vmem:[#allocation5 + $0x28] sm:$0xf0]  ;;  %v4279_v5 = vld [vmem:[#allocation5] sm:$0xf]  ;;  %v6070_v7 = vld [vmem:[#allocation5 + $0x4] sm:$0xf]  ;;  %v4436_v8 = vor.u32 %v6110_v0, %v4435_v63  ;;  %v4296_v9 = vor.u32 %v6073_v62, %v4293_v1 }
  0x5b   :  { %480 = vmatpush.bf16.msra.mxu2 %v4336_v35  ;;  %v6071_v6 = vld [vmem:[#allocation5 + $0x8] sm:$0xf0]  ;;  %v4300_v10 = vor.u32 %v6075_v3, %v4299_v2  ;;  %v4281_v11 = vld [vmem:[#allocation5 + $0xc] sm:$0xf0]  ;;  %v4423_v12 = vld [vmem:[#allocation8 + $0x60] sm:$0xf] }
  0x5c   :  { %v6107_v13 = vld [vmem:[#allocation8 + $0x68] sm:$0xf0]  ;;  %v4287_v14 = vld [vmem:[#allocation5 + $0x8] sm:$0xf]  ;;  %v6072_v15 = vld [vmem:[#allocation5 + $0x10] sm:$0xf0]  ;;  %v4280_v20 = vor.u32 %v6071_v6, %v4279_v5  ;;  %v4284_v24 = vor.u32 %v6070_v7, %v4281_v11 }
  0x5d   :  { %453 = vmatpush.bf16.msra.mxu0 %v4316_v43  ;;  %1006 = vmatpush.bf16.msra.mxu3 %v4448_v59  ;;  %v4555_v16 = vld [vmem:[#allocation8 + $0x168] sm:$0xf]  ;;  %v6140_v17 = vld [vmem:[#allocation8 + $0x170] sm:$0xf0]  ;;  %v6115_v18 = vld [vmem:[#allocation8 + $0xac] sm:$0xf]  ;;  %v4424_v21 = vor.u32 %v6107_v13, %v4423_v12  ;;  %v4288_v25 = vor.u32 %v6072_v15, %v4287_v14 }
  0x5e   :  { %467 = vmatpush.bf16.msra.mxu1 %v4320_v47  ;;  %v4461_v19 = vld [vmem:[#allocation8 + $0xb4] sm:$0xf0]  ;;  %v4651_v22 = vld [vmem:[#allocation8 + $0x228] sm:$0xf]  ;;  %v6164_v23 = vld [vmem:[#allocation8 + $0x230] sm:$0xf0]  ;;  %v4556_v27 = vor.u32 %v6140_v17, %v4555_v16 }
  0x5f   :  { %481 = vmatpush.bf16.msra.mxu2 %v4324_v48  ;;  %v6069_v26 = vld [vmem:[#allocation2] sm:$0xff]  ;;  %v4464_v28 = vor.u32 %v6115_v18, %v4461_v19  ;;  %v4411_v29 = vld [vmem:[#allocation8 + $0x48] sm:$0xf]  ;;  %v4543_v31 = vld [vmem:[#allocation8 + $0x150] sm:$0xf]  ;;  %v4652_v35 = vor.u32 %v6164_v23, %v4651_v22  ;;  %s4253_s28 = sshll.u32 %s7283_s19, 4  ;;  %s4254_s28 = int_to_ptr.hbm [resolvable:$true] %s4253_s28 }
  0x60   :  { %v6104_v30 = vld [vmem:[#allocation8 + $0x50] sm:$0xf0]  ;;  %v6137_v32 = vld [vmem:[#allocation8 + $0x158] sm:$0xf0]  ;;  %v4449_v34 = vld [vmem:[#allocation8 + $0x9c] sm:$0xf0] }
  0x61   :  { %454 = vmatpush.bf16.msra.mxu0 %v4304_v56  ;;  %1007 = vmatpush.bf16.msra.mxu3 %v4436_v8  ;;  %v6112_v33 = vld [vmem:[#allocation8 + $0x94] sm:$0xf]  ;;  %v4639_v36 = vld [vmem:[#allocation8 + $0x210] sm:$0xf]  ;;  %v6161_v37 = vld [vmem:[#allocation8 + $0x218] sm:$0xf0]  ;;  %v4412_v38 = vor.u32 %v6104_v30, %v4411_v29  ;;  %v4544_v39 = vor.u32 %v6137_v32, %v4543_v31 }
  0x62   :  { %468 = vmatpush.bf16.msra.mxu1 %v4308_v60  ;;  %v4452_v40 = vor.u32 %v6112_v33, %v4449_v34  ;;  %v4399_v41 = vld [vmem:[#allocation8 + $0x30] sm:$0xf]  ;;  %v6101_v42 = vld [vmem:[#allocation8 + $0x38] sm:$0xf0]  ;;  %v4531_v43 = vld [vmem:[#allocation8 + $0x138] sm:$0xf]  ;;  %v4640_v47 = vor.u32 %v6161_v37, %v4639_v36 }
  0x63   :  { %482 = vmatpush.bf16.msra.mxu2 %v4312_v61  ;;  %v6134_v44 = vld [vmem:[#allocation8 + $0x140] sm:$0xf0]  ;;  %v6109_v45 = vld [vmem:[#allocation8 + $0x7c] sm:$0xf]  ;;  %v4437_v46 = vld [vmem:[#allocation8 + $0x84] sm:$0xf0]  ;;  %v4400_v50 = vor.u32 %v6101_v42, %v4399_v41 }
  0x64   :  { %v4627_v48 = vld [vmem:[#allocation8 + $0x1f8] sm:$0xf]  ;;  %v6158_v49 = vld [vmem:[#allocation8 + $0x200] sm:$0xf0]  ;;  %v4532_v53 = vor.u32 %v6134_v44, %v4531_v43  ;;  %v4440_v54 = vor.u32 %v6109_v45, %v4437_v46  ;;  %v4519_v55 = vld [vmem:[#allocation8 + $0x120] sm:$0xf] }
  0x65   :  { %455 = vmatpush.bf16.msra.mxu0 %v4292_v4  ;;  %1008 = vmatpush.bf16.msra.mxu3 %v4424_v21  ;;  %v4387_v51 = vld [vmem:[#allocation8 + $0x18] sm:$0xf]  ;;  %v6098_v52 = vld [vmem:[#allocation8 + $0x20] sm:$0xf0]  ;;  %v6131_v56 = vld [vmem:[#allocation8 + $0x128] sm:$0xf0]  ;;  %v4628_v59 = vor.u32 %v6158_v49, %v4627_v48 }
  0x66   :  { %469 = vmatpush.bf16.msra.mxu1 %v4296_v9  ;;  %v6106_v57 = vld [vmem:[#allocation8 + $0x64] sm:$0xf]  ;;  %v4425_v58 = vld [vmem:[#allocation8 + $0x6c] sm:$0xf0]  ;;  %v4615_v60 = vld [vmem:[#allocation8 + $0x1e0] sm:$0xf]  ;;  %v4388_v62 = vor.u32 %v6098_v52, %v4387_v51  ;;  %v4520_v0 = vor.u32 %v6131_v56, %v4519_v55 }
  0x67   :  { %483 = vmatpush.bf16.msra.mxu2 %v4300_v10  ;;  %v6155_v61 = vld [vmem:[#allocation8 + $0x1e8] sm:$0xf0]  ;;  %v4375_v63 = vld [vmem:[#allocation8] sm:$0xf]  ;;  %v4428_v1 = vor.u32 %v6106_v57, %v4425_v58  ;;  %v4507_v3 = vld [vmem:[#allocation8 + $0x108] sm:$0xf] }
  0x68   :  { %v6095_v2 = vld [vmem:[#allocation8 + $0x8] sm:$0xf0]  ;;  %v6128_v4 = vld [vmem:[#allocation8 + $0x110] sm:$0xf0]  ;;  %v4413_v6 = vld [vmem:[#allocation8 + $0x54] sm:$0xf0]  ;;  %v4616_v8 = vor.u32 %v6155_v61, %v4615_v60 }
  0x69   :  { %456 = vmatpush.bf16.msra.mxu0 %v4280_v20  ;;  %1009 = vmatpush.bf16.msra.mxu3 %v4412_v38  ;;  %v6103_v5 = vld [vmem:[#allocation8 + $0x4c] sm:$0xf]  ;;  %v4557_v9 = vld [vmem:[#allocation8 + $0x174] sm:$0xf0]  ;;  %v4603_v10 = vld [vmem:[#allocation8 + $0x1c8] sm:$0xf]  ;;  %v4376_v12 = vor.u32 %v6095_v2, %v4375_v63  ;;  %v4508_v13 = vor.u32 %v6128_v4, %v4507_v3 }
  0x6a   :  { %470 = vmatpush.bf16.msra.mxu1 %v4284_v24  ;;  %v6139_v7 = vld [vmem:[#allocation8 + $0x16c] sm:$0xf]  ;;  %v6152_v11 = vld [vmem:[#allocation8 + $0x1d0] sm:$0xf0]  ;;  %v4416_v14 = vor.u32 %v6103_v5, %v4413_v6  ;;  %v4495_v15 = vld [vmem:[#allocation8 + $0xf0] sm:$0xf] }
  0x6b   :  { %484 = vmatpush.bf16.msra.mxu2 %v4288_v25  ;;  %v4560_v16 = vor.u32 %v6139_v7, %v4557_v9  ;;  %v6125_v17 = vld [vmem:[#allocation8 + $0xf8] sm:$0xf0]  ;;  %v6100_v18 = vld [vmem:[#allocation8 + $0x34] sm:$0xf]  ;;  %v4401_v19 = vld [vmem:[#allocation8 + $0x3c] sm:$0xf0]  ;;  %v4604_v20 = vor.u32 %v6152_v11, %v4603_v10 }
  0x6c   :  { %457 = vmatmul.bf16.vlgmr.msra.gmra.mxu0 %v6069_v26  ;;  %v6136_v21 = vld [vmem:[#allocation8 + $0x154] sm:$0xf]  ;;  %v4545_v22 = vld [vmem:[#allocation8 + $0x15c] sm:$0xf0]  ;;  %v4496_v23 = vor.u32 %v6125_v17, %v4495_v15  ;;  %v4404_v24 = vor.u32 %v6100_v18, %v4401_v19  ;;  %v4483_v25 = vld [vmem:[#allocation8 + $0xd8] sm:$0xf] }
  0x6d   :  { %1019 = vmatpush.bf16.msrb.mxu0 %v4556_v27  ;;  %471 = vmatmul.bf16.vlgmr.msra.gmra.mxu1 %v6069_v26  ;;  %v6122_v27 = vld [vmem:[#allocation8 + $0xe0] sm:$0xf0]  ;;  %v4389_v29 = vld [vmem:[#allocation8 + $0x24] sm:$0xf0]  ;;  %v6133_v30 = vld [vmem:[#allocation8 + $0x13c] sm:$0xf] }
  0x6e   :  { %1033 = vmatpush.bf16.msrb.mxu1 %v4652_v35  ;;  %485 = vmatmul.bf16.vlgmr.msra.gmra.mxu2 %v6069_v26  ;;  %v4548_v26 = vor.u32 %v6136_v21, %v4545_v22  ;;  %v4533_v31 = vld [vmem:[#allocation8 + $0x144] sm:$0xf0]  ;;  %v4484_v32 = vor.u32 %v6122_v27, %v4483_v25  ;;  %v4591_v35 = vld [vmem:[#allocation8 + $0x1b0] sm:$0xf]  ;;  %v6149_v36 = vld [vmem:[#allocation8 + $0x1b8] sm:$0xf0] }
  0x6f   :  { %1047 = vmatpush.bf16.msrb.mxu2 %v4464_v28  ;;  %1010 = vmatpush.bf16.msra.mxu3 %v4400_v50  ;;  %v6097_v28 = vld [vmem:[#allocation8 + $0x1c] sm:$0xf]  ;;  %v4536_v34 = vor.u32 %v6133_v30, %v4533_v31  ;;  %v4592_v37 = vor.u32 %v6149_v36, %v4591_v35  ;;  %v4471_v38 = vld [vmem:[#allocation8 + $0xc0] sm:$0xf]  ;;  %v4377_v42 = vld [vmem:[#allocation8 + $0xc] sm:$0xf0] }
  0x70   :  { %v4392_v33 = vor.u32 %v6097_v28, %v4389_v29  ;;  %v6130_v43 = vld [vmem:[#allocation8 + $0x124] sm:$0xf]  ;;  %v4521_v44 = vld [vmem:[#allocation8 + $0x12c] sm:$0xf0]  ;;  %v4653_v48 = vld [vmem:[#allocation8 + $0x234] sm:$0xf0] }
  0x71   :  { %1020 = vmatpush.bf16.msrb.mxu0 %v4544_v39  ;;  %v6119_v39 = vld [vmem:[#allocation8 + $0xc8] sm:$0xf0]  ;;  %v4524_v46 = vor.u32 %v6130_v43, %v4521_v44  ;;  %v4563_v49 = vld [vmem:[#allocation8 + $0x170] sm:$0xf]  ;;  %v6141_v51 = vld [vmem:[#allocation8 + $0x178] sm:$0xf0] }
  0x72   :  { %1034 = vmatpush.bf16.msrb.mxu1 %v4640_v47  ;;  %v4472_v41 = vor.u32 %v6119_v39, %v4471_v38  ;;  %v6163_v47 = vld [vmem:[#allocation8 + $0x22c] sm:$0xf]  ;;  %v4579_v52 = vld [vmem:[#allocation8 + $0x198] sm:$0xf]  ;;  %v4641_v60 = vld [vmem:[#allocation8 + $0x21c] sm:$0xf0] }
  0x73   :  { %1048 = vmatpush.bf16.msrb.mxu2 %v4452_v40  ;;  %1011 = vmatpush.bf16.msra.mxu3 %v4388_v62  ;;  %v6094_v40 = vld [vmem:[#allocation8 + $0x4] sm:$0xf]  ;;  %v4656_v50 = vor.u32 %v6163_v47, %v4653_v48  ;;  %v6127_v56 = vld [vmem:[#allocation8 + $0x10c] sm:$0xf]  ;;  %v4509_v57 = vld [vmem:[#allocation8 + $0x114] sm:$0xf0] }
  0x74   :  { %v4380_v45 = vor.u32 %v6094_v40, %v4377_v42  ;;  %v4512_v58 = vor.u32 %v6127_v56, %v4509_v57  ;;  %v4551_v62 = vld [vmem:[#allocation8 + $0x158] sm:$0xf]  ;;  %v6138_v63 = vld [vmem:[#allocation8 + $0x160] sm:$0xf0]  ;;  %v6143_v2 = vld [vmem:[#allocation8 + $0x188] sm:$0xf0] }
  0x75   :  { %1021 = vmatpush.bf16.msrb.mxu0 %v4532_v53  ;;  %v6146_v53 = vld [vmem:[#allocation8 + $0x1a0] sm:$0xf0]  ;;  %v4467_v3 = vld [vmem:[#allocation8 + $0xb0] sm:$0xf]  ;;  %v6117_v4 = vld [vmem:[#allocation8 + $0xb8] sm:$0xf0] }
  0x76   :  { %1035 = vmatpush.bf16.msrb.mxu1 %v4628_v59  ;;  %v4580_v55 = vor.u32 %v6146_v53, %v4579_v52  ;;  %v6160_v59 = vld [vmem:[#allocation8 + $0x214] sm:$0xf]  ;;  %v4468_v6 = vor.u32 %v6117_v4, %v4467_v3  ;;  %v6157_v10 = vld [vmem:[#allocation8 + $0x1fc] sm:$0xf]  ;;  %v4629_v11 = vld [vmem:[#allocation8 + $0x204] sm:$0xf0] }
  0x77   :  { %1049 = vmatpush.bf16.msrb.mxu2 %v4440_v54  ;;  %1012 = vmatpush.bf16.msra.mxu3 %v4376_v12  ;;  %v4564_v54 = vor.u32 %v6141_v51, %v4563_v49  ;;  %v4644_v61 = vor.u32 %v6160_v59, %v4641_v60  ;;  %v6124_v7 = vld [vmem:[#allocation8 + $0xf4] sm:$0xf]  ;;  %v4539_v12 = vld [vmem:[#allocation8 + $0x140] sm:$0xf]  ;;  %v6114_v17 = vld [vmem:[#allocation8 + $0xa0] sm:$0xf0] }
  0x78   :  { %v6121_v19 = vld [vmem:[#allocation8 + $0xdc] sm:$0xf]  ;;  %v6154_v22 = vld [vmem:[#allocation8 + $0x1e4] sm:$0xf]  ;;  %v4443_v28 = vld [vmem:[#allocation8 + $0x80] sm:$0xf] }
  0x79   :  { %1022 = vmatpush.bf16.msrb.mxu0 %v4520_v0  ;;  %v4567_v0 = vld [vmem:[#allocation8 + $0x180] sm:$0xf]  ;;  %v6111_v29 = vld [vmem:[#allocation8 + $0x88] sm:$0xf0]  ;;  %v6118_v31 = vld [vmem:[#allocation8 + $0xc4] sm:$0xf] }
  0x7a   :  { %1036 = vmatpush.bf16.msrb.mxu1 %v4616_v8  ;;  %v4568_v5 = vor.u32 %v6143_v2, %v4567_v0  ;;  %v4497_v8 = vld [vmem:[#allocation8 + $0xfc] sm:$0xf0]  ;;  %v4444_v30 = vor.u32 %v6111_v29, %v4443_v28  ;;  %v4605_v35 = vld [vmem:[#allocation8 + $0x1d4] sm:$0xf0]  ;;  %v4515_v36 = vld [vmem:[#allocation8 + $0x110] sm:$0xf] }
  0x7b   :  { %1050 = vmatpush.bf16.msrb.mxu2 %v4428_v1  ;;  %1061 = vmatpush.bf16.msrb.mxu3 %v4560_v16  ;;  %v4552_v1 = vor.u32 %v6138_v63, %v4551_v62  ;;  %v4500_v9 = vor.u32 %v6124_v7, %v4497_v8  ;;  %v4455_v16 = vld [vmem:[#allocation8 + $0x98] sm:$0xf]  ;;  %v6129_v38 = vld [vmem:[#allocation8 + $0x118] sm:$0xf0]  ;;  %v4431_v40 = vld [vmem:[#allocation8 + $0x68] sm:$0xf] }
  0x7c   :  { %v4456_v18 = vor.u32 %v6114_v17, %v4455_v16  ;;  %v4516_v39 = vor.u32 %v6129_v38, %v4515_v36  ;;  %v6148_v43 = vld [vmem:[#allocation8 + $0x1b4] sm:$0xf]  ;;  %v4593_v44 = vld [vmem:[#allocation8 + $0x1bc] sm:$0xf0]  ;;  %v6126_v47 = vld [vmem:[#allocation8 + $0x100] sm:$0xf0] }
  0x7d   :  { %1023 = vmatpush.bf16.msrb.mxu0 %v4508_v13  ;;  %v4632_v13 = vor.u32 %v6157_v10, %v4629_v11  ;;  %v4419_v49 = vld [vmem:[#allocation8 + $0x50] sm:$0xf]  ;;  %v6145_v52 = vld [vmem:[#allocation8 + $0x19c] sm:$0xf]  ;;  %v4581_v53 = vld [vmem:[#allocation8 + $0x1a4] sm:$0xf0] }
  0x7e   :  { %1037 = vmatpush.bf16.msrb.mxu1 %v4604_v20  ;;  %v4485_v20 = vld [vmem:[#allocation8 + $0xe4] sm:$0xf0]  ;;  %v6123_v56 = vld [vmem:[#allocation8 + $0xe8] sm:$0xf0]  ;;  %v307_v57 = vld [vmem:[#allocation7] sm:$0x7] }
  0x7f   :  { %1051 = vmatpush.bf16.msrb.mxu2 %v4416_v14  ;;  %1062 = vmatpush.bf16.msrb.mxu3 %v4548_v26  ;;  %v6135_v14 = vld [vmem:[#allocation8 + $0x148] sm:$0xf0]  ;;  %v4488_v21 = vor.u32 %v6121_v19, %v4485_v20  ;;  %v6132_v26 = vld [vmem:[#allocation8 + $0x130] sm:$0xf0]  ;;  %v4407_v59 = vld [vmem:[#allocation8 + $0x38] sm:$0xf] }
  0x80   :  { %v4540_v15 = vor.u32 %v6135_v14, %v4539_v12  ;;  %v6102_v60 = vld [vmem:[#allocation8 + $0x40] sm:$0xf0]  ;;  %v4569_v63 = vld [vmem:[#allocation8 + $0x18c] sm:$0xf0]  ;;  %v4479_v0 = vld [vmem:[#allocation8 + $0xc8] sm:$0xf] }
  0x81   :  { %1024 = vmatpush.bf16.msrb.mxu0 %v4496_v23  ;;  %v4617_v23 = vld [vmem:[#allocation8 + $0x1ec] sm:$0xf0]  ;;  %v4408_v62 = vor.u32 %v6102_v60, %v4407_v59  ;;  %v309_v2 = vperm.slane %v307_v57, 0  ;;  %v310_v3 = vperm.slane %v307_v57, 1  ;;  %v4395_v8 = vld [vmem:[#allocation8 + $0x20] sm:$0xf] }
  0x82   :  { %1038 = vmatpush.bf16.msrb.mxu1 %v4592_v37  ;;  %v4620_v25 = vor.u32 %v6154_v22, %v4617_v23  ;;  %v4383_v14 = vld [vmem:[#allocation8 + $0x8] sm:$0xf]  ;;  %v6182_v59 = vld [vmem:[#allocation10 + $0x80] sm:$0xf0]  ;;  %s6947_s20 = smov 128   ;;  %s6948_s1 = smov 8  }
  0x83   :  { %1052 = vmatpush.bf16.msrb.mxu2 %v4404_v24  ;;  %1063 = vmatpush.bf16.msrb.mxu3 %v4536_v34  ;;  %v4527_v24 = vld [vmem:[#allocation8 + $0x128] sm:$0xf]  ;;  %v6151_v34 = vld [vmem:[#allocation8 + $0x1cc] sm:$0xf] }
  0x84   :  { %v4528_v27 = vor.u32 %v6132_v26, %v4527_v24  ;;  %v4608_v37 = vor.u32 %v6151_v34, %v4605_v35 }
  0x85   :  { %1025 = vmatpush.bf16.msrb.mxu0 %v4484_v32  ;;  %v4473_v32 = vld [vmem:[#allocation8 + $0xcc] sm:$0xf0] }
  0x86   :  { %1039 = vmatpush.bf16.msrb.mxu1 %v4580_v55  ;;  %v4584_v55 = vor.u32 %v6145_v52, %v4581_v53  ;;  %v6185_v52 = vld [vmem:[#allocation10 + $0x98] sm:$0xf0] }
  0x87   :  { %1053 = vmatpush.bf16.msrb.mxu2 %v4392_v33  ;;  %1064 = vmatpush.bf16.msrb.mxu3 %v4524_v46  ;;  %v4476_v33 = vor.u32 %v6118_v31, %v4473_v32  ;;  %v4596_v46 = vor.u32 %v6148_v43, %v4593_v44  ;;  %v6165_v31 = vld [vmem:[#allocation8 + $0x238] sm:$0xf0]  ;;  %v4647_v43 = vld [vmem:[#allocation8 + $0x218] sm:$0xf]  ;;  %v6162_v44 = vld [vmem:[#allocation8 + $0x220] sm:$0xf0] }
  0x89   :  { %1026 = vmatpush.bf16.msrb.mxu0 %v4472_v41  ;;  %v6108_v41 = vld [vmem:[#allocation8 + $0x70] sm:$0xf0] }
  0x8a   :  { %1040 = vmatpush.bf16.msrb.mxu1 %v4568_v5  ;;  %v4432_v42 = vor.u32 %v6108_v41, %v4431_v40 }
  0x8b   :  { %1054 = vmatpush.bf16.msrb.mxu2 %v4380_v45  ;;  %1065 = vmatpush.bf16.msrb.mxu3 %v4512_v58  ;;  %v4503_v45 = vld [vmem:[#allocation8 + $0xf8] sm:$0xf] }
  0x8c   :  { %v4504_v48 = vor.u32 %v6126_v47, %v4503_v45  ;;  %v4747_v47 = vld [vmem:[#allocation10 + $0xa8] sm:$0xf] }
  0x8d   :  { %1075 = vmatpush.bf16.msra.mxu0 %v4656_v50  ;;  %v6105_v50 = vld [vmem:[#allocation8 + $0x58] sm:$0xf0] }
  0x8e   :  { %1089 = vmatpush.bf16.msra.mxu1 %v4468_v6  ;;  %v4420_v51 = vor.u32 %v6105_v50, %v4419_v49  ;;  %v4735_v49 = vld [vmem:[#allocation10 + $0x90] sm:$0xf]  ;;  %v4648_v50 = vor.u32 %v6162_v44, %v4647_v43  ;;  %v4737_v43 = vld [vmem:[#allocation10 + $0x9c] sm:$0xf0] }
  0x8f   :  { %1103 = vmatpush.bf16.msra.mxu2 %v4564_v54  ;;  %1066 = vmatpush.bf16.msrb.mxu3 %v4500_v9  ;;  %v4491_v54 = vld [vmem:[#allocation8 + $0xe0] sm:$0xf]  ;;  %v6099_v9 = vld [vmem:[#allocation8 + $0x28] sm:$0xf0] }
  0x90   :  { %v4492_v58 = vor.u32 %v6123_v56, %v4491_v54  ;;  %v4396_v10 = vor.u32 %v6099_v9, %v4395_v8  ;;  %v4635_v54 = vld [vmem:[#allocation8 + $0x200] sm:$0xf]  ;;  %v4736_v56 = vor.u32 %v6185_v52, %v4735_v49  ;;  %v4699_v9 = vld [vmem:[#allocation10 + $0x48] sm:$0xf] }
  0x91   :  { %1076 = vmatpush.bf16.msra.mxu0 %v4644_v61  ;;  %v6142_v61 = vld [vmem:[#allocation8 + $0x184] sm:$0xf] }
  0x92   :  { %1090 = vmatpush.bf16.msra.mxu1 %v4456_v18  ;;  %v4572_v4 = vor.u32 %v6142_v61, %v4569_v63  ;;  %v4623_v61 = vld [vmem:[#allocation8 + $0x1e8] sm:$0xf] }
  0x93   :  { %1104 = vmatpush.bf16.msra.mxu2 %v4552_v1  ;;  %1067 = vmatpush.bf16.msrb.mxu3 %v4488_v21  ;;  %v6120_v1 = vld [vmem:[#allocation8 + $0xd0] sm:$0xf0] }
  0x94   :  { %v4480_v5 = vor.u32 %v6120_v1, %v4479_v0  ;;  %v4711_v0 = vld [vmem:[#allocation10 + $0x60] sm:$0xf]  ;;  %v6179_v1 = vld [vmem:[#allocation10 + $0x68] sm:$0xf0] }
  0x95   :  { %1077 = vmatpush.bf16.msra.mxu0 %v4632_v13  ;;  %v311_v13 = vperm.slane %v307_v57, 2 }
  0x96   :  { %1091 = vmatpush.bf16.msra.mxu1 %v4444_v30  ;;  %v4659_v30 = vld [vmem:[#allocation8 + $0x230] sm:$0xf] }
  0x97   :  { %1105 = vmatpush.bf16.msra.mxu2 %v4540_v15  ;;  %1068 = vmatpush.bf16.msrb.mxu3 %v4476_v33  ;;  %v6096_v15 = vld [vmem:[#allocation8 + $0x10] sm:$0xf0] }
  0x98   :  { %v4384_v16 = vor.u32 %v6096_v15, %v4383_v14  ;;  %v4831_v14 = vld [vmem:[#allocation10 + $0x150] sm:$0xf] }
  0x99   :  { %1078 = vmatpush.bf16.msra.mxu0 %v4620_v25 }
  0x9a   :  { %1092 = vmatpush.bf16.msra.mxu1 %v4432_v42 }
  0x9b   :  { %1106 = vmatpush.bf16.msra.mxu2 %v4528_v27 }
  0x9d   :  { %1079 = vmatpush.bf16.msra.mxu0 %v4608_v37 }
  0x9e   :  { %1093 = vmatpush.bf16.msra.mxu1 %v4420_v51 }
  0x9f   :  { %1107 = vmatpush.bf16.msra.mxu2 %v4516_v39  ;;  %v4660_v39 = vor.u32 %v6165_v31, %v4659_v30  ;;  %v6144_v30 = vld [vmem:[#allocation8 + $0x190] sm:$0xf0]  ;;  %v6187_v31 = vld [vmem:[#allocation10 + $0xac] sm:$0xf] }
  0xa1   :  { %1080 = vmatpush.bf16.msra.mxu0 %v4596_v46 }
  0xa2   :  { %1094 = vmatpush.bf16.msra.mxu1 %v4408_v62  ;;  %v6156_v62 = vld [vmem:[#allocation8 + $0x1f0] sm:$0xf0] }
  0xa3   :  { %1108 = vmatpush.bf16.msra.mxu2 %v4504_v48  ;;  %v6188_v48 = vld [vmem:[#allocation10 + $0xb0] sm:$0xf0] }
  0xa4   :  { %v4748_v51 = vor.u32 %v6188_v48, %v4747_v47  ;;  %v6181_v47 = vld [vmem:[#allocation10 + $0x7c] sm:$0xf]  ;;  %v4725_v48 = vld [vmem:[#allocation10 + $0x84] sm:$0xf0] }
  0xa5   :  { %1081 = vmatpush.bf16.msra.mxu0 %v4584_v55  ;;  %v6159_v55 = vld [vmem:[#allocation8 + $0x208] sm:$0xf0]  ;;  %v4728_v49 = vor.u32 %v6181_v47, %v4725_v48 }
  0xa6   :  { %1095 = vmatpush.bf16.msra.mxu1 %v4396_v10  ;;  %v4636_v60 = vor.u32 %v6159_v55, %v4635_v54  ;;  %v6176_v10 = vld [vmem:[#allocation10 + $0x50] sm:$0xf0]  ;;  %v4701_v54 = vld [vmem:[#allocation10 + $0x54] sm:$0xf0]  ;;  %v6207_v47 = vld [vmem:[#allocation10 + $0x148] sm:$0xf0] }
  0xa7   :  { %1109 = vmatpush.bf16.msra.mxu2 %v4492_v58  ;;  %v4723_v58 = vld [vmem:[#allocation10 + $0x78] sm:$0xf]  ;;  %v4700_v15 = vor.u32 %v6176_v10, %v4699_v9  ;;  %v4939_v10 = vld [vmem:[#allocation10 + $0x228] sm:$0xf] }
  0xa8   :  { %v4724_v63 = vor.u32 %v6182_v59, %v4723_v58  ;;  %v4689_v58 = vld [vmem:[#allocation10 + $0x3c] sm:$0xf0]  ;;  %v6208_v59 = vld [vmem:[#allocation10 + $0x154] sm:$0xf] }
  0xa9   :  { %1082 = vmatpush.bf16.msra.mxu0 %v4572_v4  ;;  %v6153_v4 = vld [vmem:[#allocation8 + $0x1d8] sm:$0xf0] }
  0xaa   :  { %1096 = vmatpush.bf16.msra.mxu1 %v4384_v16  ;;  %v6209_v16 = vld [vmem:[#allocation10 + $0x158] sm:$0xf0] }
  0xab   :  { %1110 = vmatpush.bf16.msra.mxu2 %v4480_v5  ;;  %v4843_v5 = vld [vmem:[#allocation10 + $0x168] sm:$0xf] }
  0xe9   :  { %v458_v6 = vpop.f32.mrf.mxu0 }
  0xea   :  { %v472_v7 = vpop.f32.mrf.mxu1  ;;  %v459_v11 = vadd.f32 %v458_v6, %v309_v2  ;;  %v6212_v6 = vld [vmem:[#allocation10 + $0x170] sm:$0xf0] }
  0xeb   :  { %v473_v12 = vadd.f32 %v472_v7, %v310_v3  ;;  %v4712_v7 = vor.u32 %v6179_v1, %v4711_v0  ;;  %v4844_v8 = vor.u32 %v6212_v6, %v4843_v5  ;;  %v6169_v1 = vld [vmem:[#allocation10 + $0x1c] sm:$0xf]  ;;  %v4821_v5 = vld [vmem:[#allocation10 + $0x144] sm:$0xf0] }
  0xec   :  { %v491_v17 = vmax.f32 %v459_v11, 0.0 }
  0xed   :  { %v492_v18 = vmax.f32 %v473_v12, 0.0  ;;  %v4599_v12 = vld [vmem:[#allocation8 + $0x1b8] sm:$0xf] }
  0xef   :  { %v7118_v25 = vpack.c.bf16 %v492_v18, %v491_v17  ;;  %v4687_v17 = vld [vmem:[#allocation10 + $0x30] sm:$0xf]  ;;  %v6173_v18 = vld [vmem:[#allocation10 + $0x38] sm:$0xf0] }
  0xf1   :  { %v486_v19 = vpop.f32.mrf.mxu2  ;;  %v460_v21 = vpop.f32.mrf.mxu0  ;;  %v609_v33 = vunpack.c.l.b16 %v7118_v25  ;;  %v610_v34 = vunpack.c.h.b16 %v7118_v25 }
  0xf2   :  { %v487_v20 = vadd.f32 %v486_v19, %v311_v13  ;;  %v461_v22 = vadd.f32 %v460_v21, %v309_v2  ;;  %v474_v23 = vpop.f32.mrf.mxu1  ;;  %v4624_v2 = vor.u32 %v6156_v62, %v4623_v61  ;;  %v4832_v19 = vor.u32 %v6209_v16, %v4831_v14  ;;  %v4587_v21 = vld [vmem:[#allocation8 + $0x1a0] sm:$0xf]  ;;  %v4819_v62 = vld [vmem:[#allocation10 + $0x138] sm:$0xf]  ;;  %v4665_v14 = vld [vmem:[#allocation10 + $0xc] sm:$0xf0] }
  0xf3   :  { %v475_v24 = vadd.f32 %v474_v23, %v310_v3  ;;  %v4611_v3 = vld [vmem:[#allocation8 + $0x1d0] sm:$0xf]  ;;  %v4688_v23 = vor.u32 %v6173_v18, %v4687_v17  ;;  %v4833_v61 = vld [vmem:[#allocation10 + $0x15c] sm:$0xf0] }
  0xf4   :  { %v494_v26 = vmax.f32 %v461_v22, 0.0  ;;  %v493_v27 = vmax.f32 %v487_v20, 0.0  ;;  %v4612_v11 = vor.u32 %v6153_v4, %v4611_v3  ;;  %v6147_v22 = vld [vmem:[#allocation8 + $0x1a8] sm:$0xf0]  ;;  %v6205_v3 = vld [vmem:[#allocation10 + $0x13c] sm:$0xf] }
  0xf5   :  { %v495_v28 = vmax.f32 %v475_v24, 0.0  ;;  %v4675_v24 = vld [vmem:[#allocation10 + $0x18] sm:$0xf]  ;;  %v4824_v6 = vor.u32 %v6205_v3, %v4821_v5  ;;  %v4809_v16 = vld [vmem:[#allocation10 + $0x12c] sm:$0xf0] }
  0xf6   :  { %v7124_v35 = vpack.c.bf16 %v493_v27, %v493_v27  ;;  %v4588_v27 = vor.u32 %v6147_v22, %v4587_v21  ;;  %v4795_v21 = vld [vmem:[#allocation10 + $0x108] sm:$0xf]  ;;  %v6224_v5 = vld [vmem:[#allocation10 + $0x1d0] sm:$0xf0] }
  0xf7   :  { %v7120_v29 = vpack.c.bf16 %v495_v28, %v494_v26  ;;  %v6170_v26 = vld [vmem:[#allocation10 + $0x20] sm:$0xf0]  ;;  %v4575_v28 = vld [vmem:[#allocation8 + $0x188] sm:$0xf] }
  0xf8   :  { %v611_v45 = vunpack.c.l.b16 %v7124_v35 }
  0xf9   :  { %v488_v32 = vpop.f32.mrf.mxu2  ;;  %v612_v37 = vunpack.c.l.b16 %v7120_v29  ;;  %v613_v38 = vunpack.c.h.b16 %v7120_v29 }
  0xfa   :  { %v489_v36 = vadd.f32 %v488_v32, %v311_v13  ;;  %v6150_v13 = vld [vmem:[#allocation8 + $0x1c0] sm:$0xf0]  ;;  %v4749_v32 = vld [vmem:[#allocation10 + $0xb4] sm:$0xf0] }
  0xfb   :  { %v7128_v41 = vpack.c.b16 %v612_v37, %v609_v33  ;;  %v616_v42 = vpack.c.b16 %v613_v38, %v610_v34  ;;  %v4600_v20 = vor.u32 %v6150_v13, %v4599_v12  ;;  %v4676_v33 = vor.u32 %v6170_v26, %v4675_v24  ;;  %v4663_v34 = vld [vmem:[#allocation10] sm:$0xf]  ;;  %v6211_v38 = vld [vmem:[#allocation10 + $0x16c] sm:$0xf]  ;;  %v6166_v12 = vld [vmem:[#allocation10 + $0x4] sm:$0xf] }
  0xfc   :  { %v496_v40 = vmax.f32 %v489_v36, 0.0  ;;  %v6167_v36 = vld [vmem:[#allocation10 + $0x8] sm:$0xf0]  ;;  %v4576_v37 = vor.u32 %v6144_v30, %v4575_v28  ;;  %v4668_v17 = vor.u32 %v6166_v12, %v4665_v14  ;;  %v4927_v26 = vld [vmem:[#allocation10 + $0x210] sm:$0xf] }
  0xfd   :  { %1013 = vmatmul.bf16.vlgmr.msra.gmra.mxu3 %v7128_v41  ;;  %1027 = vmatmul.bf16.vlgmr.msrb.gmra.mxu0 %v616_v42  ;;  %v4664_v44 = vor.u32 %v6167_v36, %v4663_v34  ;;  %v6199_v28 = vld [vmem:[#allocation10 + $0x10c] sm:$0xf]  ;;  %v4929_v14 = vld [vmem:[#allocation10 + $0x21c] sm:$0xf0] }
  0xfe   :  { %v7131_v46 = vpack.c.bf16 %v496_v40, %v496_v40  ;;  %1055 = vmatmul.bf16.vlgmr.msrb.gmra.mxu2 %v7128_v41  ;;  %1117 = vmatpush.bf16.msra.mxu3 %v4660_v39  ;;  %v4845_v39 = vld [vmem:[#allocation10 + $0x174] sm:$0xf0]  ;;  %v4752_v40 = vor.u32 %v6187_v31, %v4749_v32 }
  0xff   :  { %1628 = vmatpush.bf16.msrb.mxu0 %v4748_v51  ;;  %v4713_v51 = vld [vmem:[#allocation10 + $0x6c] sm:$0xf0]  ;;  %v4797_v31 = vld [vmem:[#allocation10 + $0x114] sm:$0xf0] }
 0x100   :  { %v614_v53 = vunpack.c.l.b16 %v7131_v46  ;;  %v4839_v32 = vld [vmem:[#allocation10 + $0x158] sm:$0xf]  ;;  %v4800_v34 = vor.u32 %v6199_v28, %v4797_v31  ;;  %v6195_v31 = vld [vmem:[#allocation10 + $0xe8] sm:$0xf0] }
 0x102   :  { %v7136_v57 = vpack.c.b16 %v614_v53, %v611_v45  ;;  %1118 = vmatpush.bf16.msra.mxu3 %v4648_v50  ;;  %v4848_v45 = vor.u32 %v6211_v38, %v4845_v39  ;;  %v6178_v50 = vld [vmem:[#allocation10 + $0x64] sm:$0xf]  ;;  %v6175_v53 = vld [vmem:[#allocation10 + $0x4c] sm:$0xf]  ;;  %v6197_v38 = vld [vmem:[#allocation10 + $0xf8] sm:$0xf0] }
 0x103   :  { %1629 = vmatpush.bf16.msrb.mxu0 %v4736_v56  ;;  %v4716_v52 = vor.u32 %v6178_v50, %v4713_v51  ;;  %v4704_v55 = vor.u32 %v6175_v53, %v4701_v54  ;;  %v6172_v56 = vld [vmem:[#allocation10 + $0x34] sm:$0xf]  ;;  %v4771_v50 = vld [vmem:[#allocation10 + $0xd8] sm:$0xf]  ;;  %v6194_v51 = vld [vmem:[#allocation10 + $0xe0] sm:$0xf0] }
 0x104   :  { %1041 = vmatmul.bf16.vlgmr.msrb.gmra.mxu1 %v7136_v57  ;;  %v4903_v53 = vld [vmem:[#allocation10 + $0x1e0] sm:$0xf]  ;;  %v6227_v54 = vld [vmem:[#allocation10 + $0x1e8] sm:$0xf0] }
 0x105   :  { %1642 = vmatpush.bf16.msrb.mxu1 %v4844_v8  ;;  %v6203_v8 = vld [vmem:[#allocation10 + $0x128] sm:$0xf0] }
 0x106   :  { %1119 = vmatpush.bf16.msra.mxu3 %v4636_v60  ;;  %v4692_v60 = vor.u32 %v6172_v56, %v4689_v58  ;;  %v4904_v56 = vor.u32 %v6227_v54, %v4903_v53  ;;  %v4773_v58 = vld [vmem:[#allocation10 + $0xe4] sm:$0xf0] }
 0x107   :  { %1630 = vmatpush.bf16.msrb.mxu0 %v4724_v63  ;;  %v6206_v63 = vld [vmem:[#allocation10 + $0x140] sm:$0xf0] }
 0x108   :  { %v4820_v0 = vor.u32 %v6206_v63, %v4819_v62  ;;  %v4759_v63 = vld [vmem:[#allocation10 + $0xc0] sm:$0xf] }
 0x109   :  { %1643 = vmatpush.bf16.msrb.mxu1 %v4832_v19  ;;  %v4851_v19 = vld [vmem:[#allocation10 + $0x170] sm:$0xf] }
 0x10a   :  { %1120 = vmatpush.bf16.msra.mxu3 %v4624_v2  ;;  %v4677_v2 = vld [vmem:[#allocation10 + $0x24] sm:$0xf0] }
 0x10b   :  { %1631 = vmatpush.bf16.msrb.mxu0 %v4712_v7  ;;  %v4680_v4 = vor.u32 %v6169_v1, %v4677_v2  ;;  %v4807_v7 = vld [vmem:[#allocation10 + $0x120] sm:$0xf]  ;;  %v6235_v1 = vld [vmem:[#allocation10 + $0x22c] sm:$0xf]  ;;  %v4941_v2 = vld [vmem:[#allocation10 + $0x234] sm:$0xf0] }
 0x10c   :  { %v4808_v9 = vor.u32 %v6203_v8, %v4807_v7  ;;  %v4944_v3 = vor.u32 %v6235_v1, %v4941_v2  ;;  %v4761_v8 = vld [vmem:[#allocation10 + $0xcc] sm:$0xf0] }
 0x10d   :  { %1069 = vmatmul.bf16.vlgmr.msrb.gmra.mxu3 %v616_v42  ;;  %1083 = vmatmul.bf16.vlgmr.msra.gmra.mxu0 %v7136_v57 }
 0x10e   :  { %1111 = vmatmul.bf16.vlgmr.msra.gmra.mxu2 %v616_v42  ;;  %1121 = vmatpush.bf16.msra.mxu3 %v4612_v11  ;;  %v6184_v42 = vld [vmem:[#allocation10 + $0x94] sm:$0xf] }
 0x10f   :  { %1632 = vmatpush.bf16.msrb.mxu0 %v4700_v15  ;;  %1644 = vmatpush.bf16.msrb.mxu1 %v4820_v0  ;;  %v6236_v11 = vld [vmem:[#allocation10 + $0x230] sm:$0xf0]  ;;  %v6202_v15 = vld [vmem:[#allocation10 + $0x124] sm:$0xf] }
 0x110   :  { %v4940_v13 = vor.u32 %v6236_v11, %v4939_v10  ;;  %v4812_v18 = vor.u32 %v6202_v15, %v4809_v16  ;;  %v6201_v10 = vld [vmem:[#allocation10 + $0x118] sm:$0xf0]  ;;  %v4879_v16 = vld [vmem:[#allocation10 + $0x1b0] sm:$0xf] }
 0x112   :  { %1122 = vmatpush.bf16.msra.mxu3 %v4600_v20  ;;  %v6213_v20 = vld [vmem:[#allocation10 + $0x178] sm:$0xf0]  ;;  %1656 = vmatpush.bf16.msrb.mxu2 %v4940_v13  ;;  %v6232_v13 = vld [vmem:[#allocation10 + $0x214] sm:$0xf] }
 0x113   :  { %1633 = vmatpush.bf16.msrb.mxu0 %v4688_v23  ;;  %1645 = vmatpush.bf16.msrb.mxu1 %v4808_v9  ;;  %v4852_v22 = vor.u32 %v6213_v20, %v4851_v19  ;;  %v6200_v23 = vld [vmem:[#allocation10 + $0x110] sm:$0xf0]  ;;  %v4803_v9 = vld [vmem:[#allocation10 + $0x110] sm:$0xf]  ;;  %v4932_v15 = vor.u32 %v6232_v13, %v4929_v14  ;;  %v4791_v19 = vld [vmem:[#allocation10 + $0xf8] sm:$0xf] }
 0x114   :  { %1097 = vmatmul.bf16.vlgmr.msra.gmra.mxu1 %v7128_v41  ;;  %v4740_v41 = vor.u32 %v6184_v42, %v4737_v43  ;;  %v4796_v24 = vor.u32 %v6200_v23, %v4795_v21  ;;  %v6230_v42 = vld [vmem:[#allocation10 + $0x200] sm:$0xf0]  ;;  %v6196_v43 = vld [vmem:[#allocation10 + $0xf4] sm:$0xf]  ;;  %v4804_v12 = vor.u32 %v6201_v10, %v4803_v9  ;;  %v4917_v23 = vld [vmem:[#allocation10 + $0x204] sm:$0xf0] }
 0x115   :  { %v6198_v20 = vld [vmem:[#allocation10 + $0x100] sm:$0xf0]  ;;  %v4719_v9 = vld [vmem:[#allocation10 + $0x68] sm:$0xf]  ;;  %v6180_v10 = vld [vmem:[#allocation10 + $0x70] sm:$0xf0] }
 0x116   :  { %1123 = vmatpush.bf16.msra.mxu3 %v4588_v27  ;;  %v6233_v27 = vld [vmem:[#allocation10 + $0x218] sm:$0xf0]  ;;  %v4792_v21 = vor.u32 %v6198_v20, %v4791_v19  ;;  %v4720_v13 = vor.u32 %v6180_v10, %v4719_v9 }
 0x117   :  { %1634 = vmatpush.bf16.msrb.mxu0 %v4676_v33  ;;  %v4928_v30 = vor.u32 %v6233_v27, %v4927_v26  ;;  %v6210_v33 = vld [vmem:[#allocation10 + $0x160] sm:$0xf0]  ;;  %1646 = vmatpush.bf16.msrb.mxu1 %v4796_v24  ;;  %v4867_v26 = vld [vmem:[#allocation10 + $0x198] sm:$0xf]  ;;  %v6237_v19 = vld [vmem:[#allocation10 + $0x238] sm:$0xf0] }
 0x118   :  { %v4840_v36 = vor.u32 %v6210_v33, %v4839_v32  ;;  %v6218_v27 = vld [vmem:[#allocation10 + $0x1a0] sm:$0xf0] }
 0x119   :  { %1657 = vmatpush.bf16.msrb.mxu2 %v4928_v30  ;;  %v4868_v28 = vor.u32 %v6218_v27, %v4867_v26  ;;  %v4779_v30 = vld [vmem:[#allocation10 + $0xe0] sm:$0xf] }
 0x11a   :  { %1124 = vmatpush.bf16.msra.mxu3 %v4576_v37  ;;  %v4783_v37 = vld [vmem:[#allocation10 + $0xf0] sm:$0xf]  ;;  %v4780_v32 = vor.u32 %v6195_v31, %v4779_v30 }
 0x11b   :  { %1635 = vmatpush.bf16.msrb.mxu0 %v4664_v44  ;;  %v4784_v39 = vor.u32 %v6197_v38, %v4783_v37  ;;  %v4905_v37 = vld [vmem:[#allocation10 + $0x1ec] sm:$0xf0] }
 0x11d   :  { %1125 = vmatmul.bf16.vlgmr.msra.gmra.mxu3 %v7136_v57  ;;  %v4836_v57 = vor.u32 %v6208_v59, %v4833_v61  ;;  %1647 = vmatpush.bf16.msrb.mxu1 %v4784_v39  ;;  %v4815_v59 = vld [vmem:[#allocation10 + $0x128] sm:$0xf]  ;;  %v4855_v39 = vld [vmem:[#allocation10 + $0x180] sm:$0xf] }
 0x11e   :  { %1670 = vmatpush.bf16.msrb.mxu3 %v4752_v40  ;;  %v4915_v40 = vld [vmem:[#allocation10 + $0x1f8] sm:$0xf] }
 0x11f   :  { %1684 = vmatpush.bf16.msra.mxu0 %v4848_v45  ;;  %v4916_v44 = vor.u32 %v6230_v42, %v4915_v40  ;;  %v4785_v45 = vld [vmem:[#allocation10 + $0xfc] sm:$0xf0]  ;;  %v6215_v40 = vld [vmem:[#allocation10 + $0x188] sm:$0xf0] }
 0x120   :  { %v4788_v48 = vor.u32 %v6196_v43, %v4785_v45  ;;  %v4856_v42 = vor.u32 %v6215_v40, %v4855_v39  ;;  %v4755_v43 = vld [vmem:[#allocation10 + $0xb0] sm:$0xf]  ;;  %v4767_v45 = vld [vmem:[#allocation10 + $0xc8] sm:$0xf]  ;;  %v6174_v39 = vld [vmem:[#allocation10 + $0x40] sm:$0xf0] }
 0x121   :  { %1658 = vmatpush.bf16.msrb.mxu2 %v4916_v44  ;;  %v6189_v44 = vld [vmem:[#allocation10 + $0xb8] sm:$0xf0] }
 0x122   :  { %1671 = vmatpush.bf16.msrb.mxu3 %v4740_v41  ;;  %v4827_v41 = vld [vmem:[#allocation10 + $0x140] sm:$0xf] }
 0x123   :  { %1685 = vmatpush.bf16.msra.mxu0 %v4836_v57  ;;  %v6191_v57 = vld [vmem:[#allocation10 + $0xc8] sm:$0xf0] }
 0x124   :  { %v4760_v0 = vor.u32 %v6191_v57, %v4759_v63  ;;  %v4731_v57 = vld [vmem:[#allocation10 + $0x80] sm:$0xf] }
 0x125   :  { %1659 = vmatpush.bf16.msrb.mxu2 %v4904_v56  ;;  %v6186_v56 = vld [vmem:[#allocation10 + $0xa0] sm:$0xf0] }
 0x126   :  { %1672 = vmatpush.bf16.msrb.mxu3 %v4728_v49  ;;  %v4828_v49 = vor.u32 %v6207_v47, %v4827_v41  ;;  %v4756_v47 = vor.u32 %v6189_v44, %v4755_v43  ;;  %v4683_v43 = vld [vmem:[#allocation10 + $0x20] sm:$0xf]  ;;  %v6171_v44 = vld [vmem:[#allocation10 + $0x28] sm:$0xf0] }
 0x127   :  { %1686 = vmatpush.bf16.msra.mxu0 %v4824_v6  ;;  %v6190_v6 = vld [vmem:[#allocation10 + $0xc4] sm:$0xf] }
 0x128   :  { %v4764_v11 = vor.u32 %v6190_v6, %v4761_v8  ;;  %v4869_v6 = vld [vmem:[#allocation10 + $0x1a4] sm:$0xf0] }
 0x12a   :  { %1673 = vmatpush.bf16.msrb.mxu3 %v4716_v52  ;;  %v4772_v52 = vor.u32 %v6194_v51, %v4771_v50  ;;  %v6223_v51 = vld [vmem:[#allocation10 + $0x1cc] sm:$0xf] }
 0x12b   :  { %1687 = vmatpush.bf16.msra.mxu0 %v4812_v18 }
 0x12c   :  { %1648 = vmatpush.bf16.msrb.mxu1 %v4772_v52  ;;  %v4893_v52 = vld [vmem:[#allocation10 + $0x1d4] sm:$0xf0] }
 0x12d   :  { %v4896_v53 = vor.u32 %v6223_v51, %v4893_v52  ;;  %v4671_v51 = vld [vmem:[#allocation10 + $0x8] sm:$0xf]  ;;  %v6168_v52 = vld [vmem:[#allocation10 + $0x10] sm:$0xf0] }
 0x12e   :  { %1674 = vmatpush.bf16.msrb.mxu3 %v4704_v55  ;;  %v6193_v55 = vld [vmem:[#allocation10 + $0xdc] sm:$0xf] }
 0x12f   :  { %1688 = vmatpush.bf16.msra.mxu0 %v4800_v34  ;;  %v4776_v61 = vor.u32 %v6193_v55, %v4773_v58  ;;  %v7145_v34 = vld [vmem:[%s7268_s4] sm:$0x7]  ;;  %v4743_v55 = vld [vmem:[#allocation10 + $0x98] sm:$0xf] }
 0x130   :  { %1649 = vmatpush.bf16.msrb.mxu1 %v4760_v0  ;;  %v599_v41 = vperm.slane %v7145_v34, 0  ;;  %v6183_v0 = vld [vmem:[#allocation10 + $0x88] sm:$0xf0] }
 0x131   :  { %v4732_v2 = vor.u32 %v6183_v0, %v4731_v57  ;;  %v601_v57 = vperm.slane %v7145_v34, 2 }
 0x132   :  { %1675 = vmatpush.bf16.msrb.mxu3 %v4692_v60  ;;  %v6204_v60 = vld [vmem:[#allocation10 + $0x130] sm:$0xf0] }
 0x133   :  { %1689 = vmatpush.bf16.msra.mxu0 %v4788_v48  ;;  %v4816_v62 = vor.u32 %v6204_v60, %v4815_v59  ;;  %v6192_v48 = vld [vmem:[#allocation10 + $0xd0] sm:$0xf0]  ;;  %v4744_v59 = vor.u32 %v6186_v56, %v4743_v55 }
 0x134   :  { %1698 = vmatpush.bf16.msra.mxu1 %v4944_v3  ;;  %v4768_v50 = vor.u32 %v6192_v48, %v4767_v45  ;;  %v6220_v60 = vld [vmem:[#allocation10 + $0x1b4] sm:$0xf]  ;;  %v6231_v48 = vld [vmem:[#allocation10 + $0x208] sm:$0xf0] }
 0x136   :  { %1676 = vmatpush.bf16.msrb.mxu3 %v4680_v4  ;;  %v4891_v4 = vld [vmem:[#allocation10 + $0x1c8] sm:$0xf] }
 0x137   :  { %1690 = vmatpush.bf16.msra.mxu0 %v4776_v61  ;;  %v4892_v7 = vor.u32 %v6224_v5, %v4891_v4  ;;  %v4881_v61 = vld [vmem:[#allocation10 + $0x1bc] sm:$0xf0]  ;;  %v6217_v5 = vld [vmem:[#allocation10 + $0x19c] sm:$0xf] }
 0x138   :  { %1699 = vmatpush.bf16.msra.mxu1 %v4932_v15  ;;  %v4872_v8 = vor.u32 %v6217_v5, %v4869_v6  ;;  %v6214_v15 = vld [vmem:[#allocation10 + $0x184] sm:$0xf]  ;;  %v6225_v5 = vld [vmem:[#allocation10 + $0x1d8] sm:$0xf0] }
 0x139   :  { %1660 = vmatpush.bf16.msrb.mxu2 %v4892_v7 }
 0x13a   :  { %1677 = vmatpush.bf16.msrb.mxu3 %v4668_v17  ;;  %v6221_v17 = vld [vmem:[#allocation10 + $0x1b8] sm:$0xf0] }
 0x13b   :  { %1691 = vmatpush.bf16.msra.mxu0 %v4764_v11  ;;  %v4880_v18 = vor.u32 %v6221_v17, %v4879_v16  ;;  %v4857_v16 = vld [vmem:[#allocation10 + $0x18c] sm:$0xf0] }
 0x13c   :  { %v4860_v20 = vor.u32 %v6214_v15, %v4857_v16 }
 0x13d   :  { %1661 = vmatpush.bf16.msrb.mxu2 %v4880_v18  ;;  %v4947_v18 = vld [vmem:[#allocation10 + $0x230] sm:$0xf] }
 0x13e   :  { %1726 = vmatpush.bf16.msra.mxu3 %v4852_v22  ;;  %v6229_v22 = vld [vmem:[#allocation10 + $0x1fc] sm:$0xf]  ;;  %v4948_v31 = vor.u32 %v6237_v19, %v4947_v18  ;;  %v4875_v18 = vld [vmem:[#allocation10 + $0x1a0] sm:$0xf]  ;;  %v6219_v19 = vld [vmem:[#allocation10 + $0x1a8] sm:$0xf0] }
 0x13f   :  { %v4920_v24 = vor.u32 %v6229_v22, %v4917_v23  ;;  %v6177_v22 = vld [vmem:[#allocation10 + $0x58] sm:$0xf0] }
 0x141   :  { %1700 = vmatpush.bf16.msra.mxu1 %v4920_v24  ;;  %1662 = vmatpush.bf16.msrb.mxu2 %v4868_v28  ;;  %v600_v24 = vperm.slane %v7145_v34, 1  ;;  %v6222_v34 = vld [vmem:[#allocation10 + $0x1c0] sm:$0xf0] }
 0x142   :  { %1727 = vmatpush.bf16.msra.mxu3 %v4840_v36  ;;  %v6226_v36 = vld [vmem:[#allocation10 + $0x1e4] sm:$0xf] }
 0x143   :  { %v4908_v38 = vor.u32 %v6226_v36, %v4905_v37  ;;  %v6234_v36 = vld [vmem:[#allocation10 + $0x220] sm:$0xf0] }
 0x145   :  { %1701 = vmatpush.bf16.msra.mxu1 %v4908_v38  ;;  %1663 = vmatpush.bf16.msrb.mxu2 %v4856_v42  ;;  %v4695_v38 = vld [vmem:[#allocation10 + $0x38] sm:$0xf] }
 0x146   :  { %1728 = vmatpush.bf16.msra.mxu3 %v4828_v49  ;;  %v4696_v42 = vor.u32 %v6174_v39, %v4695_v38  ;;  %v6257_v38 = vld [vmem:[#allocation13 + $0x98] sm:$0xf0] }
 0x149   :  { %1712 = vmatpush.bf16.msra.mxu2 %v4756_v47  ;;  %1702 = vmatpush.bf16.msra.mxu1 %v4896_v53  ;;  %v4923_v47 = vld [vmem:[#allocation10 + $0x200] sm:$0xf] }
 0x14a   :  { %1729 = vmatpush.bf16.msra.mxu3 %v4816_v62  ;;  %v4884_v62 = vor.u32 %v6220_v60, %v4881_v61  ;;  %v4924_v55 = vor.u32 %v6231_v48, %v4923_v47  ;;  %v6228_v60 = vld [vmem:[#allocation10 + $0x1f0] sm:$0xf0]  ;;  %v4672_v61 = vor.u32 %v6168_v52, %v4671_v51  ;;  %v6259_v47 = vld [vmem:[#allocation13 + $0xac] sm:$0xf]  ;;  %v5037_v48 = vld [vmem:[#allocation13 + $0xb4] sm:$0xf0] }
 0x14b   :  { %v6248_v51 = vld [vmem:[#allocation13 + $0x50] sm:$0xf0] }
 0x14d   :  { %1713 = vmatpush.bf16.msra.mxu2 %v4744_v59  ;;  %1703 = vmatpush.bf16.msra.mxu1 %v4884_v62  ;;  %v4911_v59 = vld [vmem:[#allocation10 + $0x1e8] sm:$0xf] }
 0x14e   :  { %1730 = vmatpush.bf16.msra.mxu3 %v4804_v12 }
 0x151   :  { %1714 = vmatpush.bf16.msra.mxu2 %v4732_v2  ;;  %1704 = vmatpush.bf16.msra.mxu1 %v4872_v8  ;;  %v6260_v8 = vld [vmem:[#allocation13 + $0xb0] sm:$0xf0] }
 0x152   :  { %1731 = vmatpush.bf16.msra.mxu3 %v4792_v21  ;;  %v4707_v21 = vld [vmem:[#allocation10 + $0x50] sm:$0xf] }
 0x153   :  { %v4708_v27 = vor.u32 %v6177_v22, %v4707_v21 }
 0x155   :  { %1715 = vmatpush.bf16.msra.mxu2 %v4720_v13  ;;  %1705 = vmatpush.bf16.msra.mxu1 %v4860_v20 }
 0x156   :  { %1732 = vmatpush.bf16.msra.mxu3 %v4780_v32 }
 0x159   :  { %1716 = vmatpush.bf16.msra.mxu2 %v4708_v27  ;;  %v4863_v27 = vld [vmem:[#allocation10 + $0x188] sm:$0xf] }
 0x15a   :  { %1733 = vmatpush.bf16.msra.mxu3 %v4768_v50 }
 0x15d   :  { %1717 = vmatpush.bf16.msra.mxu2 %v4696_v42  ;;  %v6254_v42 = vld [vmem:[#allocation13 + $0x80] sm:$0xf0] }
 0x17a   :  { %v1028_v33 = vpop.f32.mrf.mxu0 }
 0x180   :  { %v1014_v49 = vpop.f32.mrf.mxu3 }
 0x181   :  { %v1042_v54 = vpop.f32.mrf.mxu1  ;;  %v1015_v58 = vadd.f32 %v1014_v49, %v599_v41  ;;  %v1056_v3 = vpop.f32.mrf.mxu2  ;;  %v4684_v49 = vor.u32 %v6171_v44, %v4683_v43  ;;  %v4999_v44 = vld [vmem:[#allocation13 + $0x60] sm:$0xf] }
 0x182   :  { %v1030_v63 = vpop.f32.mrf.mxu0  ;;  %v1057_v40 = vadd.f32 %v1056_v3, %v600_v24 }
 0x183   :  { %v1029_v1 = vadd.f32 %v1028_v33, %v1015_v58  ;;  %v4935_v33 = vld [vmem:[#allocation10 + $0x218] sm:$0xf]  ;;  %1718 = vmatpush.bf16.msra.mxu2 %v4684_v49  ;;  %v5040_v49 = vor.u32 %v6259_v47, %v5037_v48  ;;  %v4965_v47 = vld [vmem:[#allocation13 + $0x24] sm:$0xf0] }
 0x184   :  { %v4936_v45 = vor.u32 %v6234_v36, %v4935_v33 }
 0x185   :  { %v1043_v11 = vadd.f32 %v1042_v54, %v1029_v1  ;;  %v4912_v1 = vor.u32 %v6228_v60, %v4911_v59  ;;  %v4975_v59 = vld [vmem:[#allocation13 + $0x30] sm:$0xf]  ;;  %v6245_v60 = vld [vmem:[#allocation13 + $0x38] sm:$0xf0] }
 0x187   :  { %v1131_v23 = vmax.f32 %v1043_v11, 0.0  ;;  %1719 = vmatpush.bf16.msra.mxu2 %v4672_v61  ;;  %v4976_v61 = vor.u32 %v6245_v60, %v4975_v59  ;;  %v6238_v59 = vld [vmem:[#allocation13 + $0x4] sm:$0xf]  ;;  %v4953_v60 = vld [vmem:[#allocation13 + $0xc] sm:$0xf0] }
 0x188   :  { %v1016_v4 = vpop.f32.mrf.mxu3 }
 0x189   :  { %v1017_v7 = vadd.f32 %v1016_v4, %v599_v41  ;;  %v1044_v14 = vpop.f32.mrf.mxu1  ;;  %v1058_v37 = vpop.f32.mrf.mxu2  ;;  %v4899_v4 = vld [vmem:[#allocation10 + $0x1d0] sm:$0xf] }
 0x18a   :  { %v1084_v28 = vpop.f32.mrf.mxu0  ;;  %v1059_v53 = vadd.f32 %v1058_v37, %v600_v24  ;;  %v4900_v11 = vor.u32 %v6225_v5, %v4899_v4  ;;  %v4876_v24 = vor.u32 %v6219_v19, %v4875_v18  ;;  %v5023_v37 = vld [vmem:[#allocation13 + $0x90] sm:$0xf]  ;;  %v6242_v4 = vld [vmem:[#allocation13 + $0x20] sm:$0xf0]  ;;  %v4989_v18 = vld [vmem:[#allocation13 + $0x54] sm:$0xf0] }
 0x18b   :  { %v1031_v12 = vadd.f32 %v1030_v63, %v1017_v7  ;;  %v5035_v7 = vld [vmem:[#allocation13 + $0xa8] sm:$0xf]  ;;  %v5024_v39 = vor.u32 %v6257_v38, %v5023_v37  ;;  %v6283_v19 = vld [vmem:[#allocation13 + $0x16c] sm:$0xf]  ;;  %v6280_v37 = vld [vmem:[#allocation13 + $0x154] sm:$0xf] }
 0x18c   :  { %v5121_v38 = vld [vmem:[#allocation13 + $0x15c] sm:$0xf0] }
 0x18d   :  { %v1045_v17 = vadd.f32 %v1044_v14, %v1031_v12  ;;  %v5036_v12 = vor.u32 %v6260_v8, %v5035_v7  ;;  %v4887_v14 = vld [vmem:[#allocation10 + $0x1b8] sm:$0xf]  ;;  %v6278_v7 = vld [vmem:[#allocation13 + $0x140] sm:$0xf0] }
 0x18e   :  { %v4888_v16 = vor.u32 %v6222_v34, %v4887_v14  ;;  %v6250_v8 = vld [vmem:[#allocation13 + $0x64] sm:$0xf]  ;;  %v5095_v34 = vld [vmem:[#allocation13 + $0x120] sm:$0xf] }
 0x18f   :  { %v1134_v26 = vmax.f32 %v1045_v17, 0.0 }
 0x190   :  { %v1070_v30 = vpop.f32.mrf.mxu3 }
 0x191   :  { %v7149_v32 = vpack.c.bf16 %v1134_v26, %v1131_v23  ;;  %v1071_v41 = vadd.f32 %v1070_v30, %v1057_v40  ;;  %v1098_v50 = vpop.f32.mrf.mxu1  ;;  %v1112_v0 = vpop.f32.mrf.mxu2  ;;  %v5011_v40 = vld [vmem:[#allocation13 + $0x78] sm:$0xf] }
 0x192   :  { %v1086_v62 = vpop.f32.mrf.mxu0  ;;  %v1099_v13 = vadd.f32 %v1098_v50, %v601_v57  ;;  %v5012_v43 = vor.u32 %v6254_v42, %v5011_v40  ;;  %v4987_v50 = vld [vmem:[#allocation13 + $0x48] sm:$0xf]  ;;  %v5071_v40 = vld [vmem:[#allocation13 + $0xf0] sm:$0xf]  ;;  %v6269_v42 = vld [vmem:[#allocation13 + $0xf8] sm:$0xf0] }
 0x193   :  { %1636 = vmatmul.bf16.vlgmr.msrb.gmra.mxu0 %v7149_v32  ;;  %1678 = vmatmul.bf16.vlgmr.msrb.gmra.mxu3 %v7149_v32  ;;  %v1085_v56 = vadd.f32 %v1084_v28, %v1071_v41  ;;  %v6216_v28 = vld [vmem:[#allocation10 + $0x190] sm:$0xf0]  ;;  %v4988_v52 = vor.u32 %v6248_v51, %v4987_v50  ;;  %v6277_v50 = vld [vmem:[#allocation13 + $0x13c] sm:$0xf]  ;;  %v5109_v51 = vld [vmem:[#allocation13 + $0x144] sm:$0xf0] }
 0x194   :  { %1740 = vmatpush.bf16.msrb.mxu0 %v4948_v31  ;;  %v1113_v17 = vadd.f32 %v1112_v0, %v1099_v13  ;;  %v4864_v33 = vor.u32 %v6216_v28, %v4863_v27  ;;  %v6239_v13 = vld [vmem:[#allocation13 + $0x8] sm:$0xf0]  ;;  %v6308_v28 = vld [vmem:[#allocation13 + $0x230] sm:$0xf0] }
 0x195   :  { %v1132_v2 = vmax.f32 %v1085_v56, 0.0  ;;  %v5025_v56 = vld [vmem:[#allocation13 + $0x9c] sm:$0xf0] }
 0x198   :  { %v1072_v54 = vpop.f32.mrf.mxu3  ;;  %1741 = vmatpush.bf16.msrb.mxu0 %v4936_v45  ;;  %v6251_v45 = vld [vmem:[#allocation13 + $0x68] sm:$0xf0] }
 0x199   :  { %v1073_v58 = vadd.f32 %v1072_v54, %v1059_v53  ;;  %v1100_v9 = vpop.f32.mrf.mxu1  ;;  %v1114_v20 = vpop.f32.mrf.mxu2  ;;  %v5000_v41 = vor.u32 %v6251_v45, %v4999_v44  ;;  %v6284_v53 = vld [vmem:[#allocation13 + $0x170] sm:$0xf0]  ;;  %v5072_v44 = vor.u32 %v6269_v42, %v5071_v40  ;;  %v6305_v45 = vld [vmem:[#allocation13 + $0x218] sm:$0xf0]  ;;  %v5061_v42 = vld [vmem:[#allocation13 + $0xe4] sm:$0xf0] }
 0x19a   :  { %v1101_v15 = vadd.f32 %v1100_v9, %v601_v57  ;;  %v6256_v54 = vld [vmem:[#allocation13 + $0x94] sm:$0xf]  ;;  %v6253_v57 = vld [vmem:[#allocation13 + $0x7c] sm:$0xf] }
 0x19b   :  { %v1087_v63 = vadd.f32 %v1086_v62, %v1073_v58  ;;  %v5028_v58 = vor.u32 %v6256_v54, %v5025_v56  ;;  %v5119_v62 = vld [vmem:[#allocation13 + $0x150] sm:$0xf]  ;;  %v6266_v54 = vld [vmem:[#allocation13 + $0xe0] sm:$0xf0]  ;;  %v6265_v40 = vld [vmem:[#allocation13 + $0xdc] sm:$0xf] }
 0x19c   :  { %1742 = vmatpush.bf16.msrb.mxu0 %v4924_v55  ;;  %v1115_v21 = vadd.f32 %v1114_v20, %v1101_v15  ;;  %v6275_v15 = vld [vmem:[#allocation13 + $0x128] sm:$0xf0]  ;;  %v5133_v20 = vld [vmem:[#allocation13 + $0x174] sm:$0xf0] }
 0x19d   :  { %v1135_v3 = vmax.f32 %v1087_v63, 0.0  ;;  %v6281_v63 = vld [vmem:[#allocation13 + $0x158] sm:$0xf0] }
 0x19e   :  { %v5120_v0 = vor.u32 %v6281_v63, %v5119_v62  ;;  %v4956_v62 = vor.u32 %v6238_v59, %v4953_v60  ;;  %v6274_v63 = vld [vmem:[#allocation13 + $0x124] sm:$0xf]  ;;  %v5193_v60 = vld [vmem:[#allocation13 + $0x1ec] sm:$0xf0] }
 0x19f   :  { %v1138_v6 = vpack.c.bf16 %v1135_v3, %v1132_v2  ;;  %v4963_v3 = vld [vmem:[#allocation13 + $0x18] sm:$0xf]  ;;  %v6298_v59 = vld [vmem:[#allocation13 + $0x1e4] sm:$0xf] }
 0x1a0   :  { %v1126_v10 = vpop.f32.mrf.mxu3  ;;  %1743 = vmatpush.bf16.msrb.mxu0 %v4912_v1  ;;  %v5013_v1 = vld [vmem:[#allocation13 + $0x84] sm:$0xf0]  ;;  %v4964_v5 = vor.u32 %v6242_v4, %v4963_v3  ;;  %v5047_v4 = vld [vmem:[#allocation13 + $0xc0] sm:$0xf] }
 0x1a1   :  { %1650 = vmatmul.bf16.vlgmr.msrb.gmra.mxu1 %v1138_v6  ;;  %v1127_v22 = vadd.f32 %v1126_v10, %v1113_v17  ;;  %v5016_v2 = vor.u32 %v6253_v57, %v5013_v1  ;;  %v5001_v10 = vld [vmem:[#allocation13 + $0x6c] sm:$0xf0]  ;;  %v5096_v17 = vor.u32 %v6275_v15, %v5095_v34  ;;  %v5127_v34 = vld [vmem:[#allocation13 + $0x158] sm:$0xf] }
 0x1a2   :  { %2280 = vmatpush.bf16.msrb.mxu1 %v5036_v12  ;;  %v4951_v12 = vld [vmem:[#allocation13] sm:$0xf]  ;;  %v5097_v57 = vld [vmem:[#allocation13 + $0x12c] sm:$0xf0] }
 0x1a3   :  { %1692 = vmatmul.bf16.vlgmr.msra.gmra.mxu0 %v1138_v6  ;;  %1734 = vmatmul.bf16.vlgmr.msra.gmra.mxu3 %v1138_v6  ;;  %v1133_v30 = vmax.f32 %v1127_v22, 0.0  ;;  %v5107_v6 = vld [vmem:[#allocation13 + $0x138] sm:$0xf]  ;;  %v4952_v14 = vor.u32 %v6239_v13, %v4951_v12  ;;  %v5136_v22 = vor.u32 %v6283_v19, %v5133_v20  ;;  %v5100_v1 = vor.u32 %v6274_v63, %v5097_v57  ;;  %v6307_v13 = vld [vmem:[#allocation13 + $0x22c] sm:$0xf] }
 0x1a4   :  { %1744 = vmatpush.bf16.msrb.mxu0 %v4900_v11  ;;  %v5108_v9 = vor.u32 %v6278_v7, %v5107_v6  ;;  %v5004_v11 = vor.u32 %v6250_v8, %v5001_v10  ;;  %v5191_v6 = vld [vmem:[#allocation13 + $0x1e0] sm:$0xf]  ;;  %v6299_v8 = vld [vmem:[#allocation13 + $0x1e8] sm:$0xf0]  ;;  %v5085_v10 = vld [vmem:[#allocation13 + $0x114] sm:$0xf0] }
 0x1a5   :  { %v6296_v19 = vld [vmem:[#allocation13 + $0x1d0] sm:$0xf0]  ;;  %v5091_v63 = vld [vmem:[#allocation13 + $0x110] sm:$0xf]  ;;  %v6273_v57 = vld [vmem:[#allocation13 + $0x118] sm:$0xf0] }
 0x1a6   :  { %2281 = vmatpush.bf16.msrb.mxu1 %v5024_v39  ;;  %v5124_v39 = vor.u32 %v6280_v37, %v5121_v38  ;;  %v6268_v20 = vld [vmem:[#allocation13 + $0xf4] sm:$0xf]  ;;  %v5167_v37 = vld [vmem:[#allocation13 + $0x1b0] sm:$0xf]  ;;  %v6293_v38 = vld [vmem:[#allocation13 + $0x1b8] sm:$0xf0] }
 0x1a8   :  { %v1128_v23 = vpop.f32.mrf.mxu3  ;;  %1745 = vmatpush.bf16.msrb.mxu0 %v4888_v16  ;;  %v6247_v16 = vld [vmem:[#allocation13 + $0x4c] sm:$0xf] }
 0x1a9   :  { %v1129_v26 = vadd.f32 %v1128_v23, %v1115_v21  ;;  %v4992_v21 = vor.u32 %v6247_v16, %v4989_v18  ;;  %v5083_v23 = vld [vmem:[#allocation13 + $0x108] sm:$0xf]  ;;  %v6282_v16 = vld [vmem:[#allocation13 + $0x160] sm:$0xf0] }
 0x1aa   :  { %2282 = vmatpush.bf16.msrb.mxu1 %v5012_v43  ;;  %v5215_v43 = vld [vmem:[#allocation13 + $0x210] sm:$0xf]  ;;  %v5179_v18 = vld [vmem:[#allocation13 + $0x1c8] sm:$0xf] }
 0x1ab   :  { %v1136_v31 = vmax.f32 %v1129_v26, 0.0  ;;  %v5227_v26 = vld [vmem:[#allocation13 + $0x228] sm:$0xf]  ;;  %v5216_v48 = vor.u32 %v6305_v45, %v5215_v43  ;;  %v6301_v43 = vld [vmem:[#allocation13 + $0x1fc] sm:$0xf] }
 0x1ac   :  { %1746 = vmatpush.bf16.msrb.mxu0 %v4876_v24  ;;  %v6272_v24 = vld [vmem:[#allocation13 + $0x110] sm:$0xf0]  ;;  %v5205_v45 = vld [vmem:[#allocation13 + $0x204] sm:$0xf0] }
 0x1ad   :  { %v1139_v36 = vpack.c.bf16 %v1136_v31, %v1133_v30  ;;  %v5084_v27 = vor.u32 %v6272_v24, %v5083_v23  ;;  %v6244_v30 = vld [vmem:[#allocation13 + $0x34] sm:$0xf]  ;;  %v4977_v31 = vld [vmem:[#allocation13 + $0x3c] sm:$0xf0]  ;;  %v5180_v23 = vor.u32 %v6296_v19, %v5179_v18  ;;  %v5031_v18 = vld [vmem:[#allocation13 + $0x98] sm:$0xf] }
 0x1ae   :  { %2283 = vmatpush.bf16.msrb.mxu1 %v5000_v41  ;;  %v6241_v41 = vld [vmem:[#allocation13 + $0x1c] sm:$0xf]  ;;  %v5073_v24 = vld [vmem:[#allocation13 + $0xfc] sm:$0xf0] }
 0x1af   :  { %1664 = vmatmul.bf16.vlgmr.msrb.gmra.mxu2 %v1139_v36 }
 0x1b0   :  { %1747 = vmatpush.bf16.msrb.mxu0 %v4864_v33  ;;  %v5228_v33 = vor.u32 %v6308_v28, %v5227_v26  ;;  %v6304_v26 = vld [vmem:[#allocation13 + $0x214] sm:$0xf]  ;;  %v5076_v28 = vor.u32 %v6268_v20, %v5073_v24  ;;  %v5067_v24 = vld [vmem:[#allocation13 + $0xe0] sm:$0xf] }
 0x1b1   :  { %1706 = vmatmul.bf16.vlgmr.msra.gmra.mxu1 %v1139_v36 }
 0x1b2   :  { %2284 = vmatpush.bf16.msrb.mxu1 %v4988_v52  ;;  %2308 = vmatpush.bf16.msrb.mxu3 %v5228_v33  ;;  %v6279_v33 = vld [vmem:[#allocation13 + $0x148] sm:$0xf0] }
 0x1b3   :  { %1748 = vmatmul.bf16.vlgmr.msrb.gmra.mxu0 %v1139_v36  ;;  %v4980_v36 = vor.u32 %v6244_v30, %v4977_v31  ;;  %v5115_v31 = vld [vmem:[#allocation13 + $0x140] sm:$0xf] }
 0x1b4   :  { %2322 = vmatpush.bf16.msra.mxu0 %v5040_v49  ;;  %v4968_v49 = vor.u32 %v6241_v41, %v4965_v47  ;;  %v5103_v41 = vld [vmem:[#allocation13 + $0x128] sm:$0xf]  ;;  %v6276_v47 = vld [vmem:[#allocation13 + $0x130] sm:$0xf0] }
 0x1b6   :  { %2285 = vmatpush.bf16.msrb.mxu1 %v4976_v61  ;;  %2309 = vmatpush.bf16.msrb.mxu3 %v5216_v48  ;;  %v7161_v48 = vld [vmem:[#allocation11] sm:$0x7] }
 0x1b8   :  { %2323 = vmatpush.bf16.msra.mxu0 %v5028_v58  ;;  %v6302_v58 = vld [vmem:[#allocation13 + $0x200] sm:$0xf0] }
 0x1ba   :  { %2286 = vmatpush.bf16.msrb.mxu1 %v4964_v5  ;;  %v6263_v5 = vld [vmem:[#allocation13 + $0xc8] sm:$0xf0] }
 0x1bb   :  { %v5048_v7 = vor.u32 %v6263_v5, %v5047_v4  ;;  %v6287_v4 = vld [vmem:[#allocation13 + $0x188] sm:$0xf0] }
 0x1bc   :  { %2324 = vmatpush.bf16.msra.mxu0 %v5016_v2  ;;  %v6285_v2 = vld [vmem:[#allocation13 + $0x178] sm:$0xf0] }
 0x1be   :  { %2287 = vmatpush.bf16.msrb.mxu1 %v4952_v14  ;;  %v5229_v14 = vld [vmem:[#allocation13 + $0x234] sm:$0xf0] }
 0x1bf   :  { %1720 = vmatmul.bf16.vlgmr.msra.gmra.mxu2 %v7149_v32  ;;  %v5131_v32 = vld [vmem:[#allocation13 + $0x168] sm:$0xf]  ;;  %v5232_v15 = vor.u32 %v6307_v13, %v5229_v14  ;;  %v1239_v13 = vperm.slane %v7161_v48, 1 }
 0x1c0   :  { %v5132_v55 = vor.u32 %v6284_v53, %v5131_v32  ;;  %2325 = vmatpush.bf16.msra.mxu0 %v5004_v11  ;;  %v5112_v32 = vor.u32 %v6277_v50, %v5109_v51  ;;  %v5059_v53 = vld [vmem:[#allocation13 + $0xd8] sm:$0xf]  ;;  %v5192_v11 = vor.u32 %v6299_v8, %v5191_v6  ;;  %v5104_v50 = vor.u32 %v6276_v47, %v5103_v41  ;;  %v6295_v6 = vld [vmem:[#allocation13 + $0x1cc] sm:$0xf]  ;;  %v5043_v8 = vld [vmem:[#allocation13 + $0xb0] sm:$0xf] }
 0x1c1   :  { %v5060_v56 = vor.u32 %v6266_v54, %v5059_v53  ;;  %v5155_v51 = vld [vmem:[#allocation13 + $0x198] sm:$0xf]  ;;  %v6262_v53 = vld [vmem:[#allocation13 + $0xc4] sm:$0xf]  ;;  %v5055_v41 = vld [vmem:[#allocation13 + $0xc8] sm:$0xf] }
 0x1c2   :  { %2294 = vmatpush.bf16.msrb.mxu2 %v5132_v55  ;;  %2336 = vmatpush.bf16.msra.mxu1 %v5136_v22  ;;  %v5203_v55 = vld [vmem:[#allocation13 + $0x1f8] sm:$0xf] }
 0x1c3   :  { %v5204_v61 = vor.u32 %v6302_v58, %v5203_v55  ;;  %v5049_v58 = vld [vmem:[#allocation13 + $0xcc] sm:$0xf0] }
 0x1c4   :  { %2326 = vmatpush.bf16.msra.mxu0 %v4992_v21 }
 0x1c5   :  { %2310 = vmatpush.bf16.msrb.mxu3 %v5204_v61  ;;  %v5052_v61 = vor.u32 %v6262_v53, %v5049_v58  ;;  %v1755_v53 = vunpack.c.h.bf16 %v7118_v25  ;;  %v6286_v58 = vld [vmem:[#allocation13 + $0x184] sm:$0xf] }
 0x1c6   :  { %2295 = vmatpush.bf16.msrb.mxu2 %v5120_v0  ;;  %2337 = vmatpush.bf16.msra.mxu1 %v5124_v39  ;;  %v5139_v0 = vld [vmem:[#allocation13 + $0x170] sm:$0xf]  ;;  %v5168_v39 = vor.u32 %v6293_v38, %v5167_v37 }
 0x1c7   :  { %v5140_v3 = vor.u32 %v6285_v2, %v5139_v0  ;;  %v1238_v2 = vperm.slane %v7161_v48, 0 }
 0x1c8   :  { %2327 = vmatpush.bf16.msra.mxu0 %v4980_v36  ;;  %v5116_v36 = vor.u32 %v6279_v33, %v5115_v31 }
 0x1c9   :  { %2311 = vmatpush.bf16.msrb.mxu3 %v5192_v11  ;;  %v5079_v11 = vld [vmem:[#allocation13 + $0xf8] sm:$0xf] }
 0x1ca   :  { %2296 = vmatpush.bf16.msrb.mxu2 %v5108_v9  ;;  %2338 = vmatpush.bf16.msra.mxu1 %v5112_v32  ;;  %v6271_v9 = vld [vmem:[#allocation13 + $0x10c] sm:$0xf]  ;;  %v6290_v32 = vld [vmem:[#allocation13 + $0x1a0] sm:$0xf0] }
 0x1cb   :  { %v5088_v12 = vor.u32 %v6271_v9, %v5085_v10  ;;  %v6261_v10 = vld [vmem:[#allocation13 + $0xb8] sm:$0xf0] }
 0x1cc   :  { %2328 = vmatpush.bf16.msra.mxu0 %v4968_v49  ;;  %v5208_v49 = vor.u32 %v6301_v43, %v5205_v45  ;;  %v5044_v14 = vor.u32 %v6261_v10, %v5043_v8  ;;  %v6255_v45 = vld [vmem:[#allocation13 + $0x88] sm:$0xf0] }
 0x1cd   :  { %2312 = vmatpush.bf16.msrb.mxu3 %v5180_v23  ;;  %v6258_v23 = vld [vmem:[#allocation13 + $0xa0] sm:$0xf0] }
 0x1ce   :  { %2297 = vmatpush.bf16.msrb.mxu2 %v5096_v17  ;;  %2339 = vmatpush.bf16.msra.mxu1 %v5100_v1  ;;  %v5128_v17 = vor.u32 %v6282_v16, %v5127_v34  ;;  %v5092_v1 = vor.u32 %v6273_v57, %v5091_v63  ;;  %v6292_v16 = vld [vmem:[#allocation13 + $0x1b4] sm:$0xf] }
 0x1cf   :  { %v6252_v57 = vld [vmem:[#allocation13 + $0x70] sm:$0xf0] }
 0x1d0   :  { %2329 = vmatpush.bf16.msra.mxu0 %v4956_v62  ;;  %v5196_v62 = vor.u32 %v6298_v59, %v5193_v60  ;;  %v5145_v59 = vld [vmem:[#allocation13 + $0x18c] sm:$0xf0]  ;;  %v5007_v60 = vld [vmem:[#allocation13 + $0x68] sm:$0xf] }
 0x1d1   :  { %2313 = vmatpush.bf16.msrb.mxu3 %v5168_v39  ;;  %v6289_v39 = vld [vmem:[#allocation13 + $0x19c] sm:$0xf]  ;;  %v5148_v63 = vor.u32 %v6286_v58, %v5145_v59 }
 0x1d2   :  { %2298 = vmatpush.bf16.msrb.mxu2 %v5084_v27  ;;  %2340 = vmatpush.bf16.msra.mxu1 %v5088_v12  ;;  %v5217_v27 = vld [vmem:[#allocation13 + $0x21c] sm:$0xf0]  ;;  %v6270_v12 = vld [vmem:[#allocation13 + $0x100] sm:$0xf0] }
 0x1d3   :  { %v5220_v30 = vor.u32 %v6304_v26, %v5217_v27  ;;  %v5080_v34 = vor.u32 %v6270_v12, %v5079_v11  ;;  %v6267_v26 = vld [vmem:[#allocation13 + $0xe8] sm:$0xf0]  ;;  %v4983_v11 = vld [vmem:[#allocation13 + $0x38] sm:$0xf]  ;;  %v6246_v12 = vld [vmem:[#allocation13 + $0x40] sm:$0xf0] }
 0x1d4   :  { %2378 = vmatpush.bf16.msrb.mxu0 %v5140_v3  ;;  %v5143_v3 = vld [vmem:[#allocation13 + $0x180] sm:$0xf]  ;;  %v5068_v31 = vor.u32 %v6267_v26, %v5067_v24 }
 0x1d5   :  { %v5144_v5 = vor.u32 %v6287_v4, %v5143_v3 }
 0x1d6   :  { %2299 = vmatpush.bf16.msrb.mxu2 %v5072_v44  ;;  %2341 = vmatpush.bf16.msra.mxu1 %v5076_v28  ;;  %v5064_v44 = vor.u32 %v6265_v40, %v5061_v42  ;;  %v5157_v40 = vld [vmem:[#allocation13 + $0x1a4] sm:$0xf0]  ;;  %v5019_v42 = vld [vmem:[#allocation13 + $0x80] sm:$0xf] }
 0x1d8   :  { %2379 = vmatpush.bf16.msrb.mxu0 %v5128_v17  ;;  %v5169_v17 = vld [vmem:[#allocation13 + $0x1bc] sm:$0xf0] }
 0x1d9   :  { %v5172_v20 = vor.u32 %v6292_v16, %v5169_v17  ;;  %v1240_v16 = vperm.slane %v7161_v48, 2  ;;  %v4971_v17 = vld [vmem:[#allocation13 + $0x20] sm:$0xf] }
 0x1da   :  { %2300 = vmatpush.bf16.msrb.mxu2 %v5060_v56  ;;  %2342 = vmatpush.bf16.msra.mxu1 %v5064_v44  ;;  %v5156_v56 = vor.u32 %v6290_v32, %v5155_v51  ;;  %v5160_v44 = vor.u32 %v6289_v39, %v5157_v40  ;;  %v6264_v51 = vld [vmem:[#allocation13 + $0xd0] sm:$0xf0]  ;;  %v5223_v40 = vld [vmem:[#allocation13 + $0x218] sm:$0xf] }
 0x1db   :  { %v5056_v32 = vor.u32 %v6264_v51, %v5055_v41 }
 0x1dc   :  { %2380 = vmatpush.bf16.msrb.mxu0 %v5116_v36  ;;  %2314 = vmatpush.bf16.msrb.mxu3 %v5156_v56 }
 0x1de   :  { %2301 = vmatpush.bf16.msrb.mxu2 %v5048_v7  ;;  %2343 = vmatpush.bf16.msra.mxu1 %v5052_v61  ;;  %v5181_v7 = vld [vmem:[#allocation13 + $0x1d4] sm:$0xf0] }
 0x1df   :  { %v5184_v9 = vor.u32 %v6295_v6, %v5181_v7  ;;  %v4995_v6 = vld [vmem:[#allocation13 + $0x50] sm:$0xf]  ;;  %v6249_v7 = vld [vmem:[#allocation13 + $0x58] sm:$0xf0] }
 0x1e0   :  { %2381 = vmatpush.bf16.msrb.mxu0 %v5104_v50  ;;  %2315 = vmatpush.bf16.msrb.mxu3 %v5144_v5  ;;  %v5020_v50 = vor.u32 %v6255_v45, %v5019_v42  ;;  %v4996_v10 = vor.u32 %v6249_v7, %v4995_v6  ;;  %v6306_v42 = vld [vmem:[#allocation13 + $0x220] sm:$0xf0] }
 0x1e1   :  { %v5224_v41 = vor.u32 %v6306_v42, %v5223_v40  ;;  %v6356_v40 = vld [vmem:[#allocation16 + $0x170] sm:$0xf0] }
 0x1e2   :  { %2350 = vmatpush.bf16.msra.mxu2 %v5232_v15  ;;  %v6328_v42 = vld [vmem:[#allocation16 + $0x94] sm:$0xf] }
 0x1e4   :  { %2382 = vmatpush.bf16.msrb.mxu0 %v5092_v1  ;;  %2364 = vmatpush.bf16.msra.mxu3 %v5044_v14  ;;  %v5008_v1 = vor.u32 %v6252_v57, %v5007_v60  ;;  %v5311_v60 = vld [vmem:[#allocation16 + $0x90] sm:$0xf] }
 0x1e5   :  { %v6300_v57 = vld [vmem:[#allocation13 + $0x1f0] sm:$0xf0] }
 0x1e6   :  { %2351 = vmatpush.bf16.msra.mxu2 %v5220_v30  ;;  %v5032_v30 = vor.u32 %v6258_v23, %v5031_v18  ;;  %v6243_v18 = vld [vmem:[#allocation13 + $0x28] sm:$0xf0]  ;;  %v6309_v23 = vld [vmem:[#allocation13 + $0x238] sm:$0xf0] }
 0x1e8   :  { %2383 = vmatpush.bf16.msrb.mxu0 %v5080_v34  ;;  %2365 = vmatpush.bf16.msra.mxu3 %v5032_v30 }
 0x1ea   :  { %2352 = vmatpush.bf16.msra.mxu2 %v5208_v49  ;;  %v1754_v49 = vunpack.c.l.bf16 %v7118_v25  ;;  %v1758_v25 = vunpack.c.h.bf16 %v7120_v29 }
 0x1ec   :  { %2384 = vmatpush.bf16.msrb.mxu0 %v5068_v31  ;;  %2366 = vmatpush.bf16.msra.mxu3 %v5020_v50  ;;  %v6303_v50 = vld [vmem:[#allocation13 + $0x208] sm:$0xf0] }
 0x1ee   :  { %2353 = vmatpush.bf16.msra.mxu2 %v5196_v62 }
 0x1f0   :  { %2385 = vmatpush.bf16.msrb.mxu0 %v5056_v32  ;;  %2367 = vmatpush.bf16.msra.mxu3 %v5008_v1  ;;  %v1759_v1 = vunpack.c.l.bf16 %v7131_v46  ;;  %v5175_v46 = vld [vmem:[#allocation13 + $0x1b8] sm:$0xf] }
 0x1f2   :  { %2354 = vmatpush.bf16.msra.mxu2 %v5184_v9 }
 0x1f4   :  { %2368 = vmatpush.bf16.msra.mxu3 %v4996_v10 }
 0x1f6   :  { %2355 = vmatpush.bf16.msra.mxu2 %v5172_v20  ;;  %v5235_v20 = vld [vmem:[#allocation13 + $0x230] sm:$0xf] }
 0x1fa   :  { %2356 = vmatpush.bf16.msra.mxu2 %v5160_v44 }
 0x1fe   :  { %2357 = vmatpush.bf16.msra.mxu2 %v5148_v63  ;;  %v5199_v63 = vld [vmem:[#allocation13 + $0x1e8] sm:$0xf] }
 0x1ff   :  { %v5200_v6 = vor.u32 %v6300_v57, %v5199_v63  ;;  %v5239_v57 = vld [vmem:[#allocation16] sm:$0xf] }
 0x210   :  { %v7155_v52 = vpop.f32.mrf.mxu0 }
 0x211   :  { %v1638_v19 = vadd.f32 %v7155_v52, %v1238_v2 }
 0x216   :  { %v1679_v54 = vpop.f32.mrf.mxu3 }
 0x217   :  { %v1680_v27 = vadd.f32 %v1679_v54, %v1239_v13 }
 0x218   :  { %v7157_v21 = vpop.f32.mrf.mxu0 }
 0x219   :  { %v1640_v61 = vadd.f32 %v7157_v21, %v1238_v2  ;;  %v1757_v21 = vunpack.c.l.bf16 %v7120_v29 }
 0x21e   :  { %v7159_v22 = vpop.f32.mrf.mxu1  ;;  %v1681_v28 = vpop.f32.mrf.mxu3 }
 0x21f   :  { %v1652_v33 = vadd.f32 %v7159_v22, %v1638_v19  ;;  %v1682_v52 = vadd.f32 %v1681_v28, %v1239_v13 }
 0x220   :  { %v1693_v0 = vpop.f32.mrf.mxu0 }
 0x221   :  { %v1694_v36 = vadd.f32 %v1693_v0, %v1680_v27  ;;  %v4972_v27 = vor.u32 %v6243_v18, %v4971_v17 }
 0x226   :  { %v7163_v55 = vpop.f32.mrf.mxu1  ;;  %v1735_v29 = vpop.f32.mrf.mxu3 }
 0x227   :  { %v1654_v3 = vadd.f32 %v7163_v55, %v1640_v61  ;;  %v4984_v55 = vor.u32 %v6246_v12, %v4983_v11  ;;  %v6329_v61 = vld [vmem:[#allocation16 + $0x98] sm:$0xf0]  ;;  %v5287_v11 = vld [vmem:[#allocation16 + $0x60] sm:$0xf]  ;;  %v6323_v12 = vld [vmem:[#allocation16 + $0x68] sm:$0xf0] }
 0x228   :  { %v1695_v37 = vpop.f32.mrf.mxu0 }
 0x229   :  { %v1696_v22 = vadd.f32 %v1695_v37, %v1682_v52  ;;  %2369 = vmatpush.bf16.msra.mxu3 %v4984_v55  ;;  %v4959_v52 = vld [vmem:[#allocation13 + $0x8] sm:$0xf] }
 0x22d   :  { %2370 = vmatpush.bf16.msra.mxu3 %v4972_v27  ;;  %v6288_v27 = vld [vmem:[#allocation13 + $0x190] sm:$0xf0] }
 0x22e   :  { %v1707_v15 = vpop.f32.mrf.mxu1 }
 0x22f   :  { %v1708_v47 = vadd.f32 %v1707_v15, %v1694_v36  ;;  %v5236_v36 = vor.u32 %v6309_v23, %v5235_v20  ;;  %v5163_v23 = vld [vmem:[#allocation13 + $0x1a0] sm:$0xf] }
 0x230   :  { %v1749_v48 = vpop.f32.mrf.mxu0 }
 0x231   :  { %v1761_v0 = vadd.f32 %v1755_v53, %v1708_v47  ;;  %v1756_v47 = vunpack.c.l.bf16 %v7124_v35  ;;  %v5323_v53 = vld [vmem:[#allocation16 + $0xa8] sm:$0xf]  ;;  %v5312_v35 = vor.u32 %v6329_v61, %v5311_v60  ;;  %v6322_v60 = vld [vmem:[#allocation16 + $0x64] sm:$0xf] }
 0x232   :  { %v1665_v38 = vpop.f32.mrf.mxu2 }
 0x233   :  { %v1666_v43 = vadd.f32 %v1665_v38, %v1652_v33  ;;  %v1767_v2 = vmax.f32 %v1761_v0, 0.0 }
 0x235   :  { %v1760_v54 = vadd.f32 %v1754_v49, %v1666_v43  ;;  %v6240_v43 = vld [vmem:[#allocation13 + $0x10] sm:$0xf0]  ;;  %v5211_v49 = vld [vmem:[#allocation13 + $0x200] sm:$0xf] }
 0x236   :  { %v1709_v56 = vpop.f32.mrf.mxu1  ;;  %v4960_v45 = vor.u32 %v6240_v43, %v4959_v52  ;;  %v5212_v58 = vor.u32 %v6303_v50, %v5211_v49  ;;  %v5313_v43 = vld [vmem:[#allocation16 + $0x9c] sm:$0xf0]  ;;  %v6353_v50 = vld [vmem:[#allocation16 + $0x158] sm:$0xf0] }
 0x237   :  { %v1710_v62 = vadd.f32 %v1709_v56, %v1696_v22  ;;  %v1766_v4 = vmax.f32 %v1760_v54, 0.0  ;;  %v6332_v54 = vld [vmem:[#allocation16 + $0xb0] sm:$0xf0]  ;;  %v1737_v56 = vpop.f32.mrf.mxu3 }
 0x238   :  { %2371 = vmatpush.bf16.msra.mxu3 %v4960_v45  ;;  %v5324_v59 = vor.u32 %v6332_v54, %v5323_v53  ;;  %v1751_v0 = vpop.f32.mrf.mxu0  ;;  %v5263_v45 = vld [vmem:[#allocation16 + $0x30] sm:$0xf]  ;;  %v5251_v53 = vld [vmem:[#allocation16 + $0x18] sm:$0xf]  ;;  %v6314_v54 = vld [vmem:[#allocation16 + $0x20] sm:$0xf0] }
 0x239   :  { %v1764_v8 = vadd.f32 %v1758_v25, %v1710_v62  ;;  %v7179_v14 = vpack.c.bf16 %v1767_v2, %v1766_v4  ;;  %v5299_v4 = vld [vmem:[#allocation16 + $0x78] sm:$0xf] }
 0x23a   :  { %v1667_v5 = vpop.f32.mrf.mxu2 }
 0x23b   :  { %v1668_v9 = vadd.f32 %v1667_v5, %v1654_v3  ;;  %v1770_v34 = vmax.f32 %v1764_v8, 0.0  ;;  %v1884_v26 = vunpack.c.l.b16 %v7179_v14  ;;  %v1885_v31 = vunpack.c.h.b16 %v7179_v14  ;;  %v6326_v5 = vld [vmem:[#allocation16 + $0x80] sm:$0xf0]  ;;  %v5187_v8 = vld [vmem:[#allocation13 + $0x1d0] sm:$0xf] }
 0x23d   :  { %v1763_v13 = vadd.f32 %v1757_v21, %v1668_v9  ;;  %v6297_v9 = vld [vmem:[#allocation13 + $0x1d8] sm:$0xf0]  ;;  %v5300_v21 = vor.u32 %v6326_v5, %v5299_v4 }
 0x23e   :  { %v5277_v4 = vld [vmem:[#allocation16 + $0x54] sm:$0xf0] }
 0x23f   :  { %v1769_v15 = vmax.f32 %v1763_v13, 0.0  ;;  %v5188_v13 = vor.u32 %v6297_v9, %v5187_v8  ;;  %v5421_v8 = vld [vmem:[#allocation16 + $0x174] sm:$0xf0] }
 0x241   :  { %v7182_v19 = vpack.c.bf16 %v1770_v34, %v1769_v15  ;;  %v6294_v34 = vld [vmem:[#allocation13 + $0x1c0] sm:$0xf0]  ;;  %v5288_v15 = vor.u32 %v6323_v12, %v5287_v11  ;;  %v5515_v11 = vld [vmem:[#allocation16 + $0x228] sm:$0xf] }
 0x242   :  { %v1721_v24 = vpop.f32.mrf.mxu2  ;;  %v5176_v18 = vor.u32 %v6294_v34, %v5175_v46  ;;  %v6316_v46 = vld [vmem:[#allocation16 + $0x34] sm:$0xf]  ;;  %v5265_v34 = vld [vmem:[#allocation16 + $0x3c] sm:$0xf0] }
 0x243   :  { %v1722_v28 = vadd.f32 %v1721_v24, %v1240_v16  ;;  %v1887_v30 = vunpack.c.l.b16 %v7182_v19  ;;  %v1888_v33 = vunpack.c.h.b16 %v7182_v19 }
 0x245   :  { %v1736_v37 = vadd.f32 %v1735_v29, %v1722_v28  ;;  %v7188_v38 = vpack.c.b16 %v1887_v30, %v1884_v26  ;;  %v1891_v39 = vpack.c.b16 %v1888_v33, %v1885_v31  ;;  %v6291_v29 = vld [vmem:[#allocation13 + $0x1a8] sm:$0xf0]  ;;  %v5151_v26 = vld [vmem:[#allocation13 + $0x188] sm:$0xf]  ;;  %v6331_v28 = vld [vmem:[#allocation16 + $0xac] sm:$0xf] }
 0x246   :  { %v5164_v24 = vor.u32 %v6291_v29, %v5163_v23  ;;  %v5325_v30 = vld [vmem:[#allocation16 + $0xb4] sm:$0xf0]  ;;  %v5152_v31 = vor.u32 %v6288_v27, %v5151_v26  ;;  %v6341_v29 = vld [vmem:[#allocation16 + $0xf8] sm:$0xf0] }
 0x247   :  { %v1750_v44 = vadd.f32 %v1749_v48, %v1736_v37  ;;  %2288 = vmatmul.bf16.vlgmr.msrb.gmra.mxu1 %v7188_v38  ;;  %2302 = vmatmul.bf16.vlgmr.msrb.gmra.mxu2 %v1891_v39  ;;  %v5328_v33 = vor.u32 %v6331_v28, %v5325_v30  ;;  %v5275_v48 = vld [vmem:[#allocation16 + $0x48] sm:$0xf]  ;;  %v6377_v26 = vld [vmem:[#allocation16 + $0x218] sm:$0xf0] }
 0x248   :  { %2330 = vmatmul.bf16.vlgmr.msra.gmra.mxu0 %v7188_v38  ;;  %2392 = vmatpush.bf16.msrb.mxu1 %v5236_v36  ;;  %v6320_v36 = vld [vmem:[#allocation16 + $0x50] sm:$0xf0]  ;;  %v6313_v30 = vld [vmem:[#allocation16 + $0x1c] sm:$0xf] }
 0x249   :  { %v1762_v22 = vadd.f32 %v1756_v47, %v1750_v44  ;;  %2903 = vmatpush.bf16.msrb.mxu2 %v5324_v59  ;;  %v5276_v37 = vor.u32 %v6320_v36, %v5275_v48  ;;  %v5316_v44 = vor.u32 %v6328_v42, %v5313_v43  ;;  %v5407_v47 = vld [vmem:[#allocation16 + $0x150] sm:$0xf]  ;;  %v6350_v59 = vld [vmem:[#allocation16 + $0x140] sm:$0xf0]  ;;  %v5397_v36 = vld [vmem:[#allocation16 + $0x144] sm:$0xf0] }
 0x24a   :  { %v1723_v51 = vpop.f32.mrf.mxu2  ;;  %v5491_v42 = vld [vmem:[#allocation16 + $0x1f8] sm:$0xf]  ;;  %v6374_v43 = vld [vmem:[#allocation16 + $0x200] sm:$0xf0] }
 0x24b   :  { %v1724_v32 = vadd.f32 %v1723_v51, %v1240_v16  ;;  %v1768_v3 = vmax.f32 %v1762_v22, 0.0  ;;  %v6325_v51 = vld [vmem:[#allocation16 + $0x7c] sm:$0xf]  ;;  %v5301_v22 = vld [vmem:[#allocation16 + $0x84] sm:$0xf0] }
 0x24c   :  { %2393 = vmatpush.bf16.msrb.mxu1 %v5224_v41  ;;  %v6317_v41 = vld [vmem:[#allocation16 + $0x38] sm:$0xf0] }
 0x24d   :  { %v1738_v62 = vadd.f32 %v1737_v56, %v1724_v32  ;;  %2904 = vmatpush.bf16.msrb.mxu2 %v5312_v35  ;;  %v7194_v2 = vpack.c.bf16 %v1768_v3, %v1768_v3  ;;  %v5264_v49 = vor.u32 %v6317_v41, %v5263_v45  ;;  %v5304_v32 = vor.u32 %v6325_v51, %v5301_v22  ;;  %v5383_v35 = vld [vmem:[#allocation16 + $0x120] sm:$0xf]  ;;  %v6347_v3 = vld [vmem:[#allocation16 + $0x128] sm:$0xf0]  ;;  %v5241_v45 = vld [vmem:[#allocation16 + $0xc] sm:$0xf0] }
 0x24e   :  { %v5252_v56 = vor.u32 %v6314_v54, %v5251_v53  ;;  %v5384_v5 = vor.u32 %v6347_v3, %v5383_v35  ;;  %v5492_v41 = vor.u32 %v6374_v43, %v5491_v42  ;;  %v5427_v51 = vld [vmem:[#allocation16 + $0x170] sm:$0xf]  ;;  %v5335_v53 = vld [vmem:[#allocation16 + $0xc0] sm:$0xf]  ;;  %v6335_v54 = vld [vmem:[#allocation16 + $0xc8] sm:$0xf0] }
 0x24f   :  { %v1752_v25 = vadd.f32 %v1751_v0, %v1738_v62  ;;  %v1886_v16 = vunpack.c.l.b16 %v7194_v2  ;;  %v5289_v62 = vld [vmem:[#allocation16 + $0x6c] sm:$0xf0]  ;;  %v6311_v0 = vld [vmem:[#allocation16 + $0x8] sm:$0xf0]  ;;  %v5415_v35 = vld [vmem:[#allocation16 + $0x158] sm:$0xf] }
 0x250   :  { %2394 = vmatpush.bf16.msrb.mxu1 %v5212_v58  ;;  %v5395_v58 = vld [vmem:[#allocation16 + $0x138] sm:$0xf]  ;;  %v5292_v63 = vor.u32 %v6322_v60, %v5289_v62  ;;  %v6343_v60 = vld [vmem:[#allocation16 + $0x10c] sm:$0xf]  ;;  %v6354_v3 = vld [vmem:[#allocation16 + $0x160] sm:$0xf0] }
 0x251   :  { %v1765_v7 = vadd.f32 %v1759_v1, %v1752_v25  ;;  %2905 = vmatpush.bf16.msrb.mxu2 %v5300_v21  ;;  %v5396_v61 = vor.u32 %v6350_v59, %v5395_v58  ;;  %v5240_v1 = vor.u32 %v6311_v0, %v5239_v57  ;;  %v6319_v25 = vld [vmem:[#allocation16 + $0x4c] sm:$0xf]  ;;  %v5371_v21 = vld [vmem:[#allocation16 + $0x108] sm:$0xf]  ;;  %v5336_v58 = vor.u32 %v6335_v54, %v5335_v53  ;;  %v5517_v0 = vld [vmem:[#allocation16 + $0x234] sm:$0xf0] }
 0x252   :  { %v6371_v59 = vld [vmem:[#allocation16 + $0x1e8] sm:$0xf0]  ;;  %v5481_v42 = vld [vmem:[#allocation16 + $0x1ec] sm:$0xf0]  ;;  %v6333_v54 = vld [vmem:[#allocation16 + $0xb8] sm:$0xf0] }
 0x253   :  { %v1771_v10 = vmax.f32 %v1765_v7, 0.0  ;;  %v6355_v7 = vld [vmem:[#allocation16 + $0x16c] sm:$0xf] }
 0x254   :  { %2395 = vmatpush.bf16.msrb.mxu1 %v5200_v6  ;;  %v5280_v6 = vor.u32 %v6319_v25, %v5277_v4  ;;  %v5424_v9 = vor.u32 %v6355_v7, %v5421_v8  ;;  %v6379_v57 = vld [vmem:[#allocation16 + $0x22c] sm:$0xf]  ;;  %v5416_v25 = vor.u32 %v6354_v3, %v5415_v35  ;;  %v5467_v4 = vld [vmem:[#allocation16 + $0x1c8] sm:$0xf]  ;;  %v5355_v35 = vld [vmem:[#allocation16 + $0xe0] sm:$0xf] }
 0x255   :  { %v7196_v55 = vpack.c.bf16 %v1771_v10, %v1771_v10  ;;  %2906 = vmatpush.bf16.msrb.mxu2 %v5288_v15  ;;  %v6344_v10 = vld [vmem:[#allocation16 + $0x110] sm:$0xf0] }
 0x256   :  { %v5372_v12 = vor.u32 %v6344_v10, %v5371_v21  ;;  %v6376_v21 = vld [vmem:[#allocation16 + $0x214] sm:$0xf]  ;;  %v5505_v10 = vld [vmem:[#allocation16 + $0x21c] sm:$0xf0] }
 0x257   :  { %2344 = vmatmul.bf16.vlgmr.msra.gmra.mxu1 %v1891_v39  ;;  %v1889_v17 = vunpack.c.l.b16 %v7196_v55 }
 0x258   :  { %2386 = vmatmul.bf16.vlgmr.msrb.gmra.mxu0 %v1891_v39  ;;  %2396 = vmatpush.bf16.msrb.mxu1 %v5188_v13  ;;  %v5419_v39 = vld [vmem:[#allocation16 + $0x168] sm:$0xf]  ;;  %v6380_v13 = vld [vmem:[#allocation16 + $0x230] sm:$0xf0] }
 0x259   :  { %v1892_v20 = vpack.c.b16 %v1889_v17, %v1886_v16  ;;  %v5420_v52 = vor.u32 %v6356_v40, %v5419_v39  ;;  %2907 = vmatpush.bf16.msrb.mxu2 %v5276_v37  ;;  %v5516_v15 = vor.u32 %v6380_v13, %v5515_v11  ;;  %v5268_v16 = vor.u32 %v6316_v46, %v5265_v34  ;;  %v6352_v17 = vld [vmem:[#allocation16 + $0x154] sm:$0xf]  ;;  %v5347_v39 = vld [vmem:[#allocation16 + $0xd8] sm:$0xf]  ;;  %v6338_v40 = vld [vmem:[#allocation16 + $0xe0] sm:$0xf0] }
 0x25a   :  { %v5403_v13 = vld [vmem:[#allocation16 + $0x140] sm:$0xf]  ;;  %v6351_v46 = vld [vmem:[#allocation16 + $0x148] sm:$0xf0] }
 0x25b   :  { %2316 = vmatmul.bf16.vlgmr.msrb.gmra.mxu3 %v1892_v20  ;;  %2358 = vmatmul.bf16.vlgmr.msra.gmra.mxu2 %v1892_v20  ;;  %v5404_v34 = vor.u32 %v6351_v46, %v5403_v13  ;;  %v6336_v13 = vld [vmem:[#allocation16 + $0xd0] sm:$0xf0]  ;;  %v7207_v46 = vld [vmem:[#allocation14] sm:$0x7] }
 0x25c   :  { %2397 = vmatpush.bf16.msrb.mxu1 %v5176_v18  ;;  %2917 = vmatpush.bf16.msrb.mxu3 %v5420_v52  ;;  %v5409_v18 = vld [vmem:[#allocation16 + $0x15c] sm:$0xf0]  ;;  %v5348_v52 = vor.u32 %v6338_v40, %v5347_v39  ;;  %v5337_v39 = vld [vmem:[#allocation16 + $0xcc] sm:$0xf0]  ;;  %v6370_v40 = vld [vmem:[#allocation16 + $0x1e4] sm:$0xf] }
 0x25d   :  { %2908 = vmatpush.bf16.msrb.mxu2 %v5264_v49  ;;  %v5412_v23 = vor.u32 %v6352_v17, %v5409_v18  ;;  %2931 = vmatpush.bf16.msra.mxu0 %v5516_v15  ;;  %v6346_v49 = vld [vmem:[#allocation16 + $0x124] sm:$0xf]  ;;  %v5455_v15 = vld [vmem:[#allocation16 + $0x1b0] sm:$0xf]  ;;  %v6337_v17 = vld [vmem:[#allocation16 + $0xdc] sm:$0xf]  ;;  %v5484_v43 = vor.u32 %v6370_v40, %v5481_v42 }
 0x25e   :  { %v5271_v42 = vld [vmem:[#allocation16 + $0x38] sm:$0xf] }
 0x260   :  { %2398 = vmatpush.bf16.msrb.mxu1 %v5164_v24  ;;  %v5503_v24 = vld [vmem:[#allocation16 + $0x210] sm:$0xf] }
 0x261   :  { %2909 = vmatpush.bf16.msrb.mxu2 %v5252_v56  ;;  %v5504_v28 = vor.u32 %v6377_v26, %v5503_v24  ;;  %v5479_v56 = vld [vmem:[#allocation16 + $0x1e0] sm:$0xf] }
 0x262   :  { %v5480_v62 = vor.u32 %v6371_v59, %v5479_v56  ;;  %v5367_v56 = vld [vmem:[#allocation16 + $0xf8] sm:$0xf] }
 0x263   :  { %2932 = vmatpush.bf16.msra.mxu0 %v5504_v28  ;;  %v6348_v28 = vld [vmem:[#allocation16 + $0x130] sm:$0xf0] }
 0x264   :  { %2399 = vmatpush.bf16.msrb.mxu1 %v5152_v31  ;;  %v5253_v31 = vld [vmem:[#allocation16 + $0x24] sm:$0xf0] }
 0x265   :  { %2910 = vmatpush.bf16.msrb.mxu2 %v5240_v1  ;;  %v5256_v48 = vor.u32 %v6313_v30, %v5253_v31  ;;  %v5520_v1 = vor.u32 %v6379_v57, %v5517_v0  ;;  %v5443_v31 = vld [vmem:[#allocation16 + $0x198] sm:$0xf]  ;;  %v6330_v0 = vld [vmem:[#allocation16 + $0xa0] sm:$0xf0] }
 0x267   :  { %2400 = vmatmul.bf16.vlgmr.msrb.gmra.mxu1 %v1892_v20  ;;  %v5359_v20 = vld [vmem:[#allocation16 + $0xf0] sm:$0xf]  ;;  %2933 = vmatpush.bf16.msra.mxu0 %v5492_v41 }
 0x268   :  { %2945 = vmatpush.bf16.msra.mxu1 %v5328_v33  ;;  %v5360_v27 = vor.u32 %v6341_v29, %v5359_v20  ;;  %v6349_v33 = vld [vmem:[#allocation16 + $0x13c] sm:$0xf]  ;;  %v5349_v20 = vld [vmem:[#allocation16 + $0xe4] sm:$0xf0] }
 0x269   :  { %2959 = vmatpush.bf16.msra.mxu2 %v5424_v9  ;;  %v5400_v37 = vor.u32 %v6349_v33, %v5397_v36  ;;  %v5361_v9 = vld [vmem:[#allocation16 + $0xfc] sm:$0xf0]  ;;  %v5493_v29 = vld [vmem:[#allocation16 + $0x204] sm:$0xf0]  ;;  %v5352_v24 = vor.u32 %v6337_v17, %v5349_v20  ;;  %v6362_v33 = vld [vmem:[#allocation16 + $0x1a0] sm:$0xf0] }
 0x26a   :  { %v5433_v17 = vld [vmem:[#allocation16 + $0x18c] sm:$0xf0]  ;;  %v1874_v20 = vperm.slane %v7207_v46, 0 }
 0x26b   :  { %2372 = vmatmul.bf16.vlgmr.msra.gmra.mxu3 %v7188_v38  ;;  %v5408_v38 = vor.u32 %v6353_v50, %v5407_v47  ;;  %v5385_v50 = vld [vmem:[#allocation16 + $0x12c] sm:$0xf0]  ;;  %2934 = vmatpush.bf16.msra.mxu0 %v5480_v62  ;;  %v5457_v62 = vld [vmem:[#allocation16 + $0x1bc] sm:$0xf0] }
 0x26c   :  { %2946 = vmatpush.bf16.msra.mxu1 %v5316_v44  ;;  %v6310_v44 = vld [vmem:[#allocation16 + $0x4] sm:$0xf]  ;;  %v5388_v22 = vor.u32 %v6346_v49, %v5385_v50  ;;  %v5431_v49 = vld [vmem:[#allocation16 + $0x180] sm:$0xf]  ;;  %v6359_v50 = vld [vmem:[#allocation16 + $0x188] sm:$0xf0] }
 0x26d   :  { %2918 = vmatpush.bf16.msrb.mxu3 %v5408_v38  ;;  %2960 = vmatpush.bf16.msra.mxu2 %v5412_v23  ;;  %v5244_v47 = vor.u32 %v6310_v44, %v5241_v45  ;;  %v6357_v38 = vld [vmem:[#allocation16 + $0x178] sm:$0xf0]  ;;  %v5379_v44 = vld [vmem:[#allocation16 + $0x110] sm:$0xf] }
 0x26e   :  { %v6373_v23 = vld [vmem:[#allocation16 + $0x1fc] sm:$0xf] }
 0x26f   :  { %v5496_v26 = vor.u32 %v6373_v23, %v5493_v29  ;;  %v6345_v45 = vld [vmem:[#allocation16 + $0x118] sm:$0xf0]  ;;  %v1875_v23 = vperm.slane %v7207_v46, 1 }
 0x270   :  { %2947 = vmatpush.bf16.msra.mxu1 %v5304_v32  ;;  %v5428_v32 = vor.u32 %v6357_v38, %v5427_v51  ;;  %v5432_v51 = vor.u32 %v6359_v50, %v5431_v49  ;;  %v5469_v38 = vld [vmem:[#allocation16 + $0x1d4] sm:$0xf0] }
 0x271   :  { %2919 = vmatpush.bf16.msrb.mxu3 %v5396_v61  ;;  %2961 = vmatpush.bf16.msra.mxu2 %v5400_v37  ;;  %v5373_v61 = vld [vmem:[#allocation16 + $0x114] sm:$0xf0]  ;;  %v5444_v37 = vor.u32 %v6362_v33, %v5443_v31  ;;  %v5283_v31 = vld [vmem:[#allocation16 + $0x50] sm:$0xf]  ;;  %v6321_v33 = vld [vmem:[#allocation16 + $0x58] sm:$0xf0] }
 0x274   :  { %2948 = vmatpush.bf16.msra.mxu1 %v5292_v63  ;;  %v5376_v63 = vor.u32 %v6343_v60, %v5373_v61  ;;  %v6364_v61 = vld [vmem:[#allocation16 + $0x1b4] sm:$0xf] }
 0x275   :  { %2920 = vmatpush.bf16.msrb.mxu3 %v5384_v5  ;;  %2962 = vmatpush.bf16.msra.mxu2 %v5388_v22  ;;  %v6368_v5 = vld [vmem:[#allocation16 + $0x1d0] sm:$0xf0]  ;;  %v6367_v22 = vld [vmem:[#allocation16 + $0x1cc] sm:$0xf]  ;;  %v5460_v57 = vor.u32 %v6364_v61, %v5457_v62 }
 0x276   :  { %v5468_v8 = vor.u32 %v6368_v5, %v5467_v4  ;;  %v5472_v53 = vor.u32 %v6367_v22, %v5469_v38 }
 0x278   :  { %2949 = vmatpush.bf16.msra.mxu1 %v5280_v6  ;;  %v6340_v6 = vld [vmem:[#allocation16 + $0xf4] sm:$0xf]  ;;  %2935 = vmatpush.bf16.msra.mxu0 %v5468_v8  ;;  %v6361_v8 = vld [vmem:[#allocation16 + $0x19c] sm:$0xf] }
 0x279   :  { %2921 = vmatpush.bf16.msrb.mxu3 %v5372_v12  ;;  %2963 = vmatpush.bf16.msra.mxu2 %v5376_v63  ;;  %v5364_v11 = vor.u32 %v6340_v6, %v5361_v9  ;;  %v5508_v12 = vor.u32 %v6376_v21, %v5505_v10  ;;  %v5319_v63 = vld [vmem:[#allocation16 + $0x98] sm:$0xf]  ;;  %v5445_v9 = vld [vmem:[#allocation16 + $0x1a4] sm:$0xf0]  ;;  %v5307_v21 = vld [vmem:[#allocation16 + $0x80] sm:$0xf] }
 0x27a   :  { %v5320_v4 = vor.u32 %v6330_v0, %v5319_v63  ;;  %v5448_v10 = vor.u32 %v6361_v8, %v5445_v9 }
 0x27c   :  { %2950 = vmatpush.bf16.msra.mxu1 %v5268_v16  ;;  %v6365_v16 = vld [vmem:[#allocation16 + $0x1b8] sm:$0xf0] }
 0x27d   :  { %2922 = vmatpush.bf16.msrb.mxu3 %v5360_v27  ;;  %2964 = vmatpush.bf16.msra.mxu2 %v5364_v11  ;;  %v5456_v18 = vor.u32 %v6365_v16, %v5455_v15  ;;  %v5391_v27 = vld [vmem:[#allocation16 + $0x128] sm:$0xf]  ;;  %v6327_v11 = vld [vmem:[#allocation16 + $0x88] sm:$0xf0]  ;;  %v6358_v16 = vld [vmem:[#allocation16 + $0x184] sm:$0xf] }
 0x27e   :  { %v5392_v30 = vor.u32 %v6348_v28, %v5391_v27  ;;  %v5436_v29 = vor.u32 %v6358_v16, %v5433_v17 }
 0x27f   :  { %2936 = vmatpush.bf16.msra.mxu0 %v5456_v18  ;;  %v5295_v18 = vld [vmem:[#allocation16 + $0x68] sm:$0xf] }
 0x280   :  { %2951 = vmatpush.bf16.msra.mxu1 %v5256_v48  ;;  %v6334_v48 = vld [vmem:[#allocation16 + $0xc4] sm:$0xf] }
 0x281   :  { %2923 = vmatpush.bf16.msrb.mxu3 %v5348_v52  ;;  %2965 = vmatpush.bf16.msra.mxu2 %v5352_v24  ;;  %v5340_v52 = vor.u32 %v6334_v48, %v5337_v39  ;;  %v6324_v24 = vld [vmem:[#allocation16 + $0x70] sm:$0xf0]  ;;  %v5284_v39 = vor.u32 %v6321_v33, %v5283_v31  ;;  %v5475_v33 = vld [vmem:[#allocation16 + $0x1d0] sm:$0xf] }
 0x282   :  { %v5296_v28 = vor.u32 %v6324_v24, %v5295_v18  ;;  %v5623_v18 = vld [vmem:[#allocation19 + $0xc0] sm:$0xf] }
 0x283   :  { %2937 = vmatpush.bf16.msra.mxu0 %v5444_v37 }
 0x284   :  { %2952 = vmatpush.bf16.msra.mxu1 %v5244_v47  ;;  %v5380_v47 = vor.u32 %v6345_v45, %v5379_v44 }
 0x285   :  { %2924 = vmatpush.bf16.msrb.mxu3 %v5336_v58  ;;  %2966 = vmatpush.bf16.msra.mxu2 %v5340_v52  ;;  %v6342_v58 = vld [vmem:[#allocation16 + $0x100] sm:$0xf0] }
 0x286   :  { %v5368_v60 = vor.u32 %v6342_v58, %v5367_v56  ;;  %v6318_v52 = vld [vmem:[#allocation16 + $0x40] sm:$0xf0] }
 0x287   :  { %2938 = vmatpush.bf16.msra.mxu0 %v5432_v51  ;;  %v5272_v49 = vor.u32 %v6318_v52, %v5271_v42  ;;  %v5591_v52 = vld [vmem:[#allocation19 + $0x80] sm:$0xf] }
 0x288   :  { %3001 = vmatpush.bf16.msrb.mxu1 %v5428_v32  ;;  %v5331_v32 = vld [vmem:[#allocation16 + $0xb0] sm:$0xf] }
 0x289   :  { %2973 = vmatpush.bf16.msra.mxu3 %v5520_v1  ;;  %v5332_v59 = vor.u32 %v6333_v54, %v5331_v32  ;;  %v6339_v1 = vld [vmem:[#allocation16 + $0xe8] sm:$0xf0] }
 0x28a   :  { %v5356_v5 = vor.u32 %v6339_v1, %v5355_v35  ;;  %v6315_v54 = vld [vmem:[#allocation16 + $0x28] sm:$0xf0]  ;;  %v5511_v1 = vld [vmem:[#allocation16 + $0x218] sm:$0xf] }
 0x28b   :  { %2987 = vmatpush.bf16.msrb.mxu0 %v5332_v59  ;;  %v5523_v59 = vld [vmem:[#allocation16 + $0x230] sm:$0xf] }
 0x28c   :  { %3002 = vmatpush.bf16.msrb.mxu1 %v5416_v25 }
 0x28d   :  { %2974 = vmatpush.bf16.msra.mxu3 %v5508_v12  ;;  %v5343_v12 = vld [vmem:[#allocation16 + $0xc8] sm:$0xf] }
 0x28e   :  { %v5344_v15 = vor.u32 %v6336_v13, %v5343_v12 }
 0x28f   :  { %2988 = vmatpush.bf16.msrb.mxu0 %v5320_v4  ;;  %v6312_v4 = vld [vmem:[#allocation16 + $0x10] sm:$0xf0] }
 0x290   :  { %3003 = vmatpush.bf16.msrb.mxu1 %v5404_v34  ;;  %v5308_v34 = vor.u32 %v6327_v11, %v5307_v21  ;;  %v6375_v11 = vld [vmem:[#allocation16 + $0x208] sm:$0xf0] }
 0x291   :  { %2975 = vmatpush.bf16.msra.mxu3 %v5496_v26 }
 0x293   :  { %2989 = vmatpush.bf16.msrb.mxu0 %v5308_v34  ;;  %v5639_v34 = vld [vmem:[#allocation19 + $0xe0] sm:$0xf] }
 0x294   :  { %3004 = vmatpush.bf16.msrb.mxu1 %v5392_v30 }
 0x295   :  { %2976 = vmatpush.bf16.msra.mxu3 %v5484_v43 }
 0x297   :  { %2990 = vmatpush.bf16.msrb.mxu0 %v5296_v28 }
 0x298   :  { %3005 = vmatpush.bf16.msrb.mxu1 %v5380_v47 }
 0x299   :  { %2977 = vmatpush.bf16.msra.mxu3 %v5472_v53 }
 0x29b   :  { %2991 = vmatpush.bf16.msrb.mxu0 %v5284_v39 }
 0x29c   :  { %3006 = vmatpush.bf16.msrb.mxu1 %v5368_v60  ;;  %v6381_v60 = vld [vmem:[#allocation16 + $0x238] sm:$0xf0] }
 0x29d   :  { %2978 = vmatpush.bf16.msra.mxu3 %v5460_v57  ;;  %v5524_v57 = vor.u32 %v6381_v60, %v5523_v59 }
 0x29f   :  { %2992 = vmatpush.bf16.msrb.mxu0 %v5272_v49 }
 0x2a0   :  { %3007 = vmatpush.bf16.msrb.mxu1 %v5356_v5  ;;  %v1876_v5 = vperm.slane %v7207_v46, 2  ;;  %v5487_v46 = vld [vmem:[#allocation16 + $0x1e8] sm:$0xf] }
 0x2a1   :  { %2979 = vmatpush.bf16.msra.mxu3 %v5448_v10  ;;  %v5499_v10 = vld [vmem:[#allocation16 + $0x200] sm:$0xf] }
 0x2a2   :  { %v5500_v16 = vor.u32 %v6375_v11, %v5499_v10  ;;  %v6432_v10 = vld [vmem:[#allocation19 + $0x18c] sm:$0xf0]  ;;  %v6406_v11 = vld [vmem:[#allocation19 + $0xc4] sm:$0xf] }
 0x2a4   :  { %3008 = vmatpush.bf16.msrb.mxu1 %v5344_v15  ;;  %v6412_v15 = vld [vmem:[#allocation19 + $0xec] sm:$0xf0] }
 0x2a5   :  { %2980 = vmatpush.bf16.msra.mxu3 %v5436_v29  ;;  %v5640_v17 = vor.u32 %v6412_v15, %v5639_v34  ;;  %v6402_v15 = vld [vmem:[#allocation19 + $0xa4] sm:$0xf] }
 0x2c4   :  { %v7201_v7 = vpop.f32.mrf.mxu1 }
 0x2c5   :  { %v2331_v3 = vpop.f32.mrf.mxu0  ;;  %v2290_v48 = vadd.f32 %v7201_v7, %v1874_v20  ;;  %v5259_v7 = vld [vmem:[#allocation16 + $0x20] sm:$0xf] }
 0x2c6   :  { %v2332_v37 = vadd.f32 %v2331_v3, %v1875_v23  ;;  %v6378_v3 = vld [vmem:[#allocation16 + $0x220] sm:$0xf0] }
 0x2c7   :  { %v5512_v21 = vor.u32 %v6378_v3, %v5511_v1  ;;  %v6360_v3 = vld [vmem:[#allocation16 + $0x190] sm:$0xf0] }
 0x2ca   :  { %v7203_v36 = vpop.f32.mrf.mxu2 }
 0x2cb   :  { %v2304_v43 = vadd.f32 %v7203_v36, %v2290_v48  ;;  %v5260_v36 = vor.u32 %v6315_v54, %v5259_v7  ;;  %v6369_v48 = vld [vmem:[#allocation16 + $0x1d8] sm:$0xf0]  ;;  %v5575_v7 = vld [vmem:[#allocation19 + $0x60] sm:$0xf]  ;;  %v6396_v54 = vld [vmem:[#allocation19 + $0x6c] sm:$0xf0] }
 0x2cc   :  { %v7205_v41 = vpop.f32.mrf.mxu1 }
 0x2cd   :  { %v2333_v30 = vpop.f32.mrf.mxu0  ;;  %v2292_v44 = vadd.f32 %v7205_v41, %v1874_v20  ;;  %2993 = vmatpush.bf16.msrb.mxu0 %v5260_v36  ;;  %v6408_v20 = vld [vmem:[#allocation19 + $0xcc] sm:$0xf0]  ;;  %v6363_v36 = vld [vmem:[#allocation16 + $0x1a8] sm:$0xf0] }
 0x2ce   :  { %v2334_v45 = vadd.f32 %v2333_v30, %v1875_v23  ;;  %v6372_v23 = vld [vmem:[#allocation16 + $0x1f0] sm:$0xf0]  ;;  %v5624_v29 = vor.u32 %v6408_v20, %v5623_v18  ;;  %v6398_v18 = vld [vmem:[#allocation19 + $0x84] sm:$0xf]  ;;  %v5593_v20 = vld [vmem:[#allocation19 + $0x90] sm:$0xf0] }
 0x2cf   :  { %v5488_v30 = vor.u32 %v6372_v23, %v5487_v46  ;;  %v5596_v46 = vor.u32 %v6398_v18, %v5593_v20  ;;  %v6394_v23 = vld [vmem:[#allocation19 + $0x64] sm:$0xf]  ;;  %v5897_v20 = vld [vmem:[#allocation19 + $0x2f0] sm:$0xf0] }
 0x2d0   :  { %v6474_v18 = vld [vmem:[#allocation19 + $0x2e4] sm:$0xf] }
 0x2d2   :  { %v2305_v25 = vpop.f32.mrf.mxu2 }
 0x2d3   :  { %v2306_v50 = vadd.f32 %v2305_v25, %v2292_v44  ;;  %v5247_v25 = vld [vmem:[#allocation16 + $0x8] sm:$0xf] }
 0x2d4   :  { %v2345_v6 = vpop.f32.mrf.mxu1 }
 0x2d5   :  { %v2346_v47 = vadd.f32 %v2345_v6, %v2332_v37  ;;  %v5248_v6 = vor.u32 %v6312_v4, %v5247_v25  ;;  %v2387_v8 = vpop.f32.mrf.mxu0  ;;  %v5735_v25 = vld [vmem:[#allocation19 + $0x1a0] sm:$0xf]  ;;  %v6410_v4 = vld [vmem:[#allocation19 + $0xe4] sm:$0xf] }
 0x2d7   :  { %2994 = vmatpush.bf16.msrb.mxu0 %v5248_v6 }
 0x2dc   :  { %v2347_v40 = vpop.f32.mrf.mxu1 }
 0x2dd   :  { %v2348_v51 = vadd.f32 %v2347_v40, %v2334_v45  ;;  %v2389_v37 = vpop.f32.mrf.mxu0  ;;  %v5476_v45 = vor.u32 %v6369_v48, %v5475_v33  ;;  %v6390_v33 = vld [vmem:[#allocation19 + $0x44] sm:$0xf]  ;;  %v5561_v48 = vld [vmem:[#allocation19 + $0x50] sm:$0xf0] }
 0x2de   :  { %v2317_v26 = vpop.f32.mrf.mxu3  ;;  %v2359_v27 = vpop.f32.mrf.mxu2 }
 0x2df   :  { %v2318_v22 = vadd.f32 %v2317_v26, %v2304_v43  ;;  %v2360_v38 = vadd.f32 %v2359_v27, %v2346_v47  ;;  %v5607_v26 = vld [vmem:[#allocation19 + $0xa0] sm:$0xf]  ;;  %v6404_v27 = vld [vmem:[#allocation19 + $0xac] sm:$0xf0]  ;;  %v5463_v47 = vld [vmem:[#allocation16 + $0x1b8] sm:$0xf] }
 0x2e0   :  { %v5608_v39 = vor.u32 %v6404_v27, %v5607_v26  ;;  %v6400_v43 = vld [vmem:[#allocation19 + $0x8c] sm:$0xf0]  ;;  %v5559_v26 = vld [vmem:[#allocation19 + $0x40] sm:$0xf] }
 0x2e1   :  { %v2406_v61 = vmax.f32 %v2318_v22, 0.0  ;;  %v2407_v41 = vmax.f32 %v2360_v38, 0.0  ;;  %v6444_v22 = vld [vmem:[#allocation19 + $0x1ec] sm:$0xf0]  ;;  %v5592_v38 = vor.u32 %v6400_v43, %v5591_v52  ;;  %v5543_v52 = vld [vmem:[#allocation19 + $0x20] sm:$0xf] }
 0x2e2   :  { %v6392_v27 = vld [vmem:[#allocation19 + $0x4c] sm:$0xf0] }
 0x2e3   :  { %v6388_v43 = vld [vmem:[#allocation19 + $0x2c] sm:$0xf0] }
 0x2e4   :  { %v2401_v12 = vpop.f32.mrf.mxu1 }
 0x2e6   :  { %v2319_v32 = vpop.f32.mrf.mxu3  ;;  %v2361_v53 = vpop.f32.mrf.mxu2 }
 0x2e7   :  { %v2320_v56 = vadd.f32 %v2319_v32, %v2306_v50  ;;  %v2362_v58 = vadd.f32 %v2361_v53, %v2348_v51  ;;  %v6366_v50 = vld [vmem:[#allocation16 + $0x1c0] sm:$0xf0] }
 0x2e8   :  { %v5767_v51 = vld [vmem:[#allocation19 + $0x1e0] sm:$0xf] }
 0x2e9   :  { %v2409_v62 = vmax.f32 %v2320_v56, 0.0  ;;  %v2410_v63 = vmax.f32 %v2362_v58, 0.0  ;;  %v5464_v56 = vor.u32 %v6366_v50, %v5463_v47  ;;  %v5451_v58 = vld [vmem:[#allocation16 + $0x1a0] sm:$0xf]  ;;  %v5768_v59 = vor.u32 %v6444_v22, %v5767_v51  ;;  %v6472_v47 = vld [vmem:[#allocation19 + $0x2cc] sm:$0xf0] }
 0x2ea   :  { %v5545_v50 = vld [vmem:[#allocation19 + $0x30] sm:$0xf0] }
 0x2eb   :  { %v7214_v0 = vpack.c.bf16 %v2409_v62, %v2406_v61  ;;  %v2413_v35 = vpack.c.bf16 %v2410_v63, %v2407_v41  ;;  %v5751_v61 = vld [vmem:[#allocation19 + $0x1c0] sm:$0xf]  ;;  %v6440_v41 = vld [vmem:[#allocation19 + $0x1cc] sm:$0xf0]  ;;  %v5576_v62 = vor.u32 %v6396_v54, %v5575_v7  ;;  %v5452_v63 = vor.u32 %v6363_v36, %v5451_v58  ;;  %v5529_v36 = vld [vmem:[#allocation19 + $0x10] sm:$0xf0] }
 0x2ec   :  { %v2403_v44 = vpop.f32.mrf.mxu1  ;;  %v5752_v1 = vor.u32 %v6440_v41, %v5751_v61  ;;  %v5527_v7 = vld [vmem:[#allocation19] sm:$0xf]  ;;  %v6384_v54 = vld [vmem:[#allocation19 + $0xc] sm:$0xf0] }
 0x2ed   :  { %2911 = vmatmul.bf16.vlgmr.msrb.gmra.mxu2 %v7214_v0  ;;  %2925 = vmatmul.bf16.vlgmr.msrb.gmra.mxu3 %v2413_v35  ;;  %v5528_v58 = vor.u32 %v6384_v54, %v5527_v7  ;;  %v6426_v7 = vld [vmem:[#allocation19 + $0x164] sm:$0xf]  ;;  %v5705_v54 = vld [vmem:[#allocation19 + $0x170] sm:$0xf0] }
 0x2ee   :  { %2953 = vmatmul.bf16.vlgmr.msra.gmra.mxu1 %v7214_v0  ;;  %v2373_v9 = vpop.f32.mrf.mxu3  ;;  %3015 = vmatpush.bf16.msrb.mxu2 %v5524_v57  ;;  %v5439_v57 = vld [vmem:[#allocation16 + $0x188] sm:$0xf] }
 0x2ef   :  { %v2374_v13 = vadd.f32 %v2373_v9, %v1876_v5  ;;  %3636 = vmatpush.bf16.msrb.mxu3 %v5640_v17  ;;  %v5440_v6 = vor.u32 %v6360_v3, %v5439_v57  ;;  %v5775_v57 = vld [vmem:[#allocation19 + $0x1e8] sm:$0xf]  ;;  %v6445_v3 = vld [vmem:[#allocation19 + $0x1f4] sm:$0xf0] }
 0x2f1   :  { %v2388_v24 = vadd.f32 %v2387_v8, %v2374_v13 }
 0x2f2   :  { %3016 = vmatpush.bf16.msrb.mxu2 %v5512_v21  ;;  %v5719_v21 = vld [vmem:[#allocation19 + $0x180] sm:$0xf] }
 0x2f3   :  { %3637 = vmatpush.bf16.msrb.mxu3 %v5624_v29  ;;  %v2402_v40 = vadd.f32 %v2401_v12, %v2388_v24  ;;  %v5625_v12 = vld [vmem:[#allocation19 + $0xd0] sm:$0xf0]  ;;  %v5720_v13 = vor.u32 %v6432_v10, %v5719_v21 }
 0x2f4   :  { %v5628_v34 = vor.u32 %v6406_v11, %v5625_v12  ;;  %v5577_v29 = vld [vmem:[#allocation19 + $0x70] sm:$0xf0]  ;;  %v5759_v11 = vld [vmem:[#allocation19 + $0x1c8] sm:$0xf]  ;;  %v6441_v12 = vld [vmem:[#allocation19 + $0x1d4] sm:$0xf0] }
 0x2f5   :  { %v2408_v32 = vmax.f32 %v2402_v40, 0.0  ;;  %v5580_v24 = vor.u32 %v6394_v23, %v5577_v29  ;;  %v5703_v40 = vld [vmem:[#allocation19 + $0x160] sm:$0xf]  ;;  %v5753_v10 = vld [vmem:[#allocation19 + $0x1d0] sm:$0xf0] }
 0x2f6   :  { %v2375_v28 = vpop.f32.mrf.mxu3  ;;  %3017 = vmatpush.bf16.msrb.mxu2 %v5500_v16  ;;  %v5609_v16 = vld [vmem:[#allocation19 + $0xb0] sm:$0xf0]  ;;  %v5831_v23 = vld [vmem:[#allocation19 + $0x260] sm:$0xf]  ;;  %v6460_v29 = vld [vmem:[#allocation19 + $0x26c] sm:$0xf0] }
 0x2f7   :  { %v2376_v31 = vadd.f32 %v2375_v28, %v1876_v5  ;;  %3638 = vmatpush.bf16.msrb.mxu3 %v5608_v39  ;;  %v5641_v5 = vld [vmem:[#allocation19 + $0xf0] sm:$0xf0]  ;;  %v5612_v17 = vor.u32 %v6402_v15, %v5609_v16  ;;  %v5895_v28 = vld [vmem:[#allocation19 + $0x2e0] sm:$0xf]  ;;  %v5564_v39 = vor.u32 %v6390_v33, %v5561_v48  ;;  %v6416_v16 = vld [vmem:[#allocation19 + $0x10c] sm:$0xf0] }
 0x2f8   :  { %v5644_v9 = vor.u32 %v6410_v4, %v5641_v5  ;;  %v5776_v4 = vor.u32 %v6445_v3, %v5775_v57  ;;  %v5655_v15 = vld [vmem:[#allocation19 + $0x100] sm:$0xf]  ;;  %v6470_v48 = vld [vmem:[#allocation19 + $0x2c4] sm:$0xf]  ;;  %v5689_v3 = vld [vmem:[#allocation19 + $0x150] sm:$0xf0] }
 0x2f9   :  { %v2390_v42 = vadd.f32 %v2389_v37, %v2376_v31  ;;  %v6476_v31 = vld [vmem:[#allocation19 + $0x2ec] sm:$0xf0] }
 0x2fa   :  { %3018 = vmatpush.bf16.msrb.mxu2 %v5488_v30  ;;  %v5560_v30 = vor.u32 %v6392_v27, %v5559_v26  ;;  %v5896_v37 = vor.u32 %v6476_v31, %v5895_v28  ;;  %v6434_v26 = vld [vmem:[#allocation19 + $0x1a4] sm:$0xf]  ;;  %v5737_v27 = vld [vmem:[#allocation19 + $0x1b0] sm:$0xf0]  ;;  %v5743_v28 = vld [vmem:[#allocation19 + $0x1a8] sm:$0xf] }
 0x2fb   :  { %v2404_v49 = vadd.f32 %v2403_v44, %v2390_v42  ;;  %3639 = vmatpush.bf16.msrb.mxu3 %v5592_v38  ;;  %v6428_v42 = vld [vmem:[#allocation19 + $0x16c] sm:$0xf0]  ;;  %v5879_v44 = vld [vmem:[#allocation19 + $0x2c0] sm:$0xf]  ;;  %v6437_v31 = vld [vmem:[#allocation19 + $0x1b4] sm:$0xf0] }
 0x2fc   :  { %3664 = vmatpush.bf16.msra.mxu1 %v5896_v37  ;;  %v5880_v51 = vor.u32 %v6472_v47, %v5879_v44  ;;  %v5687_v38 = vld [vmem:[#allocation19 + $0x140] sm:$0xf]  ;;  %v5744_v33 = vor.u32 %v6437_v31, %v5743_v28  ;;  %v5881_v37 = vld [vmem:[#allocation19 + $0x2d0] sm:$0xf0]  ;;  %v5727_v44 = vld [vmem:[#allocation19 + $0x188] sm:$0xf] }
 0x2fd   :  { %v2411_v53 = vmax.f32 %v2404_v49, 0.0  ;;  %2967 = vmatmul.bf16.vlgmr.msra.gmra.mxu2 %v2413_v35  ;;  %v6386_v49 = vld [vmem:[#allocation19 + $0x24] sm:$0xf]  ;;  %v6433_v47 = vld [vmem:[#allocation19 + $0x194] sm:$0xf0] }
 0x2fe   :  { %3009 = vmatmul.bf16.vlgmr.msrb.gmra.mxu1 %v2413_v35  ;;  %3019 = vmatpush.bf16.msrb.mxu2 %v5476_v45  ;;  %v6436_v35 = vld [vmem:[#allocation19 + $0x1ac] sm:$0xf0]  ;;  %v5544_v45 = vor.u32 %v6388_v43, %v5543_v52  ;;  %v5548_v22 = vor.u32 %v6386_v49, %v5545_v50  ;;  %v6430_v52 = vld [vmem:[#allocation19 + $0x184] sm:$0xf]  ;;  %v5721_v43 = vld [vmem:[#allocation19 + $0x190] sm:$0xf0]  ;;  %v5728_v49 = vor.u32 %v6433_v47, %v5727_v44 }
 0x2ff   :  { %v2414_v60 = vpack.c.bf16 %v2411_v53, %v2408_v32  ;;  %3640 = vmatpush.bf16.msrb.mxu3 %v5576_v62  ;;  %v5736_v8 = vor.u32 %v6436_v35, %v5735_v25  ;;  %v6424_v32 = vld [vmem:[#allocation19 + $0x14c] sm:$0xf0]  ;;  %v6442_v62 = vld [vmem:[#allocation19 + $0x1e4] sm:$0xf]  ;;  %v5671_v25 = vld [vmem:[#allocation19 + $0x120] sm:$0xf] }
 0x300   :  { %v5688_v53 = vor.u32 %v6424_v32, %v5687_v38  ;;  %3665 = vmatpush.bf16.msra.mxu1 %v5880_v51  ;;  %v6420_v35 = vld [vmem:[#allocation19 + $0x12c] sm:$0xf0]  ;;  %v6466_v50 = vld [vmem:[#allocation19 + $0x2a4] sm:$0xf]  ;;  %v5865_v51 = vld [vmem:[#allocation19 + $0x2b0] sm:$0xf0] }
 0x301   :  { %2939 = vmatmul.bf16.vlgmr.msra.gmra.mxu0 %v2414_v60  ;;  %2981 = vmatmul.bf16.vlgmr.msra.gmra.mxu3 %v2414_v60  ;;  %v5672_v5 = vor.u32 %v6420_v35, %v5671_v25  ;;  %v5799_v38 = vld [vmem:[#allocation19 + $0x220] sm:$0xf]  ;;  %v6452_v32 = vld [vmem:[#allocation19 + $0x22c] sm:$0xf0]  ;;  %v5647_v25 = vld [vmem:[#allocation19 + $0xe8] sm:$0xf] }
 0x302   :  { %3020 = vmatpush.bf16.msrb.mxu2 %v5464_v56  ;;  %3650 = vmatpush.bf16.msra.mxu0 %v5768_v59  ;;  %v5863_v56 = vld [vmem:[#allocation19 + $0x2a0] sm:$0xf]  ;;  %v6468_v59 = vld [vmem:[#allocation19 + $0x2ac] sm:$0xf0]  ;;  %v5615_v28 = vld [vmem:[#allocation19 + $0xa8] sm:$0xf] }
 0x303   :  { %3641 = vmatpush.bf16.msrb.mxu3 %v5560_v30  ;;  %v5864_v61 = vor.u32 %v6468_v59, %v5863_v56  ;;  %v5740_v30 = vor.u32 %v6434_v26, %v5737_v27  ;;  %v5711_v56 = vld [vmem:[#allocation19 + $0x168] sm:$0xf]  ;;  %v6429_v59 = vld [vmem:[#allocation19 + $0x174] sm:$0xf0]  ;;  %v6414_v26 = vld [vmem:[#allocation19 + $0x104] sm:$0xf] }
 0x304   :  { %v5657_v27 = vld [vmem:[#allocation19 + $0x110] sm:$0xf0]  ;;  %v6405_v31 = vld [vmem:[#allocation19 + $0xb4] sm:$0xf0] }
 0x305   :  { %3666 = vmatpush.bf16.msra.mxu1 %v5864_v61  ;;  %v5849_v61 = vld [vmem:[#allocation19 + $0x290] sm:$0xf0] }
 0x306   :  { %3021 = vmatpush.bf16.msrb.mxu2 %v5452_v63  ;;  %3651 = vmatpush.bf16.msra.mxu0 %v5752_v1  ;;  %v5769_v63 = vld [vmem:[#allocation19 + $0x1f0] sm:$0xf0] }
 0x307   :  { %3642 = vmatpush.bf16.msrb.mxu3 %v5544_v45  ;;  %v5772_v1 = vor.u32 %v6442_v62, %v5769_v63  ;;  %v5724_v45 = vor.u32 %v6430_v52, %v5721_v43  ;;  %v5783_v62 = vld [vmem:[#allocation19 + $0x200] sm:$0xf]  ;;  %v6448_v63 = vld [vmem:[#allocation19 + $0x20c] sm:$0xf0]  ;;  %v5599_v52 = vld [vmem:[#allocation19 + $0x88] sm:$0xf] }
 0x308   :  { %v5784_v57 = vor.u32 %v6448_v63, %v5783_v62  ;;  %v6401_v43 = vld [vmem:[#allocation19 + $0x94] sm:$0xf0] }
 0x309   :  { %v5600_v47 = vor.u32 %v6401_v43, %v5599_v52  ;;  %v6389_v62 = vld [vmem:[#allocation19 + $0x34] sm:$0xf0] }
 0x30a   :  { %3022 = vmatpush.bf16.msrb.mxu2 %v5440_v6  ;;  %3652 = vmatpush.bf16.msra.mxu0 %v5736_v8  ;;  %v5847_v6 = vld [vmem:[#allocation19 + $0x280] sm:$0xf]  ;;  %v6464_v8 = vld [vmem:[#allocation19 + $0x28c] sm:$0xf0] }
 0x30b   :  { %3643 = vmatpush.bf16.msrb.mxu3 %v5528_v58  ;;  %v5848_v21 = vor.u32 %v6464_v8, %v5847_v6  ;;  %v5708_v58 = vor.u32 %v6426_v7, %v5705_v54  ;;  %v6425_v6 = vld [vmem:[#allocation19 + $0x154] sm:$0xf0] }
 0x30d   :  { %3023 = vmatmul.bf16.vlgmr.msrb.gmra.mxu2 %v2414_v60  ;;  %v6382_v60 = vld [vmem:[#allocation19 + $0x4] sm:$0xf]  ;;  %3667 = vmatpush.bf16.msra.mxu1 %v5848_v21 }
 0x30e   :  { %3678 = vmatpush.bf16.msra.mxu2 %v5644_v9  ;;  %3653 = vmatpush.bf16.msra.mxu0 %v5720_v13  ;;  %v5532_v41 = vor.u32 %v6382_v60, %v5529_v36  ;;  %v6438_v9 = vld [vmem:[#allocation19 + $0x1c4] sm:$0xf]  ;;  %v5712_v60 = vor.u32 %v6429_v59, %v5711_v56  ;;  %v5567_v56 = vld [vmem:[#allocation19 + $0x48] sm:$0xf] }
 0x30f   :  { %3692 = vmatpush.bf16.msra.mxu3 %v5772_v1  ;;  %v5756_v13 = vor.u32 %v6438_v9, %v5753_v10  ;;  %v6462_v36 = vld [vmem:[#allocation19 + $0x284] sm:$0xf]  ;;  %v5833_v10 = vld [vmem:[#allocation19 + $0x270] sm:$0xf0] }
 0x310   :  { %v6422_v1 = vld [vmem:[#allocation19 + $0x144] sm:$0xf] }
 0x311   :  { %2995 = vmatmul.bf16.vlgmr.msrb.gmra.mxu0 %v7214_v0  ;;  %v5704_v0 = vor.u32 %v6428_v42, %v5703_v40  ;;  %v5815_v40 = vld [vmem:[#allocation19 + $0x240] sm:$0xf]  ;;  %v6456_v42 = vld [vmem:[#allocation19 + $0x24c] sm:$0xf0]  ;;  %v5692_v35 = vor.u32 %v6422_v1, %v5689_v3  ;;  %v6458_v21 = vld [vmem:[#allocation19 + $0x264] sm:$0xf] }
 0x312   :  { %3679 = vmatpush.bf16.msra.mxu2 %v5628_v34  ;;  %v5760_v34 = vor.u32 %v6441_v12, %v5759_v11  ;;  %v5836_v11 = vor.u32 %v6458_v21, %v5833_v10  ;;  %v6418_v12 = vld [vmem:[#allocation19 + $0x124] sm:$0xf] }
 0x313   :  { %3654 = vmatpush.bf16.msra.mxu0 %v5704_v0  ;;  %3693 = vmatpush.bf16.msra.mxu3 %v5756_v13  ;;  %v5816_v0 = vor.u32 %v6456_v42, %v5815_v40  ;;  %v5673_v13 = vld [vmem:[#allocation19 + $0x130] sm:$0xf0]  ;;  %v6450_v42 = vld [vmem:[#allocation19 + $0x224] sm:$0xf] }
 0x316   :  { %3680 = vmatpush.bf16.msra.mxu2 %v5612_v17  ;;  %v5656_v17 = vor.u32 %v6416_v16, %v5655_v15  ;;  %v5676_v15 = vor.u32 %v6418_v12, %v5673_v13  ;;  %v6409_v16 = vld [vmem:[#allocation19 + $0xd4] sm:$0xf0]  ;;  %v3029_v12 = vunpack.c.l.bf16 %v7179_v14 }
 0x317   :  { %3655 = vmatpush.bf16.msra.mxu0 %v5688_v53  ;;  %3694 = vmatpush.bf16.msra.mxu3 %v5740_v30  ;;  %v5800_v53 = vor.u32 %v6452_v32, %v5799_v38  ;;  %v5660_v30 = vor.u32 %v6414_v26, %v5657_v27  ;;  %v6397_v38 = vld [vmem:[#allocation19 + $0x74] sm:$0xf0]  ;;  %v6475_v26 = vld [vmem:[#allocation19 + $0x2ec] sm:$0xf]  ;;  %v5905_v27 = vld [vmem:[#allocation19 + $0x2f8] sm:$0xf0] }
 0x31a   :  { %3681 = vmatpush.bf16.msra.mxu2 %v5596_v46  ;;  %v5900_v46 = vor.u32 %v6474_v18, %v5897_v20  ;;  %v6421_v18 = vld [vmem:[#allocation19 + $0x134] sm:$0xf0] }
 0x31b   :  { %3656 = vmatpush.bf16.msra.mxu0 %v5672_v5  ;;  %3695 = vmatpush.bf16.msra.mxu3 %v5724_v45  ;;  %v5695_v5 = vld [vmem:[#allocation19 + $0x148] sm:$0xf] }
 0x31c   :  { %v5696_v9 = vor.u32 %v6425_v6, %v5695_v5  ;;  %v6385_v5 = vld [vmem:[#allocation19 + $0x14] sm:$0xf0] }
 0x31e   :  { %3682 = vmatpush.bf16.msra.mxu2 %v5580_v24  ;;  %v5832_v24 = vor.u32 %v6460_v29, %v5831_v23  ;;  %v6454_v23 = vld [vmem:[#allocation19 + $0x244] sm:$0xf]  ;;  %v5817_v29 = vld [vmem:[#allocation19 + $0x250] sm:$0xf0] }
 0x31f   :  { %3657 = vmatpush.bf16.msra.mxu0 %v5656_v17  ;;  %3696 = vmatpush.bf16.msra.mxu3 %v5708_v58  ;;  %v5679_v17 = vld [vmem:[#allocation19 + $0x128] sm:$0xf]  ;;  %v6393_v58 = vld [vmem:[#allocation19 + $0x54] sm:$0xf0] }
 0x320   :  { %3668 = vmatpush.bf16.msra.mxu1 %v5832_v24  ;;  %v5820_v24 = vor.u32 %v6454_v23, %v5817_v29 }
 0x322   :  { %3683 = vmatpush.bf16.msra.mxu2 %v5564_v39  ;;  %v5884_v39 = vor.u32 %v6470_v48, %v5881_v37  ;;  %v5616_v48 = vor.u32 %v6405_v31, %v5615_v28  ;;  %v6417_v37 = vld [vmem:[#allocation19 + $0x114] sm:$0xf0]  ;;  %v3030_v28 = vunpack.c.h.bf16 %v7179_v14 }
 0x323   :  { %3706 = vmatpush.bf16.msrb.mxu0 %v5900_v46  ;;  %3697 = vmatpush.bf16.msra.mxu3 %v5692_v35  ;;  %v5680_v46 = vor.u32 %v6421_v18, %v5679_v17  ;;  %v3032_v17 = vunpack.c.l.bf16 %v7182_v19 }
 0x324   :  { %3669 = vmatpush.bf16.msra.mxu1 %v5816_v0  ;;  %v5801_v0 = vld [vmem:[#allocation19 + $0x230] sm:$0xf0] }
 0x325   :  { %v5804_v45 = vor.u32 %v6450_v42, %v5801_v0  ;;  %v5887_v42 = vld [vmem:[#allocation19 + $0x2c8] sm:$0xf] }
 0x326   :  { %3684 = vmatpush.bf16.msra.mxu2 %v5548_v22  ;;  %v5868_v22 = vor.u32 %v6466_v50, %v5865_v51  ;;  %v5785_v50 = vld [vmem:[#allocation19 + $0x210] sm:$0xf0] }
 0x327   :  { %3707 = vmatpush.bf16.msrb.mxu0 %v5884_v39  ;;  %3698 = vmatpush.bf16.msra.mxu3 %v5676_v15 }
 0x328   :  { %3670 = vmatpush.bf16.msra.mxu1 %v5800_v53  ;;  %v7220_v53 = vld [vmem:[#allocation17] sm:$0x7] }
 0x329   :  { %v2513_v54 = vperm.slane %v7220_v53, 0  ;;  %v2514_v3 = vperm.slane %v7220_v53, 1 }
 0x32a   :  { %3685 = vmatpush.bf16.msra.mxu2 %v5532_v41  ;;  %v5852_v41 = vor.u32 %v6462_v36, %v5849_v61 }
 0x32b   :  { %3708 = vmatpush.bf16.msrb.mxu0 %v5868_v22  ;;  %3699 = vmatpush.bf16.msra.mxu3 %v5660_v30  ;;  %v5583_v22 = vld [vmem:[#allocation19 + $0x68] sm:$0xf] }
 0x32c   :  { %3671 = vmatpush.bf16.msra.mxu1 %v5784_v57  ;;  %v5584_v32 = vor.u32 %v6397_v38, %v5583_v22  ;;  %v6411_v38 = vld [vmem:[#allocation19 + $0xec] sm:$0xf] }
 0x32e   :  { %3734 = vmatpush.bf16.msrb.mxu2 %v5776_v4  ;;  %v6413_v4 = vld [vmem:[#allocation19 + $0xf4] sm:$0xf0] }
 0x32f   :  { %3709 = vmatpush.bf16.msrb.mxu0 %v5852_v41  ;;  %v5648_v8 = vor.u32 %v6413_v4, %v5647_v25  ;;  %v5551_v41 = vld [vmem:[#allocation19 + $0x28] sm:$0xf] }
 0x330   :  { %v5552_v57 = vor.u32 %v6389_v62, %v5551_v41  ;;  %v5535_v4 = vld [vmem:[#allocation19 + $0x8] sm:$0xf] }
 0x331   :  { %3720 = vmatpush.bf16.msrb.mxu1 %v5648_v8  ;;  %v5536_v6 = vor.u32 %v6385_v5, %v5535_v4  ;;  %v6463_v4 = vld [vmem:[#allocation19 + $0x28c] sm:$0xf]  ;;  %v5857_v5 = vld [vmem:[#allocation19 + $0x298] sm:$0xf0] }
 0x332   :  { %3735 = vmatpush.bf16.msrb.mxu2 %v5760_v34  ;;  %v5631_v34 = vld [vmem:[#allocation19 + $0xc8] sm:$0xf] }
 0x333   :  { %3710 = vmatpush.bf16.msrb.mxu0 %v5836_v11  ;;  %v5632_v20 = vor.u32 %v6409_v16, %v5631_v34 }
 0x335   :  { %3721 = vmatpush.bf16.msrb.mxu1 %v5632_v20  ;;  %v5903_v20 = vld [vmem:[#allocation19 + $0x2e8] sm:$0xf] }
 0x336   :  { %3736 = vmatpush.bf16.msrb.mxu2 %v5744_v33  ;;  %v5663_v33 = vld [vmem:[#allocation19 + $0x108] sm:$0xf] }
 0x337   :  { %3711 = vmatpush.bf16.msrb.mxu0 %v5820_v24  ;;  %v5664_v40 = vor.u32 %v6417_v37, %v5663_v33  ;;  %v6477_v24 = vld [vmem:[#allocation19 + $0x2f4] sm:$0xf0] }
 0x339   :  { %3722 = vmatpush.bf16.msrb.mxu1 %v5616_v48  ;;  %v2515_v48 = vperm.slane %v7220_v53, 2 }
 0x33a   :  { %3737 = vmatpush.bf16.msrb.mxu2 %v5728_v49  ;;  %v6446_v49 = vld [vmem:[#allocation19 + $0x204] sm:$0xf] }
 0x33b   :  { %3712 = vmatpush.bf16.msrb.mxu0 %v5804_v45  ;;  %v5788_v51 = vor.u32 %v6446_v49, %v5785_v50  ;;  %v6473_v45 = vld [vmem:[#allocation19 + $0x2d4] sm:$0xf0]  ;;  %v5889_v49 = vld [vmem:[#allocation19 + $0x2d8] sm:$0xf0] }
 0x33d   :  { %3723 = vmatpush.bf16.msrb.mxu1 %v5600_v47  ;;  %v6471_v47 = vld [vmem:[#allocation19 + $0x2cc] sm:$0xf] }
 0x33e   :  { %3738 = vmatpush.bf16.msrb.mxu2 %v5712_v60  ;;  %v5568_v60 = vor.u32 %v6393_v58, %v5567_v56  ;;  %v5871_v56 = vld [vmem:[#allocation19 + $0x2a8] sm:$0xf] }
 0x33f   :  { %3713 = vmatpush.bf16.msrb.mxu0 %v5788_v51 }
 0x341   :  { %3724 = vmatpush.bf16.msrb.mxu1 %v5584_v32  ;;  %v5649_v32 = vld [vmem:[#allocation19 + $0xf8] sm:$0xf0] }
 0x342   :  { %3739 = vmatpush.bf16.msrb.mxu2 %v5696_v9 }
 0x345   :  { %3725 = vmatpush.bf16.msrb.mxu1 %v5568_v60  ;;  %v6467_v60 = vld [vmem:[#allocation19 + $0x2ac] sm:$0xf] }
 0x346   :  { %3740 = vmatpush.bf16.msrb.mxu2 %v5680_v46 }
 0x349   :  { %3726 = vmatpush.bf16.msrb.mxu1 %v5552_v57  ;;  %v5633_v57 = vld [vmem:[#allocation19 + $0xd8] sm:$0xf0] }
 0x34a   :  { %3741 = vmatpush.bf16.msrb.mxu2 %v5664_v40  ;;  %v5908_v40 = vor.u32 %v6475_v26, %v5905_v27  ;;  %v3034_v27 = vunpack.c.l.bf16 %v7196_v55  ;;  %v6395_v55 = vld [vmem:[#allocation19 + $0x6c] sm:$0xf] }
 0x34d   :  { %3727 = vmatpush.bf16.msrb.mxu1 %v5536_v6 }
 0x36b   :  { %v2954_v59 = vpop.f32.mrf.mxu1 }
 0x36c   :  { %v2955_v10 = vadd.f32 %v2954_v59, %v2514_v3 }
 0x370   :  { %v2912_v39 = vpop.f32.mrf.mxu2  ;;  %v2926_v44 = vpop.f32.mrf.mxu3 }
 0x371   :  { %v2913_v61 = vadd.f32 %v2912_v39, %v2513_v54  ;;  %v5904_v39 = vor.u32 %v6477_v24, %v5903_v20  ;;  %v6459_v20 = vld [vmem:[#allocation19 + $0x26c] sm:$0xf] }
 0x373   :  { %v2927_v25 = vadd.f32 %v2926_v44, %v2913_v61  ;;  %v2956_v9 = vpop.f32.mrf.mxu1  ;;  %v3033_v44 = vunpack.c.h.bf16 %v7182_v19  ;;  %v6469_v19 = vld [vmem:[#allocation19 + $0x2b4] sm:$0xf0]  ;;  %v5652_v61 = vor.u32 %v6411_v38, %v5649_v32  ;;  %v6439_v32 = vld [vmem:[#allocation19 + $0x1cc] sm:$0xf] }
 0x374   :  { %v2957_v46 = vadd.f32 %v2956_v9, %v2514_v3  ;;  %v6453_v38 = vld [vmem:[#allocation19 + $0x234] sm:$0xf0] }
 0x378   :  { %v2914_v7 = vpop.f32.mrf.mxu2  ;;  %v2928_v36 = vpop.f32.mrf.mxu3 }
 0x379   :  { %v2915_v35 = vadd.f32 %v2914_v7, %v2513_v54  ;;  %v5888_v7 = vor.u32 %v6473_v45, %v5887_v42  ;;  %v5892_v54 = vor.u32 %v6471_v47, %v5889_v49  ;;  %v5585_v47 = vld [vmem:[#allocation19 + $0x78] sm:$0xf0] }
 0x37b   :  { %v2929_v11 = vadd.f32 %v2928_v36, %v2915_v35  ;;  %v3010_v50 = vpop.f32.mrf.mxu1  ;;  %v5873_v36 = vld [vmem:[#allocation19 + $0x2b8] sm:$0xf0]  ;;  %v6465_v35 = vld [vmem:[#allocation19 + $0x294] sm:$0xf0] }
 0x37c   :  { %v5876_v3 = vor.u32 %v6467_v60, %v5873_v36  ;;  %v5791_v36 = vld [vmem:[#allocation19 + $0x208] sm:$0xf] }
 0x37e   :  { %v2940_v63 = vpop.f32.mrf.mxu0 }
 0x37f   :  { %v2941_v8 = vadd.f32 %v2940_v63, %v2927_v25  ;;  %v6407_v63 = vld [vmem:[#allocation19 + $0xcc] sm:$0xf]  ;;  %v5855_v25 = vld [vmem:[#allocation19 + $0x288] sm:$0xf] }
 0x380   :  { %v2968_v1 = vpop.f32.mrf.mxu2 }
 0x381   :  { %v3035_v34 = vadd.f32 %v3029_v12, %v2941_v8  ;;  %v2969_v15 = vadd.f32 %v2968_v1, %v2955_v10  ;;  %v5872_v1 = vor.u32 %v6469_v19, %v5871_v56  ;;  %v5636_v8 = vor.u32 %v6407_v63, %v5633_v57  ;;  %v6403_v10 = vld [vmem:[#allocation19 + $0xac] sm:$0xf]  ;;  %v5809_v56 = vld [vmem:[#allocation19 + $0x238] sm:$0xf0] }
 0x382   :  { %v6391_v19 = vld [vmem:[#allocation19 + $0x4c] sm:$0xf]  ;;  %v5745_v57 = vld [vmem:[#allocation19 + $0x1b8] sm:$0xf0] }
 0x383   :  { %v3041_v30 = vmax.f32 %v3035_v34, 0.0  ;;  %v3012_v12 = vpop.f32.mrf.mxu1  ;;  %v5860_v34 = vor.u32 %v6463_v4, %v5857_v5  ;;  %v6435_v63 = vld [vmem:[#allocation19 + $0x1ac] sm:$0xf]  ;;  %v5553_v4 = vld [vmem:[#allocation19 + $0x38] sm:$0xf0] }
 0x384   :  { %v2982_v21 = vpop.f32.mrf.mxu3 }
 0x385   :  { %v2983_v23 = vadd.f32 %v2982_v21, %v2969_v15  ;;  %v5839_v15 = vld [vmem:[#allocation19 + $0x268] sm:$0xf] }
 0x386   :  { %v2942_v13 = vpop.f32.mrf.mxu0 }
 0x387   :  { %v2943_v16 = vadd.f32 %v2942_v13, %v2929_v11  ;;  %v3036_v0 = vadd.f32 %v3030_v28, %v2983_v23  ;;  %v5617_v11 = vld [vmem:[#allocation19 + $0xb8] sm:$0xf0]  ;;  %v5856_v13 = vor.u32 %v6465_v35, %v5855_v25  ;;  %v6399_v28 = vld [vmem:[#allocation19 + $0x8c] sm:$0xf] }
 0x388   :  { %v2970_v18 = vpop.f32.mrf.mxu2  ;;  %v5793_v25 = vld [vmem:[#allocation19 + $0x218] sm:$0xf0]  ;;  %v6387_v35 = vld [vmem:[#allocation19 + $0x2c] sm:$0xf] }
 0x389   :  { %v3038_v29 = vadd.f32 %v3032_v17, %v2943_v16  ;;  %v2971_v33 = vadd.f32 %v2970_v18, %v2957_v46  ;;  %v3042_v58 = vmax.f32 %v3036_v0, 0.0  ;;  %v3031_v16 = vunpack.c.l.bf16 %v7194_v2  ;;  %v6461_v18 = vld [vmem:[#allocation19 + $0x274] sm:$0xf0]  ;;  %v5841_v46 = vld [vmem:[#allocation19 + $0x278] sm:$0xf0] }
 0x38a   :  { %v6457_v2 = vld [vmem:[#allocation19 + $0x254] sm:$0xf0]  ;;  %v6455_v0 = vld [vmem:[#allocation19 + $0x24c] sm:$0xf] }
 0x38b   :  { %v3044_v31 = vmax.f32 %v3038_v29, 0.0  ;;  %v5620_v29 = vor.u32 %v6403_v10, %v5617_v11  ;;  %v5556_v10 = vor.u32 %v6387_v35, %v5553_v4  ;;  %v6383_v11 = vld [vmem:[#allocation19 + $0xc] sm:$0xf]  ;;  %v6497_v35 = vld [vmem:[#allocation20 + $0x98] sm:$0xff] }
 0x38c   :  { %v2984_v37 = vpop.f32.mrf.mxu3  ;;  %v6505_v4 = vld [vmem:[#allocation22 + $0x18] sm:$0xff] }
 0x38d   :  { %v7228_v52 = vpack.c.bf16 %v3044_v31, %v3041_v30  ;;  %v2985_v43 = vadd.f32 %v2984_v37, %v2971_v33  ;;  %v5601_v30 = vld [vmem:[#allocation19 + $0x98] sm:$0xf0]  ;;  %v5840_v31 = vor.u32 %v6461_v18, %v5839_v15  ;;  %v5844_v33 = vor.u32 %v6459_v20, %v5841_v46  ;;  %v6423_v18 = vld [vmem:[#allocation19 + $0x14c] sm:$0xf] }
 0x38e   :  { %v2996_v14 = vpop.f32.mrf.mxu0  ;;  %v5604_v42 = vor.u32 %v6399_v28, %v5601_v30  ;;  %v5713_v15 = vld [vmem:[#allocation19 + $0x178] sm:$0xf0] }
 0x38f   :  { %v3039_v51 = vadd.f32 %v3033_v44, %v2985_v43  ;;  %v2997_v22 = vadd.f32 %v2996_v14, %v2515_v48  ;;  %3644 = vmatmul.bf16.vlgmr.msrb.gmra.mxu3 %v7228_v52  ;;  %3686 = vmatmul.bf16.vlgmr.msra.gmra.mxu2 %v7228_v52  ;;  %v5825_v43 = vld [vmem:[#allocation19 + $0x258] sm:$0xf0]  ;;  %v5807_v14 = vld [vmem:[#allocation19 + $0x228] sm:$0xf] }
 0x390   :  { %v3024_v53 = vpop.f32.mrf.mxu2  ;;  %3748 = vmatpush.bf16.msrb.mxu3 %v5904_v39  ;;  %3790 = vmatpush.bf16.msra.mxu2 %v5908_v40  ;;  %v6443_v39 = vld [vmem:[#allocation19 + $0x1ec] sm:$0xf]  ;;  %v5777_v40 = vld [vmem:[#allocation19 + $0x1f8] sm:$0xf0] }
 0x391   :  { %v3045_v59 = vmax.f32 %v3039_v51, 0.0  ;;  %v3011_v62 = vadd.f32 %v3010_v50, %v2997_v22  ;;  %v5780_v50 = vor.u32 %v6443_v39, %v5777_v40  ;;  %v5828_v22 = vor.u32 %v6455_v0, %v5825_v43  ;;  %v5697_v20 = vld [vmem:[#allocation19 + $0x158] sm:$0xf0]  ;;  %v6490_v39 = vld [vmem:[#allocation20 + $0x60] sm:$0xff]  ;;  %v6488_v0 = vld [vmem:[#allocation20 + $0x50] sm:$0xff] }
 0x392   :  { %v5700_v46 = vor.u32 %v6423_v18, %v5697_v20  ;;  %v6485_v30 = vld [vmem:[#allocation20 + $0x38] sm:$0xff]  ;;  %v6479_v43 = vld [vmem:[#allocation20 + $0x8] sm:$0xff] }
 0x393   :  { %v7233_v41 = vpack.c.bf16 %v3045_v59, %v3042_v58  ;;  %v3025_v9 = vadd.f32 %v3024_v53, %v3011_v62  ;;  %v5761_v53 = vld [vmem:[#allocation19 + $0x1d8] sm:$0xf0]  ;;  %v5808_v59 = vor.u32 %v6453_v38, %v5807_v14  ;;  %v6449_v62 = vld [vmem:[#allocation19 + $0x214] sm:$0xf0]  ;;  %v6508_v38 = vld [vmem:[#allocation22 + $0x30] sm:$0xff] }
 0x394   :  { %3749 = vmatpush.bf16.msrb.mxu3 %v5888_v7  ;;  %3791 = vmatpush.bf16.msra.mxu2 %v5892_v54  ;;  %v5588_v7 = vor.u32 %v6395_v55, %v5585_v47  ;;  %v6451_v54 = vld [vmem:[#allocation19 + $0x22c] sm:$0xf]  ;;  %v5569_v58 = vld [vmem:[#allocation19 + $0x58] sm:$0xf0]  ;;  %v5764_v60 = vor.u32 %v6439_v32, %v5761_v53  ;;  %v5792_v5 = vor.u32 %v6449_v62, %v5791_v36  ;;  %v6478_v47 = vld [vmem:[#allocation20] sm:$0xff] }
 0x395   :  { %3658 = vmatmul.bf16.vlgmr.msra.gmra.mxu0 %v7233_v41  ;;  %v3037_v24 = vadd.f32 %v3031_v16, %v3025_v9  ;;  %v6431_v9 = vld [vmem:[#allocation19 + $0x18c] sm:$0xf]  ;;  %v6481_v40 = vld [vmem:[#allocation20 + $0x18] sm:$0xff]  ;;  %v7246_v32 = vld [vmem:[%s7276_s12] sm:$0xf] }
 0x396   :  { %v2998_v6 = vpop.f32.mrf.mxu0  ;;  %3762 = vmatpush.bf16.msra.mxu0 %v5652_v61  ;;  %v5812_v61 = vor.u32 %v6451_v54, %v5809_v56  ;;  %v6509_v14 = vld [vmem:[#allocation22 + $0x38] sm:$0xff]  ;;  %v3149_v54 = vperm.slane %v7246_v32, 1  ;;  %v6499_v56 = vld [vmem:[#allocation20 + $0xa8] sm:$0xff]  ;;  %v6506_v62 = vld [vmem:[#allocation22 + $0x20] sm:$0xff] }
 0x397   :  { %v2999_v21 = vadd.f32 %v2998_v6, %v2515_v48  ;;  %v5823_v48 = vld [vmem:[#allocation19 + $0x248] sm:$0xf]  ;;  %v3043_v44 = vmax.f32 %v3037_v24, 0.0  ;;  %v5748_v6 = vor.u32 %v6435_v63, %v5745_v57 }
 0x398   :  { %3750 = vmatpush.bf16.msrb.mxu3 %v5872_v1  ;;  %3792 = vmatpush.bf16.msra.mxu2 %v5876_v3  ;;  %v3026_v23 = vpop.f32.mrf.mxu2  ;;  %v5824_v49 = vor.u32 %v6457_v2, %v5823_v48  ;;  %v5572_v1 = vor.u32 %v6391_v19, %v5569_v58  ;;  %v6447_v3 = vld [vmem:[#allocation19 + $0x20c] sm:$0xf]  ;;  %v6492_v48 = vld [vmem:[#allocation20 + $0x70] sm:$0xff]  ;;  %v6482_v2 = vld [vmem:[#allocation20 + $0x20] sm:$0xff]  ;;  %v3148_v58 = vperm.slane %v7246_v32, 0 }
 0x399   :  { %v3013_v17 = vadd.f32 %v3012_v12, %v2999_v21  ;;  %v5729_v21 = vld [vmem:[#allocation19 + $0x198] sm:$0xf0]  ;;  %v6507_v19 = vld [vmem:[#allocation22 + $0x28] sm:$0xff] }
 0x39a   :  { %3763 = vmatpush.bf16.msra.mxu0 %v5636_v8  ;;  %v5796_v8 = vor.u32 %v6447_v3, %v5793_v25  ;;  %v5537_v12 = vld [vmem:[#allocation19 + $0x18] sm:$0xf0] }
 0x39b   :  { %v3027_v26 = vadd.f32 %v3026_v23, %v3013_v17  ;;  %v5540_v16 = vor.u32 %v6383_v11, %v5537_v12  ;;  %v6419_v23 = vld [vmem:[#allocation19 + $0x12c] sm:$0xf]  ;;  %v6496_v11 = vld [vmem:[#allocation20 + $0x90] sm:$0xff] }
 0x39c   :  { %3751 = vmatpush.bf16.msrb.mxu3 %v5856_v13  ;;  %3793 = vmatpush.bf16.msra.mxu2 %v5860_v34  ;;  %v5732_v13 = vor.u32 %v6431_v9, %v5729_v21  ;;  %v6427_v34 = vld [vmem:[#allocation19 + $0x16c] sm:$0xf]  ;;  %v6504_v12 = vld [vmem:[#allocation22 + $0x10] sm:$0xff] }
 0x39d   :  { %v3040_v37 = vadd.f32 %v3034_v27, %v3027_v26  ;;  %v5716_v17 = vor.u32 %v6427_v34, %v5713_v15  ;;  %v6415_v26 = vld [vmem:[#allocation19 + $0x10c] sm:$0xf]  ;;  %v5665_v27 = vld [vmem:[#allocation19 + $0x118] sm:$0xf0] }
 0x39e   :  { %3764 = vmatpush.bf16.msra.mxu0 %v5620_v29  ;;  %v5681_v29 = vld [vmem:[#allocation19 + $0x138] sm:$0xf0]  ;;  %v5668_v28 = vor.u32 %v6415_v26, %v5665_v27 }
 0x39f   :  { %v3046_v45 = vmax.f32 %v3040_v37, 0.0  ;;  %3700 = vmatmul.bf16.vlgmr.msra.gmra.mxu3 %v7233_v41  ;;  %3742 = vmatmul.bf16.vlgmr.msrb.gmra.mxu2 %v7233_v41  ;;  %v5684_v24 = vor.u32 %v6419_v23, %v5681_v29  ;;  %v6491_v37 = vld [vmem:[#allocation20 + $0x68] sm:$0xff] }
 0x3a0   :  { %3752 = vmatpush.bf16.msrb.mxu3 %v5840_v31  ;;  %3794 = vmatpush.bf16.msra.mxu2 %v5844_v33  ;;  %v6493_v31 = vld [vmem:[#allocation20 + $0x78] sm:$0xff]  ;;  %v6484_v33 = vld [vmem:[#allocation20 + $0x30] sm:$0xff]  ;;  %v6495_v23 = vld [vmem:[#allocation20 + $0x88] sm:$0xff] }
 0x3a1   :  { %v3049_v51 = vpack.c.bf16 %v3046_v45, %v3043_v44  ;;  %v6487_v44 = vld [vmem:[#allocation20 + $0x48] sm:$0xff] }
 0x3a2   :  { %3765 = vmatpush.bf16.msra.mxu0 %v5604_v42  ;;  %v6489_v42 = vld [vmem:[#allocation20 + $0x58] sm:$0xff]  ;;  %v6503_v29 = vld [vmem:[#allocation22 + $0x8] sm:$0xff] }
 0x3a3   :  { %3672 = vmatmul.bf16.vlgmr.msra.gmra.mxu1 %v3049_v51 }
 0x3a4   :  { %3753 = vmatpush.bf16.msrb.mxu3 %v5824_v49  ;;  %3776 = vmatpush.bf16.msra.mxu1 %v5780_v50  ;;  %v6486_v49 = vld [vmem:[#allocation20 + $0x40] sm:$0xff]  ;;  %v6501_v50 = vld [vmem:[#allocation20 + $0xb8] sm:$0xff] }
 0x3a5   :  { %3795 = vmatpush.bf16.msra.mxu2 %v5828_v22  ;;  %3714 = vmatmul.bf16.vlgmr.msrb.gmra.mxu0 %v3049_v51  ;;  %v6500_v22 = vld [vmem:[#allocation20 + $0xb0] sm:$0xff] }
 0x3a6   :  { %3766 = vmatpush.bf16.msra.mxu0 %v5588_v7 }
 0x3a8   :  { %3754 = vmatpush.bf16.msrb.mxu3 %v5808_v59  ;;  %3777 = vmatpush.bf16.msra.mxu1 %v5764_v60 }
 0x3a9   :  { %3796 = vmatpush.bf16.msra.mxu2 %v5812_v61  ;;  %v6498_v61 = vld [vmem:[#allocation20 + $0xa0] sm:$0xff] }
 0x3aa   :  { %3767 = vmatpush.bf16.msra.mxu0 %v5572_v1 }
 0x3ac   :  { %3755 = vmatpush.bf16.msrb.mxu3 %v5792_v5  ;;  %3778 = vmatpush.bf16.msra.mxu1 %v5748_v6 }
 0x3ad   :  { %3797 = vmatpush.bf16.msra.mxu2 %v5796_v8 }
 0x3ae   :  { %3768 = vmatpush.bf16.msra.mxu0 %v5556_v10 }
 0x3af   :  { %3756 = vmatmul.bf16.vlgmr.msrb.gmra.mxu3 %v3049_v51 }
 0x3b0   :  { %3798 = vmatmul.bf16.vlgmr.msra.gmra.mxu2 %v3049_v51  ;;  %3779 = vmatpush.bf16.msra.mxu1 %v5732_v13 }
 0x3b1   :  { %4028 = vmatpush.bf16.msra.mxu3 %v6485_v30  ;;  %4142 = vmatpush.bf16.msrb.mxu2 %v6509_v14 }
 0x3b2   :  { %3769 = vmatpush.bf16.msra.mxu0 %v5540_v16 }
 0x3b3   :  { %3728 = vmatmul.bf16.vlgmr.msrb.gmra.mxu1 %v7228_v52 }
 0x3b4   :  { %3780 = vmatpush.bf16.msra.mxu1 %v5716_v17 }
 0x3b5   :  { %3770 = vmatmul.bf16.vlgmr.msra.gmra.mxu0 %v7228_v52  ;;  %4029 = vmatpush.bf16.msra.mxu3 %v6484_v33  ;;  %v6483_v52 = vld [vmem:[#allocation20 + $0x28] sm:$0xff]  ;;  %v6502_v33 = vld [vmem:[#allocation22] sm:$0xff] }
 0x3b6   :  { %4042 = vmatpush.bf16.msrb.mxu0 %v6493_v31  ;;  %4143 = vmatpush.bf16.msrb.mxu2 %v6508_v38  ;;  %v6494_v31 = vld [vmem:[#allocation20 + $0x80] sm:$0xff] }
 0x3b8   :  { %3781 = vmatpush.bf16.msra.mxu1 %v5700_v46 }
 0x3b9   :  { %4030 = vmatpush.bf16.msra.mxu3 %v6483_v52 }
 0x3ba   :  { %4043 = vmatpush.bf16.msrb.mxu0 %v6492_v48  ;;  %4144 = vmatpush.bf16.msrb.mxu2 %v6507_v19 }
 0x3bc   :  { %3782 = vmatpush.bf16.msra.mxu1 %v5684_v24 }
 0x3bd   :  { %4031 = vmatpush.bf16.msra.mxu3 %v6482_v2 }
 0x3be   :  { %4044 = vmatpush.bf16.msrb.mxu0 %v6491_v37  ;;  %4145 = vmatpush.bf16.msrb.mxu2 %v6506_v62 }
 0x3c0   :  { %3783 = vmatpush.bf16.msra.mxu1 %v5668_v28 }
 0x3c1   :  { %4032 = vmatpush.bf16.msra.mxu3 %v6481_v40 }
 0x3c2   :  { %4045 = vmatpush.bf16.msrb.mxu0 %v6490_v39  ;;  %4146 = vmatpush.bf16.msrb.mxu2 %v6505_v4 }
 0x3c3   :  { %3784 = vmatmul.bf16.vlgmr.msra.gmra.mxu1 %v7233_v41  ;;  %v6480_v41 = vld [vmem:[#allocation20 + $0x10] sm:$0xff] }
 0x3c4   :  { %4056 = vmatpush.bf16.msrb.mxu1 %v6501_v50 }
 0x3c5   :  { %4033 = vmatpush.bf16.msra.mxu3 %v6480_v41 }
 0x3c6   :  { %4046 = vmatpush.bf16.msrb.mxu0 %v6489_v42  ;;  %4147 = vmatpush.bf16.msrb.mxu2 %v6504_v12  ;;  %v6513_v12 = vld [vmem:[#allocation23 + $0x18] sm:$0xff] }
 0x3c8   :  { %4057 = vmatpush.bf16.msrb.mxu1 %v6500_v22 }
 0x3c9   :  { %4034 = vmatpush.bf16.msra.mxu3 %v6479_v43  ;;  %v3150_v43 = vperm.slane %v7246_v32, 2 }
 0x3ca   :  { %4047 = vmatpush.bf16.msrb.mxu0 %v6488_v0  ;;  %4148 = vmatpush.bf16.msrb.mxu2 %v6503_v29 }
 0x3cc   :  { %4058 = vmatpush.bf16.msrb.mxu1 %v6499_v56 }
 0x3cd   :  { %4035 = vmatpush.bf16.msra.mxu3 %v6478_v47 }
 0x3ce   :  { %4048 = vmatpush.bf16.msrb.mxu0 %v6487_v44  ;;  %4149 = vmatpush.bf16.msrb.mxu2 %v6502_v33  ;;  %v3151_v44 = vperm.slane %v7246_v32, 3 }
 0x3d0   :  { %4059 = vmatpush.bf16.msrb.mxu1 %v6498_v61 }
 0x3d2   :  { %4049 = vmatpush.bf16.msrb.mxu0 %v6486_v49 }
 0x3d4   :  { %4060 = vmatpush.bf16.msrb.mxu1 %v6497_v35 }
 0x3d8   :  { %4061 = vmatpush.bf16.msrb.mxu1 %v6496_v11  ;;  %v6514_v11 = vld [vmem:[#allocation23 + $0x20] sm:$0xff] }
 0x3dc   :  { %4062 = vmatpush.bf16.msrb.mxu1 %v6495_v23 }
 0x3e0   :  { %4063 = vmatpush.bf16.msrb.mxu1 %v6494_v31 }
 0x412   :  { %v3645_v45 = vpop.f32.mrf.mxu3  ;;  %v3659_v55 = vpop.f32.mrf.mxu0 }
 0x413   :  { %v3687_v51 = vpop.f32.mrf.mxu2  ;;  %v3646_v1 = vadd.f32 %v3645_v45, %v3148_v58 }
 0x414   :  { %v3688_v60 = vadd.f32 %v3687_v51, %v3149_v54 }
 0x415   :  { %v3660_v5 = vadd.f32 %v3659_v55, %v3646_v1 }
 0x41a   :  { %v3647_v53 = vpop.f32.mrf.mxu3  ;;  %v3661_v7 = vpop.f32.mrf.mxu0 }
 0x41b   :  { %v3689_v36 = vpop.f32.mrf.mxu2  ;;  %v3648_v25 = vadd.f32 %v3647_v53, %v3148_v58 }
 0x41c   :  { %v3690_v21 = vadd.f32 %v3689_v36, %v3149_v54 }
 0x41d   :  { %v3662_v9 = vadd.f32 %v3661_v7, %v3648_v25 }
 0x420   :  { %v3673_v59 = vpop.f32.mrf.mxu1 }
 0x421   :  { %v3674_v10 = vadd.f32 %v3673_v59, %v3660_v5 }
 0x422   :  { %v3701_v63 = vpop.f32.mrf.mxu3  ;;  %v3715_v57 = vpop.f32.mrf.mxu0 }
 0x423   :  { %v3702_v3 = vadd.f32 %v3701_v63, %v3688_v60  ;;  %v3743_v17 = vpop.f32.mrf.mxu2  ;;  %v3804_v20 = vmax.f32 %v3674_v10, 0.0  ;;  %v6515_v10 = vld [vmem:[#allocation23 + $0x28] sm:$0xff] }
 0x425   :  { %v3716_v6 = vadd.f32 %v3715_v57, %v3702_v3 }
 0x427   :  { %v3805_v34 = vmax.f32 %v3716_v6, 0.0 }
 0x428   :  { %v3675_v8 = vpop.f32.mrf.mxu1 }
 0x429   :  { %v3676_v15 = vadd.f32 %v3675_v8, %v3662_v9  ;;  %v3812_v24 = vpack.c.bf16 %v3805_v34, %v3804_v20  ;;  %v6517_v9 = vld [vmem:[#allocation23 + $0x38] sm:$0xff]  ;;  %v6511_v34 = vld [vmem:[#allocation23 + $0x8] sm:$0xff] }
 0x42a   :  { %v3703_v13 = vpop.f32.mrf.mxu3  ;;  %v3717_v18 = vpop.f32.mrf.mxu0  ;;  %4227 = vmatpush.bf16.msrb.mxu3 %v6517_v9 }
 0x42b   :  { %v3704_v16 = vadd.f32 %v3703_v13, %v3690_v21  ;;  %v3808_v26 = vmax.f32 %v3676_v15, 0.0  ;;  %v3872_v48 = vunpack.c.l.b16 %v3812_v24  ;;  %v3873_v52 = vunpack.c.h.b16 %v3812_v24  ;;  %v3745_v42 = vpop.f32.mrf.mxu2  ;;  %v6516_v21 = vld [vmem:[#allocation23 + $0x30] sm:$0xff]  ;;  %v6510_v15 = vld [vmem:[#allocation23] sm:$0xff] }
 0x42c   :  { %v6512_v13 = vld [vmem:[#allocation23 + $0x10] sm:$0xff] }
 0x42d   :  { %v3718_v46 = vadd.f32 %v3717_v18, %v3704_v16 }
 0x42e   :  { %4228 = vmatpush.bf16.msrb.mxu3 %v6516_v21 }
 0x42f   :  { %v3809_v27 = vmax.f32 %v3718_v46, 0.0 }
 0x430   :  { %v3729_v28 = vpop.f32.mrf.mxu1 }
 0x431   :  { %v3814_v30 = vpack.c.bf16 %v3809_v27, %v3808_v26  ;;  %v3730_v55 = vadd.f32 %v3729_v28, %v3150_v43  ;;  %v6543_v28 = vld [vmem:[%s7282_s18] ss:$0 sm:$0xff] }
 0x432   :  { %v3771_v0 = vpop.f32.mrf.mxu0  ;;  %v3757_v45 = vpop.f32.mrf.mxu3  ;;  %4229 = vmatpush.bf16.msrb.mxu3 %v6515_v10 }
 0x433   :  { %v3875_v37 = vunpack.c.l.b16 %v3814_v30  ;;  %v3876_v2 = vunpack.c.h.b16 %v3814_v30  ;;  %v3772_v47 = vadd.f32 %v3771_v0, %v3151_v44  ;;  %v3799_v49 = vpop.f32.mrf.mxu2  ;;  %v3744_v22 = vadd.f32 %v3743_v17, %v3730_v55  ;;  %v6542_v17 = vld [vmem:[%s7280_s16] ss:$0 sm:$0xff]  ;;  %s6946_s16 = smov [#allocation25]  }
 0x434   :  { %v6541_v30 = vld [vmem:[%s7278_s14] ss:$0 sm:$0xff]  ;;  %s4251_s14 = sshll.u32 %s6946_s16, 4  ;;  %s4252_s14 = int_to_ptr.vmem [resolvable:$true] %s4251_s14 }
 0x435   :  { %v3878_v39 = vpack.c.b16 %v3875_v37, %v3872_v48  ;;  %v3879_v40 = vpack.c.b16 %v3876_v2, %v3873_v52  ;;  %v3758_v54 = vadd.f32 %v3757_v45, %v3744_v22 }
 0x436   :  { %4230 = vmatpush.bf16.msrb.mxu3 %v6514_v11 }
 0x437   :  { %4036 = vmatmul.bf16.vlgmr.msra.gmra.mxu3 %v3878_v39  ;;  %4050 = vmatmul.bf16.vlgmr.msrb.gmra.mxu0 %v3879_v40  ;;  %v3806_v32 = vmax.f32 %v3758_v54, 0.0 }
 0x438   :  { %v3731_v41 = vpop.f32.mrf.mxu1 }
 0x439   :  { %v3732_v14 = vadd.f32 %v3731_v41, %v3150_v43 }
 0x43a   :  { %v3773_v38 = vpop.f32.mrf.mxu0  ;;  %v3759_v19 = vpop.f32.mrf.mxu3  ;;  %4231 = vmatpush.bf16.msrb.mxu3 %v6513_v12 }
 0x43b   :  { %v3746_v53 = vadd.f32 %v3745_v42, %v3732_v14  ;;  %v3774_v56 = vadd.f32 %v3773_v38, %v3151_v44  ;;  %v3801_v61 = vpop.f32.mrf.mxu2 }
 0x43d   :  { %v3760_v59 = vadd.f32 %v3759_v19, %v3746_v53 }
 0x43e   :  { %4232 = vmatpush.bf16.msrb.mxu3 %v6512_v13 }
 0x43f   :  { %v3810_v63 = vmax.f32 %v3760_v59, 0.0 }
 0x440   :  { %v3785_v50 = vpop.f32.mrf.mxu1 }
 0x441   :  { %v3786_v51 = vadd.f32 %v3785_v50, %v3772_v47 }
 0x442   :  { %4233 = vmatpush.bf16.msrb.mxu3 %v6511_v34 }
 0x443   :  { %v3800_v7 = vadd.f32 %v3799_v49, %v3786_v51 }
 0x445   :  { %v3807_v60 = vmax.f32 %v3800_v7, 0.0 }
 0x446   :  { %4234 = vmatpush.bf16.msrb.mxu3 %v6510_v15 }
 0x447   :  { %v3813_v57 = vpack.c.bf16 %v3807_v60, %v3806_v32 }
 0x448   :  { %v3787_v58 = vpop.f32.mrf.mxu1 }
 0x449   :  { %v3788_v36 = vadd.f32 %v3787_v58, %v3774_v56  ;;  %v3874_v25 = vunpack.c.l.b16 %v3813_v57  ;;  %v4090_v35 = vunpack.c.h.b16 %v3813_v57 }
 0x44b   :  { %v3802_v62 = vadd.f32 %v3801_v61, %v3788_v36 }
 0x44d   :  { %v3811_v1 = vmax.f32 %v3802_v62, 0.0 }
 0x44f   :  { %v3815_v3 = vpack.c.bf16 %v3811_v1, %v3810_v63 }
 0x451   :  { %v3877_v4 = vunpack.c.l.b16 %v3815_v3  ;;  %v4091_v5 = vunpack.c.h.b16 %v3815_v3 }
 0x453   :  { %v3880_v6 = vpack.c.b16 %v3877_v4, %v3874_v25  ;;  %v4092_v8 = vpack.c.b16 %v4091_v5, %v4090_v35 }
 0x455   :  { %4064 = vmatmul.bf16.vlgmr.msrb.gmra.mxu1 %v3880_v6  ;;  %4150 = vmatmul.bf16.vlgmr.msrb.gmra.mxu2 %v4092_v8 }
 0x4b4   :  { %v4051_v52 = vpop.f32.mrf.mxu0 }
 0x4ba   :  { %v4037_v26 = vpop.f32.mrf.mxu3 }
 0x4bb   :  { %v4038_v48 = vadd.f32 %v6541_v30, %v4037_v26 }
 0x4bc   :  { %v4053_v44 = vpop.f32.mrf.mxu0 }
 0x4bd   :  { %v4052_v2 = vadd.f32 %v4051_v52, %v4038_v48 }
 0x4c2   :  { %v4039_v27 = vpop.f32.mrf.mxu3 }
 0x4c3   :  { %v4040_v0 = vadd.f32 %v6541_v30, %v4039_v27 }
 0x4c5   :  { %v4054_v55 = vadd.f32 %v4053_v44, %v4040_v0 }
 0x4d2   :  { %v4065_v37 = vpop.f32.mrf.mxu1 }
 0x4d3   :  { %v4066_v39 = vadd.f32 %v4065_v37, %v4052_v2 }
 0x4d8   :  { %v4151_v16 = vpop.f32.mrf.mxu2 }
 0x4d9   :  { %v4152_v18 = vadd.f32 %v6542_v17, %v4151_v16 }
 0x4da   :  { %v4067_v45 = vpop.f32.mrf.mxu1 }
 0x4db   :  { %v4156_v23 = vmax.f32 %v4152_v18, 0.0  ;;  %v4068_v47 = vadd.f32 %v4067_v45, %v4054_v55 }
 0x4e0   :  { %v4153_v20 = vpop.f32.mrf.mxu2 }
 0x4e1   :  { %v4154_v46 = vadd.f32 %v6542_v17, %v4153_v20 }
 0x4e3   :  { %v4157_v29 = vmax.f32 %v4154_v46, 0.0 }
 0x4e5   :  { %v4158_v24 = vpack.c.bf16 %v4157_v29, %v4156_v23 }
 0x4e7   :  { %4235 = vmatmul.bf16.vlgmr.msrb.gmra.mxu3 %v4158_v24 }
 0x56a   :  { %v4236_v31 = vpop.f32.mrf.mxu3 }
 0x56b   :  { %v4237_v33 = vadd.f32 %v6543_v28, %v4236_v31 }
 0x56d   :  { %6544 = vtanh.f32 %v4237_v33 }
 0x572   :  { %v4238_v40 = vpop.f32.mrf.mxu3 }
 0x573   :  { %v6545_v42 = vpop.eup %6544  ;;  %v4239_v41 = vadd.f32 %v6543_v28, %v4238_v40 }
 0x574   :  { %v4243_v43 = vadd.f32 %v6545_v42, %v4066_v39 }
 0x575   :  { %6546 = vtanh.f32 %v4239_v41 }
 0x576   :  { %4245 = vst [vmem:[#allocation25] sm:$0xff] %v4243_v43 }
 0x57b   :  { %v6547_v49 = vpop.eup %6546 }
 0x57c   :  { %v4244_v50 = vadd.f32 %v6547_v49, %v4068_v47 }
 0x57e   :  { %4246 = vst [vmem:[#allocation25 + $0x8] sm:$0xff] %v4244_v50 }
 0x57f   :  { %4259 = dma.vmem_to_hbm [thread:$0]  %s4252_s14, 256, %s4254_s28, [#allocation4], %s6947_s20, %s6947_s20, %s6948_s1  }
 0x580   :  { %6924 = dma.done.wait [#allocation4], 256  }
 0x581   :  { %6925 = vsyncadd [#allocation4], 4294967040 }
 0x582   :  { %4264 = vsyncpa [#allocation3], 1 }
 0x583   :  { %4265 = vsyncpa [#allocation6], 1 }
 0x584   :  { %4266 = vsyncpa [#allocation9], 1 }
 0x585   :  { %4267 = vsyncpa [#allocation12], 1 }
 0x586   :  { %4268 = vsyncpa [#allocation15], 1 }
 0x587   :  { %4269 = vsyncpa [#allocation18], 1 }
 0x588   :  { %4270 = vsyncpa [#allocation21], 1 }
 0x589   :  { %4271 = vsyncpa [#allocation24], 1 }
 0x58a   :  { %4272 = vsyncpa [#allocation4], 1 }

</bundles_post_ra>
